<compile_context>
chip_gen: v6e
topology: v6e:2x2x1
jax: 0.10.0
libtpu: 0.0.40
codegen_flags: <defaults>
</compile_context>

<pallas_src>
import functools

import jax
import jax.numpy as jnp
import numpy as np
from jax.experimental import pallas as pl
from jax.experimental.pallas import tpu as pltpu


FC1_TILE = 512                       # fc1 output-column tile per grid step (2048/512 = 4)


# ----------------------------------------------------------------------------
# Kernel A: conv1 (im2col matmul) + 2x2 maxpool + bias + ReLU
#   a1 rows are ordered (ri, rj, n, h12, w12) so the pool is a max over the
#   4 leading, contiguous row blocks of 144n rows each.
# ----------------------------------------------------------------------------
def _conv1_pool_kernel(a1_ref, w1_ref, b1_ref, o_ref, *, batch):
    m = 144 * batch                  # rows per pool-member block: (image, h12, w12)
    c1 = jnp.dot(a1_ref[...], w1_ref[...], preferred_element_type=jnp.float32)
    pooled = jnp.maximum(jnp.maximum(c1[0:m], c1[m:2 * m]),
                         jnp.maximum(c1[2 * m:3 * m], c1[3 * m:4 * m]))
    # Per-channel conv bias commutes with the max; torch applies ReLU after the pool.
    o_ref[...] = jnp.maximum(pooled + b1_ref[...], 0.0).astype(o_ref.dtype)


# ----------------------------------------------------------------------------
# Kernel B: conv2 + maxpool + ReLU + fc1 + ReLU + fc2, with wf1/wf2 streamed
# over a 4-step grid axis (fc1 output-column tiles).
#   a2 rows are ordered (pi, pj, s=h4*4+w4, n), columns (k=di*5+dj, c), so the
#   pool2 is a max over 4 contiguous row blocks of q=16n rows each.
# ----------------------------------------------------------------------------
def _conv2_fc_kernel(a2_ref, w2_ref, b2_ref, wf1_ref, bf1_ref, wf2_ref, bf2_ref,
                     out_ref, act_ref, p2_ref, *, batch):
    n = batch
    q = 16 * n
    j = pl.program_id(0)

    # ---- conv2 (single K=800 dot) + pool2 + bias + ReLU, only on step 0;
    # the (n, 1024) bf16 fc1 activation persists in scratch across grid steps.
    @pl.when(j == 0)
    def _conv_stage():
        c2 = jnp.dot(a2_ref[...], w2_ref[...], preferred_element_type=jnp.float32)
        pooled = jnp.maximum(jnp.maximum(c2[0:q], c2[q:2 * q]),
                             jnp.maximum(c2[2 * q:3 * q], c2[3 * q:4 * q]))
        p2_ref[...] = jnp.maximum(pooled + b2_ref[...], 0.0)        # (16n, 64), rows (s, n)
        # Scatter the 16 s-blocks into (n, 1024) fc1-activation columns s*64:(s+1)*64.
        # (wf1 rows were permuted in the wrapper to this (s, c) ordering, which also
        #  absorbs torch's (C, H, W) flatten.)
        for s in range(16):
            act_ref[:, s * 64:(s + 1) * 64] = (
                p2_ref[s * n:(s + 1) * n, :].astype(act_ref.dtype))

    # ---- fc1 tile (single K=1024 dot per 512-wide output tile) + ReLU
    h1 = jnp.maximum(
        jnp.dot(act_ref[...], wf1_ref[...], preferred_element_type=jnp.float32)
        + bf1_ref[...], 0.0).astype(jnp.bfloat16)                   # (n, FC1_TILE)

    # ---- fc2 partial product for this tile (K-accumulated into the resident output)
    part = jnp.dot(h1, wf2_ref[...], preferred_element_type=jnp.float32)  # (n, 128)

    @pl.when(j == 0)
    def _init_out():
        out_ref[...] = part + bf2_ref[...]

    @pl.when(j > 0)
    def _acc_out():
        out_ref[...] += part


# ----------------------------------------------------------------------------
# Wrapper-side layout glue (pure static slices / reshapes / transposes)
# ----------------------------------------------------------------------------
def _build_conv1_patches(x_nchw):
    """Compact conv1 im2col (576n, 32) bf16, rows ordered (ri, rj, n, h12, w12)."""
    n = x_nchw.shape[0]
    img = x_nchw[:, 0, :, :].astype(jnp.float32)                    # (N, 28, 28)
    pat = jnp.stack([img[:, ki:ki + 24, kj:kj + 24]
                     for ki in range(5) for kj in range(5)], axis=-1)  # (N,24,24,25)
    pat = pat.reshape(n, 12, 2, 12, 2, 25)                          # (n, h12, ri, w12, rj, k)
    pat = pat.transpose(2, 4, 0, 1, 3, 5)                           # (ri, rj, n, h12, w12, k)
    a1 = pat.reshape(4 * 144 * n, 25)
    return jnp.pad(a1, ((0, 0), (0, 7))).astype(jnp.bfloat16)       # K: 25 -> 32


def _build_conv2_slab(p1_flat, n):
    """conv2 im2col (64n, 800) from the pooled conv1 activation.

    Rows ordered (pi, pj, h4, w4, n) so pool2 is a 4-block max in-kernel;
    columns ordered (k = di*5 + dj, c) matching the packed w2."""
    p1 = p1_flat.reshape(n, 12, 12, 32)
    taps = jnp.stack([p1[:, di:di + 8, dj:dj + 8, :]
                      for di in range(5) for dj in range(5)], axis=3)  # (n,8,8,25,32)
    t = taps.reshape(n, 4, 2, 4, 2, 25, 32)                         # (n, h4, pi, w4, pj, k, c)
    t = t.transpose(2, 4, 1, 3, 0, 5, 6)                            # (pi, pj, h4, w4, n, k, c)
    return t.reshape(64 * n, 800)


@jax.jit
def conv_network_forward(x_nchw, params):
    n = x_nchw.shape[0]

    # ---- conv1 + pool1 + relu (Pallas kernel A)
    a1 = _build_conv1_patches(x_nchw)
    p1 = pl.pallas_call(
        functools.partial(_conv1_pool_kernel, batch=n),
        out_shape=jax.ShapeDtypeStruct((144 * n, 32), jnp.bfloat16),
        grid=(1,),
        in_specs=[pl.BlockSpec((576 * n, 32), lambda i: (0, 0)),
                  pl.BlockSpec((32, 32), lambda i: (0, 0)),
                  pl.BlockSpec((1, 32), lambda i: (0, 0))],
        out_specs=pl.BlockSpec((144 * n, 32), lambda i: (0, 0)),
        compiler_params=pltpu.CompilerParams(
            dimension_semantics=("arbitrary",)),
    )(a1, params["w1"], params["b1"])

    # ---- conv2 + pool2 + relu + fc1 + relu + fc2 (Pallas kernel B, streamed wf1)
    a2 = _build_conv2_slab(p1, n)
    n_tiles = 2048 // FC1_TILE
    out = pl.pallas_call(
        functools.partial(_conv2_fc_kernel, batch=n),
        out_shape=jax.ShapeDtypeStruct((n, 128), jnp.float32),
        grid=(n_tiles,),
        in_specs=[
            pl.BlockSpec((64 * n, 800), lambda j: (0, 0)),      # a2   (constant block)
            pl.BlockSpec((800, 64), lambda j: (0, 0)),          # w2   (constant block)
            pl.BlockSpec((1, 64), lambda j: (0, 0)),            # b2
            pl.BlockSpec((1024, FC1_TILE), lambda j: (0, j)),   # wf1  (streamed)
            pl.BlockSpec((1, FC1_TILE), lambda j: (0, j)),      # bf1  (streamed)
            pl.BlockSpec((FC1_TILE, 128), lambda j: (j, 0)),    # wf2  (streamed, K-tiled)
            pl.BlockSpec((1, 128), lambda j: (0, 0)),           # bf2
        ],
        out_specs=pl.BlockSpec((n, 128), lambda j: (0, 0)),     # resident accumulator
        scratch_shapes=[pltpu.VMEM((n, 1024), jnp.bfloat16),    # fc1 activation
                        pltpu.VMEM((16 * n, 64), jnp.float32)], # pool2 output
        compiler_params=pltpu.CompilerParams(
            dimension_semantics=("arbitrary",),                 # carries scratch + fc2 acc
            vmem_limit_bytes=16 * 1024 * 1024),
    )(a2, params["w2"], params["b2"], params["wf1"], params["bf1"],
      params["wf2"], params["bf2"])
    return out[:, :62]


# ----------------------------------------------------------------------------
# Parameter init (torch layouts) + packing into kernel layouts
# ----------------------------------------------------------------------------
def _pack_params(raw):
    w1, b1 = raw["w1"], raw["b1"]       # (32,1,5,5), (32,)
    w2, b2 = raw["w2"], raw["b2"]       # (64,32,5,5), (64,)
    wf1, bf1 = raw["wf1"], raw["bf1"]   # (2048,1024), (2048,)
    wf2, bf2 = raw["wf2"], raw["bf2"]   # (62,2048), (62,)

    w1k = jnp.transpose(w1, (2, 3, 1, 0)).reshape(25, 32)     # rows ki*5+kj
    w1k = jnp.pad(w1k, ((0, 7), (0, 0)))                      # K pad 25 -> 32
    w2k = jnp.transpose(w2, (2, 3, 1, 0)).reshape(800, 64)    # rows (di*5+dj)*32+c
    wf1k = (wf1.T.reshape(64, 16, 2048).transpose(1, 0, 2)
            .reshape(1024, 2048))                             # rows s*64+c (absorbs flatten)
    wf2k = jnp.pad(wf2.T, ((0, 0), (0, 66)))                  # cols 62 -> 128 (zeros)

    return dict(
        w1=w1k.astype(jnp.bfloat16),
        b1=b1.reshape(1, 32).astype(jnp.float32),
        w2=w2k.astype(jnp.bfloat16),
        b2=b2.reshape(1, 64).astype(jnp.float32),
        wf1=wf1k.astype(jnp.bfloat16),
        bf1=bf1.reshape(1, 2048).astype(jnp.float32),
        wf2=wf2k.astype(jnp.bfloat16),
        bf2=jnp.pad(bf2, (0, 66)).reshape(1, 128).astype(jnp.float32),
    )


def init_params(key):
    ks = jax.random.split(key, 8)

    def unif(k, shape, fan_in):
        bound = 1.0 / np.sqrt(fan_in)
        return jax.random.uniform(k, shape, jnp.float32, -bound, bound)

    raw = dict(
        w1=unif(ks[0], (32, 1, 5, 5), 25), b1=unif(ks[1], (32,), 25),
        w2=unif(ks[2], (64, 32, 5, 5), 800), b2=unif(ks[3], (64,), 800),
        wf1=unif(ks[4], (2048, 1024), 1024), bf1=unif(ks[5], (2048,), 1024),
        wf2=unif(ks[6], (62, 2048), 2048), bf2=unif(ks[7], (62,), 2048),
    )
    return _pack_params(raw), raw


# Pure-JAX f32 reference of the PyTorch forward (numerical sanity check).
def _reference_forward(x, raw):
    dn = ("NCHW", "OIHW", "NCHW")
    y = jax.lax.conv_general_dilated(x, raw["w1"], (1, 1), "VALID",
                                     dimension_numbers=dn)
    y = y + raw["b1"][None, :, None, None]
    y = jax.lax.reduce_window(y, -jnp.inf, jax.lax.max,
                              (1, 1, 2, 2), (1, 1, 2, 2), "VALID")
    y = jnp.maximum(y, 0.0)
    y = jax.lax.conv_general_dilated(y, raw["w2"], (1, 1), "VALID",
                                     dimension_numbers=dn)
    y = y + raw["b2"][None, :, None, None]
    y = jax.lax.reduce_window(y, -jnp.inf, jax.lax.max,
                              (1, 1, 2, 2), (1, 1, 2, 2), "VALID")
    f = y.reshape(y.shape[0], -1)                 # torch flatten (C, H, W)
    h = jnp.maximum(f, 0.0) @ raw["wf1"].T + raw["bf1"]
    return jnp.maximum(h, 0.0) @ raw["wf2"].T + raw["bf2"]


# TODO(synk): `featurize` (Normal rsample) and the unused softmax member are
# not part of forward(); not ported.

if __name__ == "__main__":
    key = jax.random.PRNGKey(0)
    k_x, k_p = jax.random.split(key)

    # Input shape forced by fc_1 (4*4*64 features): NCHW (N, 1, 28, 28), batch=2.
    x = jax.random.normal(k_x, (2, 1, 28, 28), dtype=jnp.float32)
    params, raw = init_params(k_p)

    out = conv_network_forward(x, params)
    jax.block_until_ready(out)
    assert out.shape == (2, 62), out.shape

    # Sanity check vs. f32 reference (bf16 weights/activations => ~1e-2 rel).
    ref = _reference_forward(x, raw)
    rel = float(jnp.linalg.norm(out - ref) / (jnp.linalg.norm(ref) + 1e-6))
    assert rel < 5e-2, rel

    print("KERNEL_OK")
</pallas_src>

<mosaic_0001>
module attributes {stable_mosaic.version = 11 : i64} {
  func.func @_conv1_pool_kernel(%arg0: i32, %arg1: memref<1152x32xbf16, #tpu.memory_space<vmem>>, %arg2: memref<32x32xbf16, #tpu.memory_space<vmem>>, %arg3: memref<1x32xf32, #tpu.memory_space<vmem>>, %arg4: memref<288x32xbf16, #tpu.memory_space<vmem>>) attributes {dimension_semantics = [#tpu.dimension_semantics<arbitrary>], iteration_bounds = array<i64: 1>, scalar_prefetch = 0 : i64, scratch_operands = 0 : i64, tpu.core_type = #tpu.core_type<tc>, window_params = [{pipeline_mode = #tpu.pipeline_mode<synchronous>, transform_indices = @transform_0, window_bounds = array<i64: 1152, 32>}, {pipeline_mode = #tpu.pipeline_mode<synchronous>, transform_indices = @transform_1, window_bounds = array<i64: 32, 32>}, {pipeline_mode = #tpu.pipeline_mode<synchronous>, transform_indices = @transform_2, window_bounds = array<i64: 1, 32>}, {pipeline_mode = #tpu.pipeline_mode<synchronous>, transform_indices = @transform_3, window_bounds = array<i64: 288, 32>}]} {
    %c0 = arith.constant 0 : index
    %c0_0 = arith.constant 0 : index
    %0 = vector.load %arg1[%c0, %c0_0] : memref<1152x32xbf16, #tpu.memory_space<vmem>>, vector<1152x32xbf16>
    %c0_1 = arith.constant 0 : index
    %c0_2 = arith.constant 0 : index
    %1 = vector.load %arg2[%c0_1, %c0_2] : memref<32x32xbf16, #tpu.memory_space<vmem>>, vector<32x32xbf16>
    %cst = arith.constant dense<0.000000e+00> : vector<1152x32xf32>
    %2 = tpu.matmul %0, %1, %cst {dimension_numbers = #tpu.dot_dimension_numbers<[1], [0], [0], [1], [0, 0, 1, 1], [], []>} : vector<1152x32xbf16>, vector<32x32xbf16>, vector<1152x32xf32> -> vector<1152x32xf32>
    %3 = vector.extract_strided_slice %2 {offsets = [0, 0], sizes = [288, 32], strides = [1, 1]} : vector<1152x32xf32> to vector<288x32xf32>
    %4 = vector.extract_strided_slice %2 {offsets = [288, 0], sizes = [288, 32], strides = [1, 1]} : vector<1152x32xf32> to vector<288x32xf32>
    %5 = arith.maximumf %3, %4 : vector<288x32xf32>
    %6 = vector.extract_strided_slice %2 {offsets = [576, 0], sizes = [288, 32], strides = [1, 1]} : vector<1152x32xf32> to vector<288x32xf32>
    %7 = vector.extract_strided_slice %2 {offsets = [864, 0], sizes = [288, 32], strides = [1, 1]} : vector<1152x32xf32> to vector<288x32xf32>
    %8 = arith.maximumf %6, %7 : vector<288x32xf32>
    %9 = arith.maximumf %5, %8 : vector<288x32xf32>
    %c0_3 = arith.constant 0 : index
    %c0_4 = arith.constant 0 : index
    %10 = vector.load %arg3[%c0_3, %c0_4] : memref<1x32xf32, #tpu.memory_space<vmem>>, vector<1x32xf32>
    %11 = vector.broadcast %10 : vector<1x32xf32> to vector<288x32xf32>
    %12 = arith.addf %9, %11 : vector<288x32xf32>
    %cst_5 = arith.constant 0.000000e+00 : f32
    %13 = vector.broadcast %cst_5 : f32 to vector<288x32xf32>
    %14 = arith.maximumf %12, %13 : vector<288x32xf32>
    %15 = arith.truncf %14 : vector<288x32xf32> to vector<288x32xbf16>
    %c0_6 = arith.constant 0 : index
    %c0_7 = arith.constant 0 : index
    %16 = vector.load %arg4[%c0_6, %c0_7] : memref<288x32xbf16, #tpu.memory_space<vmem>>, vector<288x32xbf16>
    tpu.vector_store %arg4[%c0_6, %c0_7], %15 {strides = array<i32>} : memref<288x32xbf16, #tpu.memory_space<vmem>>, vector<288x32xbf16>,
    return
  }
  func.func @transform_0(%arg0: i32) -> (i32, i32) {
    %c0_i32 = arith.constant 0 : i32
    %c0_i32_0 = arith.constant 0 : i32
    %c0_i32_1 = arith.constant 0 : i32
    return %c0_i32, %c0_i32_0 : i32, i32
  }
  func.func @transform_1(%arg0: i32) -> (i32, i32) {
    %c0_i32 = arith.constant 0 : i32
    %c0_i32_0 = arith.constant 0 : i32
    %c0_i32_1 = arith.constant 0 : i32
    return %c0_i32, %c0_i32_0 : i32, i32
  }
  func.func @transform_2(%arg0: i32) -> (i32, i32) {
    %c0_i32 = arith.constant 0 : i32
    %c0_i32_0 = arith.constant 0 : i32
    %c0_i32_1 = arith.constant 0 : i32
    return %c0_i32, %c0_i32_0 : i32, i32
  }
  func.func @transform_3(%arg0: i32) -> (i32, i32) {
    %c0_i32 = arith.constant 0 : i32
    %c0_i32_0 = arith.constant 0 : i32
    %c0_i32_1 = arith.constant 0 : i32
    return %c0_i32, %c0_i32_0 : i32, i32
  }
}

module attributes {stable_mosaic.version = 11 : i64} {
  func.func @_conv2_fc_kernel(%arg0: i32, %arg1: memref<128x800xbf16, #tpu.memory_space<vmem>>, %arg2: memref<800x64xbf16, #tpu.memory_space<vmem>>, %arg3: memref<1x64xf32, #tpu.memory_space<vmem>>, %arg4: memref<1024x512xbf16, #tpu.memory_space<vmem>>, %arg5: memref<1x512xf32, #tpu.memory_space<vmem>>, %arg6: memref<512x128xbf16, #tpu.memory_space<vmem>>, %arg7: memref<1x128xf32, #tpu.memory_space<vmem>>, %arg8: memref<2x128xf32, #tpu.memory_space<vmem>>, %arg9: memref<2x1024xbf16, #tpu.memory_space<vmem>>, %arg10: memref<32x64xf32, #tpu.memory_space<vmem>>) attributes {dimension_semantics = [#tpu.dimension_semantics<arbitrary>], iteration_bounds = array<i64: 4>, scalar_prefetch = 0 : i64, scratch_operands = 2 : i64, tpu.core_type = #tpu.core_type<tc>, window_params = [{pipeline_mode = #tpu.pipeline_mode<synchronous>, transform_indices = @transform_0, window_bounds = array<i64: 128, 800>}, {pipeline_mode = #tpu.pipeline_mode<synchronous>, transform_indices = @transform_1, window_bounds = array<i64: 800, 64>}, {pipeline_mode = #tpu.pipeline_mode<synchronous>, transform_indices = @transform_2, window_bounds = array<i64: 1, 64>}, {transform_indices = @transform_3, window_bounds = array<i64: 1024, 512>}, {transform_indices = @transform_4, window_bounds = array<i64: 1, 512>}, {transform_indices = @transform_5, window_bounds = array<i64: 512, 128>}, {pipeline_mode = #tpu.pipeline_mode<synchronous>, transform_indices = @transform_6, window_bounds = array<i64: 1, 128>}, {pipeline_mode = #tpu.pipeline_mode<synchronous>, transform_indices = @transform_7, window_bounds = array<i64: 2, 128>}]} {
    %c0_i32 = arith.constant 0 : i32
    %0 = arith.cmpi eq, %arg0, %c0_i32 : i32
    %1 = arith.extui %0 : i1 to i32
    %c0_i32_0 = arith.constant 0 : i32
    %2 = arith.cmpi ne, %1, %c0_i32_0 : i32
    scf.if %2 {
      %c0_14 = arith.constant 0 : index
      %c0_15 = arith.constant 0 : index
      %20 = vector.load %arg1[%c0_14, %c0_15] : memref<128x800xbf16, #tpu.memory_space<vmem>>, vector<128x800xbf16>
      %c0_16 = arith.constant 0 : index
      %c0_17 = arith.constant 0 : index
      %21 = vector.load %arg2[%c0_16, %c0_17] : memref<800x64xbf16, #tpu.memory_space<vmem>>, vector<800x64xbf16>
      %cst_18 = arith.constant dense<0.000000e+00> : vector<128x64xf32>
      %22 = tpu.matmul %20, %21, %cst_18 {dimension_numbers = #tpu.dot_dimension_numbers<[1], [0], [0], [1], [0, 0, 1, 1], [], []>} : vector<128x800xbf16>, vector<800x64xbf16>, vector<128x64xf32> -> vector<128x64xf32>
      %23 = vector.extract_strided_slice %22 {offsets = [0, 0], sizes = [32, 64], strides = [1, 1]} : vector<128x64xf32> to vector<32x64xf32>
      %24 = vector.extract_strided_slice %22 {offsets = [32, 0], sizes = [32, 64], strides = [1, 1]} : vector<128x64xf32> to vector<32x64xf32>
      %25 = arith.maximumf %23, %24 : vector<32x64xf32>
      %26 = vector.extract_strided_slice %22 {offsets = [64, 0], sizes = [32, 64], strides = [1, 1]} : vector<128x64xf32> to vector<32x64xf32>
      %27 = vector.extract_strided_slice %22 {offsets = [96, 0], sizes = [32, 64], strides = [1, 1]} : vector<128x64xf32> to vector<32x64xf32>
      %28 = arith.maximumf %26, %27 : vector<32x64xf32>
      %29 = arith.maximumf %25, %28 : vector<32x64xf32>
      %c0_19 = arith.constant 0 : index
      %c0_20 = arith.constant 0 : index
      %30 = vector.load %arg3[%c0_19, %c0_20] : memref<1x64xf32, #tpu.memory_space<vmem>>, vector<1x64xf32>
      %31 = vector.broadcast %30 : vector<1x64xf32> to vector<32x64xf32>
      %32 = arith.addf %29, %31 : vector<32x64xf32>
      %cst_21 = arith.constant 0.000000e+00 : f32
      %33 = vector.broadcast %cst_21 : f32 to vector<32x64xf32>
      %34 = arith.maximumf %32, %33 : vector<32x64xf32>
      %c0_22 = arith.constant 0 : index
      %c0_23 = arith.constant 0 : index
      %35 = vector.load %arg10[%c0_22, %c0_23] : memref<32x64xf32, #tpu.memory_space<vmem>>, vector<32x64xf32>
      tpu.vector_store %arg10[%c0_22, %c0_23], %34 {strides = array<i32>} : memref<32x64xf32, #tpu.memory_space<vmem>>, vector<32x64xf32>,
      %c0_24 = arith.constant 0 : index
      %c0_25 = arith.constant 0 : index
      %36 = vector.load %arg10[%c0_24, %c0_25] : memref<32x64xf32, #tpu.memory_space<vmem>>, vector<2x64xf32>
      %37 = arith.truncf %36 : vector<2x64xf32> to vector<2x64xbf16>
      %c0_26 = arith.constant 0 : index
      %c0_27 = arith.constant 0 : index
      %38 = vector.load %arg9[%c0_26, %c0_27] : memref<2x1024xbf16, #tpu.memory_space<vmem>>, vector<2x64xbf16>
      tpu.vector_store %arg9[%c0_26, %c0_27], %37 {strides = array<i32>} : memref<2x1024xbf16, #tpu.memory_space<vmem>>, vector<2x64xbf16>,
      %c2 = arith.constant 2 : index
      %c0_28 = arith.constant 0 : index
      %39 = vector.load %arg10[%c2, %c0_28] : memref<32x64xf32, #tpu.memory_space<vmem>>, vector<2x64xf32>
      %40 = arith.truncf %39 : vector<2x64xf32> to vector<2x64xbf16>
      %c0_29 = arith.constant 0 : index
      %c64 = arith.constant 64 : index
      %41 = vector.load %arg9[%c0_29, %c64] : memref<2x1024xbf16, #tpu.memory_space<vmem>>, vector<2x64xbf16>
      tpu.vector_store %arg9[%c0_29, %c64], %40 {strides = array<i32>} : memref<2x1024xbf16, #tpu.memory_space<vmem>>, vector<2x64xbf16>,
      %c4 = arith.constant 4 : index
      %c0_30 = arith.constant 0 : index
      %42 = vector.load %arg10[%c4, %c0_30] : memref<32x64xf32, #tpu.memory_space<vmem>>, vector<2x64xf32>
      %43 = arith.truncf %42 : vector<2x64xf32> to vector<2x64xbf16>
      %c0_31 = arith.constant 0 : index
      %c128 = arith.constant 128 : index
      %44 = vector.load %arg9[%c0_31, %c128] : memref<2x1024xbf16, #tpu.memory_space<vmem>>, vector<2x64xbf16>
      tpu.vector_store %arg9[%c0_31, %c128], %43 {strides = array<i32>} : memref<2x1024xbf16, #tpu.memory_space<vmem>>, vector<2x64xbf16>,
      %c6 = arith.constant 6 : index
      %c0_32 = arith.constant 0 : index
      %45 = vector.load %arg10[%c6, %c0_32] : memref<32x64xf32, #tpu.memory_space<vmem>>, vector<2x64xf32>
      %46 = arith.truncf %45 : vector<2x64xf32> to vector<2x64xbf16>
      %c0_33 = arith.constant 0 : index
      %c192 = arith.constant 192 : index
      %47 = vector.load %arg9[%c0_33, %c192] : memref<2x1024xbf16, #tpu.memory_space<vmem>>, vector<2x64xbf16>
      tpu.vector_store %arg9[%c0_33, %c192], %46 {strides = array<i32>} : memref<2x1024xbf16, #tpu.memory_space<vmem>>, vector<2x64xbf16>,
      %c8 = arith.constant 8 : index
      %c0_34 = arith.constant 0 : index
      %48 = vector.load %arg10[%c8, %c0_34] : memref<32x64xf32, #tpu.memory_space<vmem>>, vector<2x64xf32>
      %49 = arith.truncf %48 : vector<2x64xf32> to vector<2x64xbf16>
      %c0_35 = arith.constant 0 : index
      %c256 = arith.constant 256 : index
      %50 = vector.load %arg9[%c0_35, %c256] : memref<2x1024xbf16, #tpu.memory_space<vmem>>, vector<2x64xbf16>
      tpu.vector_store %arg9[%c0_35, %c256], %49 {strides = array<i32>} : memref<2x1024xbf16, #tpu.memory_space<vmem>>, vector<2x64xbf16>,
      %c10 = arith.constant 10 : index
      %c0_36 = arith.constant 0 : index
      %51 = vector.load %arg10[%c10, %c0_36] : memref<32x64xf32, #tpu.memory_space<vmem>>, vector<2x64xf32>
      %52 = arith.truncf %51 : vector<2x64xf32> to vector<2x64xbf16>
      %c0_37 = arith.constant 0 : index
      %c320 = arith.constant 320 : index
      %53 = vector.load %arg9[%c0_37, %c320] : memref<2x1024xbf16, #tpu.memory_space<vmem>>, vector<2x64xbf16>
      tpu.vector_store %arg9[%c0_37, %c320], %52 {strides = array<i32>} : memref<2x1024xbf16, #tpu.memory_space<vmem>>, vector<2x64xbf16>,
      %c12 = arith.constant 12 : index
      %c0_38 = arith.constant 0 : index
      %54 = vector.load %arg10[%c12, %c0_38] : memref<32x64xf32, #tpu.memory_space<vmem>>, vector<2x64xf32>
      %55 = arith.truncf %54 : vector<2x64xf32> to vector<2x64xbf16>
      %c0_39 = arith.constant 0 : index
      %c384 = arith.constant 384 : index
      %56 = vector.load %arg9[%c0_39, %c384] : memref<2x1024xbf16, #tpu.memory_space<vmem>>, vector<2x64xbf16>
      tpu.vector_store %arg9[%c0_39, %c384], %55 {strides = array<i32>} : memref<2x1024xbf16, #tpu.memory_space<vmem>>, vector<2x64xbf16>,
      %c14 = arith.constant 14 : index
      %c0_40 = arith.constant 0 : index
      %57 = vector.load %arg10[%c14, %c0_40] : memref<32x64xf32, #tpu.memory_space<vmem>>, vector<2x64xf32>
      %58 = arith.truncf %57 : vector<2x64xf32> to vector<2x64xbf16>
      %c0_41 = arith.constant 0 : index
      %c448 = arith.constant 448 : index
      %59 = vector.load %arg9[%c0_41, %c448] : memref<2x1024xbf16, #tpu.memory_space<vmem>>, vector<2x64xbf16>
      tpu.vector_store %arg9[%c0_41, %c448], %58 {strides = array<i32>} : memref<2x1024xbf16, #tpu.memory_space<vmem>>, vector<2x64xbf16>,
      %c16 = arith.constant 16 : index
      %c0_42 = arith.constant 0 : index
      %60 = vector.load %arg10[%c16, %c0_42] : memref<32x64xf32, #tpu.memory_space<vmem>>, vector<2x64xf32>
      %61 = arith.truncf %60 : vector<2x64xf32> to vector<2x64xbf16>
      %c0_43 = arith.constant 0 : index
      %c512 = arith.constant 512 : index
      %62 = vector.load %arg9[%c0_43, %c512] : memref<2x1024xbf16, #tpu.memory_space<vmem>>, vector<2x64xbf16>
      tpu.vector_store %arg9[%c0_43, %c512], %61 {strides = array<i32>} : memref<2x1024xbf16, #tpu.memory_space<vmem>>, vector<2x64xbf16>,
      %c18 = arith.constant 18 : index
      %c0_44 = arith.constant 0 : index
      %63 = vector.load %arg10[%c18, %c0_44] : memref<32x64xf32, #tpu.memory_space<vmem>>, vector<2x64xf32>
      %64 = arith.truncf %63 : vector<2x64xf32> to vector<2x64xbf16>
      %c0_45 = arith.constant 0 : index
      %c576 = arith.constant 576 : index
      %65 = vector.load %arg9[%c0_45, %c576] : memref<2x1024xbf16, #tpu.memory_space<vmem>>, vector<2x64xbf16>
      tpu.vector_store %arg9[%c0_45, %c576], %64 {strides = array<i32>} : memref<2x1024xbf16, #tpu.memory_space<vmem>>, vector<2x64xbf16>,
      %c20 = arith.constant 20 : index
      %c0_46 = arith.constant 0 : index
      %66 = vector.load %arg10[%c20, %c0_46] : memref<32x64xf32, #tpu.memory_space<vmem>>, vector<2x64xf32>
      %67 = arith.truncf %66 : vector<2x64xf32> to vector<2x64xbf16>
      %c0_47 = arith.constant 0 : index
      %c640 = arith.constant 640 : index
      %68 = vector.load %arg9[%c0_47, %c640] : memref<2x1024xbf16, #tpu.memory_space<vmem>>, vector<2x64xbf16>
      tpu.vector_store %arg9[%c0_47, %c640], %67 {strides = array<i32>} : memref<2x1024xbf16, #tpu.memory_space<vmem>>, vector<2x64xbf16>,
      %c22 = arith.constant 22 : index
      %c0_48 = arith.constant 0 : index
      %69 = vector.load %arg10[%c22, %c0_48] : memref<32x64xf32, #tpu.memory_space<vmem>>, vector<2x64xf32>
      %70 = arith.truncf %69 : vector<2x64xf32> to vector<2x64xbf16>
      %c0_49 = arith.constant 0 : index
      %c704 = arith.constant 704 : index
      %71 = vector.load %arg9[%c0_49, %c704] : memref<2x1024xbf16, #tpu.memory_space<vmem>>, vector<2x64xbf16>
      tpu.vector_store %arg9[%c0_49, %c704], %70 {strides = array<i32>} : memref<2x1024xbf16, #tpu.memory_space<vmem>>, vector<2x64xbf16>,
      %c24 = arith.constant 24 : index
      %c0_50 = arith.constant 0 : index
      %72 = vector.load %arg10[%c24, %c0_50] : memref<32x64xf32, #tpu.memory_space<vmem>>, vector<2x64xf32>
      %73 = arith.truncf %72 : vector<2x64xf32> to vector<2x64xbf16>
      %c0_51 = arith.constant 0 : index
      %c768 = arith.constant 768 : index
      %74 = vector.load %arg9[%c0_51, %c768] : memref<2x1024xbf16, #tpu.memory_space<vmem>>, vector<2x64xbf16>
      tpu.vector_store %arg9[%c0_51, %c768], %73 {strides = array<i32>} : memref<2x1024xbf16, #tpu.memory_space<vmem>>, vector<2x64xbf16>,
      %c26 = arith.constant 26 : index
      %c0_52 = arith.constant 0 : index
      %75 = vector.load %arg10[%c26, %c0_52] : memref<32x64xf32, #tpu.memory_space<vmem>>, vector<2x64xf32>
      %76 = arith.truncf %75 : vector<2x64xf32> to vector<2x64xbf16>
      %c0_53 = arith.constant 0 : index
      %c832 = arith.constant 832 : index
      %77 = vector.load %arg9[%c0_53, %c832] : memref<2x1024xbf16, #tpu.memory_space<vmem>>, vector<2x64xbf16>
      tpu.vector_store %arg9[%c0_53, %c832], %76 {strides = array<i32>} : memref<2x1024xbf16, #tpu.memory_space<vmem>>, vector<2x64xbf16>,
      %c28 = arith.constant 28 : index
      %c0_54 = arith.constant 0 : index
      %78 = vector.load %arg10[%c28, %c0_54] : memref<32x64xf32, #tpu.memory_space<vmem>>, vector<2x64xf32>
      %79 = arith.truncf %78 : vector<2x64xf32> to vector<2x64xbf16>
      %c0_55 = arith.constant 0 : index
      %c896 = arith.constant 896 : index
      %80 = vector.load %arg9[%c0_55, %c896] : memref<2x1024xbf16, #tpu.memory_space<vmem>>, vector<2x64xbf16>
      tpu.vector_store %arg9[%c0_55, %c896], %79 {strides = array<i32>} : memref<2x1024xbf16, #tpu.memory_space<vmem>>, vector<2x64xbf16>,
      %c30 = arith.constant 30 : index
      %c0_56 = arith.constant 0 : index
      %81 = vector.load %arg10[%c30, %c0_56] : memref<32x64xf32, #tpu.memory_space<vmem>>, vector<2x64xf32>
      %82 = arith.truncf %81 : vector<2x64xf32> to vector<2x64xbf16>
      %c0_57 = arith.constant 0 : index
      %c960 = arith.constant 960 : index
      %83 = vector.load %arg9[%c0_57, %c960] : memref<2x1024xbf16, #tpu.memory_space<vmem>>, vector<2x64xbf16>
      tpu.vector_store %arg9[%c0_57, %c960], %82 {strides = array<i32>} : memref<2x1024xbf16, #tpu.memory_space<vmem>>, vector<2x64xbf16>,
    } else {
    }
    %c0 = arith.constant 0 : index
    %c0_1 = arith.constant 0 : index
    %3 = vector.load %arg9[%c0, %c0_1] : memref<2x1024xbf16, #tpu.memory_space<vmem>>, vector<2x1024xbf16>
    %c0_2 = arith.constant 0 : index
    %c0_3 = arith.constant 0 : index
    %4 = vector.load %arg4[%c0_2, %c0_3] : memref<1024x512xbf16, #tpu.memory_space<vmem>>, vector<1024x512xbf16>
    %cst = arith.constant dense<0.000000e+00> : vector<2x512xf32>
    %5 = tpu.matmul %3, %4, %cst {dimension_numbers = #tpu.dot_dimension_numbers<[1], [0], [0], [1], [0, 0, 1, 1], [], []>} : vector<2x1024xbf16>, vector<1024x512xbf16>, vector<2x512xf32> -> vector<2x512xf32>
    %c0_4 = arith.constant 0 : index
    %c0_5 = arith.constant 0 : index
    %6 = vector.load %arg5[%c0_4, %c0_5] : memref<1x512xf32, #tpu.memory_space<vmem>>, vector<1x512xf32>
    %7 = vector.broadcast %6 : vector<1x512xf32> to vector<2x512xf32>
    %8 = arith.addf %5, %7 : vector<2x512xf32>
    %cst_6 = arith.constant 0.000000e+00 : f32
    %9 = vector.broadcast %cst_6 : f32 to vector<2x512xf32>
    %10 = arith.maximumf %8, %9 : vector<2x512xf32>
    %11 = arith.truncf %10 : vector<2x512xf32> to vector<2x512xbf16>
    %c0_7 = arith.constant 0 : index
    %c0_8 = arith.constant 0 : index
    %12 = vector.load %arg6[%c0_7, %c0_8] : memref<512x128xbf16, #tpu.memory_space<vmem>>, vector<512x128xbf16>
    %cst_9 = arith.constant dense<0.000000e+00> : vector<2x128xf32>
    %13 = tpu.matmul %11, %12, %cst_9 {dimension_numbers = #tpu.dot_dimension_numbers<[1], [0], [0], [1], [0, 0, 1, 1], [], []>} : vector<2x512xbf16>, vector<512x128xbf16>, vector<2x128xf32> -> vector<2x128xf32>
    %c0_i32_10 = arith.constant 0 : i32
    %14 = arith.cmpi eq, %arg0, %c0_i32_10 : i32
    %15 = arith.extui %14 : i1 to i32
    %c0_i32_11 = arith.constant 0 : i32
    %16 = arith.cmpi ne, %15, %c0_i32_11 : i32
    scf.if %16 {
      %c0_14 = arith.constant 0 : index
      %c0_15 = arith.constant 0 : index
      %20 = vector.load %arg7[%c0_14, %c0_15] : memref<1x128xf32, #tpu.memory_space<vmem>>, vector<1x128xf32>
      %21 = vector.broadcast %20 : vector<1x128xf32> to vector<2x128xf32>
      %22 = arith.addf %13, %21 : vector<2x128xf32>
      %c0_16 = arith.constant 0 : index
      %c0_17 = arith.constant 0 : index
      %23 = vector.load %arg8[%c0_16, %c0_17] : memref<2x128xf32, #tpu.memory_space<vmem>>, vector<2x128xf32>
      tpu.vector_store %arg8[%c0_16, %c0_17], %22 {strides = array<i32>} : memref<2x128xf32, #tpu.memory_space<vmem>>, vector<2x128xf32>,
    } else {
    }
    %c0_i32_12 = arith.constant 0 : i32
    %17 = arith.cmpi sgt, %arg0, %c0_i32_12 : i32
    %18 = arith.extui %17 : i1 to i32
    %c0_i32_13 = arith.constant 0 : i32
    %19 = arith.cmpi ne, %18, %c0_i32_13 : i32
    scf.if %19 {
      %c0_14 = arith.constant 0 : index
      %c0_15 = arith.constant 0 : index
      %20 = vector.load %arg8[%c0_14, %c0_15] : memref<2x128xf32, #tpu.memory_space<vmem>>, vector<2x128xf32>
      %21 = arith.addf %20, %13 : vector<2x128xf32>
      %c0_16 = arith.constant 0 : index
      %c0_17 = arith.constant 0 : index
      %22 = vector.load %arg8[%c0_16, %c0_17] : memref<2x128xf32, #tpu.memory_space<vmem>>, vector<2x128xf32>
      tpu.vector_store %arg8[%c0_16, %c0_17], %21 {strides = array<i32>} : memref<2x128xf32, #tpu.memory_space<vmem>>, vector<2x128xf32>,
    } else {
    }
    return
  }
  func.func @transform_0(%arg0: i32) -> (i32, i32) {
    %c0_i32 = arith.constant 0 : i32
    %c0_i32_0 = arith.constant 0 : i32
    %c0_i32_1 = arith.constant 0 : i32
    return %c0_i32, %c0_i32_0 : i32, i32
  }
  func.func @transform_1(%arg0: i32) -> (i32, i32) {
    %c0_i32 = arith.constant 0 : i32
    %c0_i32_0 = arith.constant 0 : i32
    %c0_i32_1 = arith.constant 0 : i32
    return %c0_i32, %c0_i32_0 : i32, i32
  }
  func.func @transform_2(%arg0: i32) -> (i32, i32) {
    %c0_i32 = arith.constant 0 : i32
    %c0_i32_0 = arith.constant 0 : i32
    %c0_i32_1 = arith.constant 0 : i32
    return %c0_i32, %c0_i32_0 : i32, i32
  }
  func.func @transform_3(%arg0: i32) -> (i32, i32) {
    %c0_i32 = arith.constant 0 : i32
    %c0_i32_0 = arith.constant 0 : i32
    return %c0_i32, %arg0 : i32, i32
  }
  func.func @transform_4(%arg0: i32) -> (i32, i32) {
    %c0_i32 = arith.constant 0 : i32
    %c0_i32_0 = arith.constant 0 : i32
    return %c0_i32, %arg0 : i32, i32
  }
  func.func @transform_5(%arg0: i32) -> (i32, i32) {
    %c0_i32 = arith.constant 0 : i32
    %c0_i32_0 = arith.constant 0 : i32
    return %arg0, %c0_i32 : i32, i32
  }
  func.func @transform_6(%arg0: i32) -> (i32, i32) {
    %c0_i32 = arith.constant 0 : i32
    %c0_i32_0 = arith.constant 0 : i32
    %c0_i32_1 = arith.constant 0 : i32
    return %c0_i32, %c0_i32_0 : i32, i32
  }
  func.func @transform_7(%arg0: i32) -> (i32, i32) {
    %c0_i32 = arith.constant 0 : i32
    %c0_i32_0 = arith.constant 0 : i32
    %c0_i32_1 = arith.constant 0 : i32
    return %c0_i32, %c0_i32_0 : i32, i32
  }
}

</mosaic_0001>

<bundles_post_ra>
// kernel: conv_network_forward.2
= control target key start
LH: loop header
LB: loop body
LE: loop exit
PB: predicated region body
PF: predicated region fallthrough
CT: control target
= control target key end

     0   :  { %vm535_vm0 = vcmask 261120   ;;  %vm1692_vm1 = vcmask 257024   ;;  %s2967_s1 = inlined_call_operand.vmem [shape: bf16[32,32], index: 1, kind: input, shape index: {}]   ;;  %s2968_s0 = inlined_call_operand.vmem [shape: bf16[1152,32], index: 0, kind: input, shape index: {}]   ;;  %s2969_s2 = inlined_call_operand.vmem [shape: f32[1,32], index: 2, kind: input, shape index: {}]   ;;  %s2970_s3 = inlined_call_operand.vmem [shape: bf16[288,32], index: 3, kind: output, shape index: {}]  }
   0x1   :  { %v2178_v0 = vld [vmem:[%s2967_s1 + $0x8] sm:$0xff]   ;;  %v2179_v1 = vld [vmem:[%s2967_s1] sm:$0xff]   ;;  %v2184_v6 = vld [vmem:[%s2968_s0 + $0x10] sm:$0xff]  }
   0x2   :  { %2026 = vmatprep.subr.bf16.mxu0 %v2178_v0  ;;  %2174 = vmatprep.subr.bf16.mxu1 %v2178_v0  ;;  %v2180_v2 = vld [vmem:[%s2968_s0] sm:$0xff]   ;;  %v2182_v4 = vld [vmem:[%s2968_s0 + $0x8] sm:$0xff]   ;;  %v2185_v7 = vld [vmem:[%s2968_s0 + $0x130] sm:$0xff]  }
   0x3   :  { %2027 = vmatpush3.bf16.msra.mxu0 %v2178_v0  ;;  %2176 = vmatpush3.bf16.msra.mxu1 %v2178_v0  ;;  %v2181_v3 = vld [vmem:[%s2968_s0 + $0x120] sm:$0xff]   ;;  %v2183_v5 = vld [vmem:[%s2968_s0 + $0x128] sm:$0xff]   ;;  %v2186_v8 = vld [vmem:[%s2968_s0 + $0x18] sm:$0xff]  }
   0x4   :  { %2028 = vmatprep.subr.bf16.mxu0 %v2179_v1  ;;  %2175 = vmatprep.subr.bf16.mxu1 %v2179_v1  ;;  %v2187_v9 = vld [vmem:[%s2968_s0 + $0x138] sm:$0xff]   ;;  %v2188_v10 = vld [vmem:[%s2968_s0 + $0x20] sm:$0xff]   ;;  %v2190_v12 = vld [vmem:[%s2968_s0 + $0x28] sm:$0xff]  }
   0x5   :  { %2030 = vmatprep.mubr.msk.bf16.mxu0 %vm535_vm0, %v2180_v2  ;;  %2102 = vmatprep.mubr.msk.bf16.mxu1 %vm535_vm0, %v2181_v3  ;;  %v2189_v11 = vld [vmem:[%s2968_s0 + $0x140] sm:$0xff]   ;;  %v2191_v13 = vld [vmem:[%s2968_s0 + $0x148] sm:$0xff]   ;;  %v2192_v14 = vld [vmem:[%s2968_s0 + $0x30] sm:$0xff]  }
   0x6   :  { %v2193_v15 = vld [vmem:[%s2968_s0 + $0x150] sm:$0xff]   ;;  %v2194_v16 = vld [vmem:[%s2968_s0 + $0x38] sm:$0xff]   ;;  %v2196_v18 = vld [vmem:[%s2968_s0 + $0x40] sm:$0xff]  }
   0x7   :  { %2029 = vmatpush3.bf16.msra.mxu0 %v2179_v1  ;;  %2177 = vmatpush3.bf16.msra.mxu1 %v2179_v1  ;;  %v2195_v17 = vld [vmem:[%s2968_s0 + $0x158] sm:$0xff]   ;;  %v2197_v19 = vld [vmem:[%s2968_s0 + $0x160] sm:$0xff]   ;;  %v2198_v20 = vld [vmem:[%s2968_s0 + $0x48] sm:$0xff]  }
   0x8   :  { %v2199_v21 = vld [vmem:[%s2968_s0 + $0x168] sm:$0xff]   ;;  %v2200_v22 = vld [vmem:[%s2968_s0 + $0x50] sm:$0xff]   ;;  %v2202_v24 = vld [vmem:[%s2968_s0 + $0x58] sm:$0xff]  }
   0x9   :  { %v2201_v23 = vld [vmem:[%s2968_s0 + $0x170] sm:$0xff]   ;;  %v2203_v25 = vld [vmem:[%s2968_s0 + $0x178] sm:$0xff]   ;;  %v2204_v26 = vld [vmem:[%s2968_s0 + $0x60] sm:$0xff]  }
   0xa   :  { %2031 = vmatmul.mubr.msk.bf16.vlgmr.msra.gmra.mxu0 %vm535_vm0, %v2182_v4  ;;  %2103 = vmatmul.mubr.msk.bf16.vlgmr.msra.gmra.mxu1 %vm535_vm0, %v2183_v5  ;;  %v2205_v27 = vld [vmem:[%s2968_s0 + $0x180] sm:$0xff]   ;;  %v2206_v28 = vld [vmem:[%s2968_s0 + $0x68] sm:$0xff]   ;;  %v2208_v30 = vld [vmem:[%s2968_s0 + $0x70] sm:$0xff]  }
   0xb   :  { %2034 = vmatprep.mubr.msk.bf16.mxu0 %vm535_vm0, %v2184_v6  ;;  %2106 = vmatprep.mubr.msk.bf16.mxu1 %vm535_vm0, %v2185_v7  ;;  %v2207_v29 = vld [vmem:[%s2968_s0 + $0x188] sm:$0xff]   ;;  %v2209_v31 = vld [vmem:[%s2968_s0 + $0x190] sm:$0xff]   ;;  %v2210_v32 = vld [vmem:[%s2968_s0 + $0x78] sm:$0xff]  }
   0xc   :  { %v2211_v33 = vld [vmem:[%s2968_s0 + $0x198] sm:$0xff]   ;;  %v2212_v34 = vld [vmem:[%s2968_s0 + $0x80] sm:$0xff]   ;;  %v2214_v36 = vld [vmem:[%s2968_s0 + $0x88] sm:$0xff]  }
   0xd   :  { %v2213_v35 = vld [vmem:[%s2968_s0 + $0x1a0] sm:$0xff]   ;;  %v2215_v37 = vld [vmem:[%s2968_s0 + $0x1a8] sm:$0xff]   ;;  %v2216_v38 = vld [vmem:[%s2968_s0 + $0x90] sm:$0xff]  }
   0xe   :  { %v2217_v39 = vld [vmem:[%s2968_s0 + $0x1b0] sm:$0xff]   ;;  %v2218_v40 = vld [vmem:[%s2968_s0 + $0x98] sm:$0xff]   ;;  %v2220_v42 = vld [vmem:[%s2968_s0 + $0xa0] sm:$0xff]  }
   0xf   :  { %v2219_v41 = vld [vmem:[%s2968_s0 + $0x1b8] sm:$0xff]   ;;  %v2221_v43 = vld [vmem:[%s2968_s0 + $0x1c0] sm:$0xff]   ;;  %v2222_v44 = vld [vmem:[%s2968_s0 + $0xa8] sm:$0xff]  }
  0x10   :  { %v2223_v45 = vld [vmem:[%s2968_s0 + $0x1c8] sm:$0xff]   ;;  %v2224_v46 = vld [vmem:[%s2968_s0 + $0xb0] sm:$0xff]   ;;  %v2226_v48 = vld [vmem:[%s2968_s0 + $0xb8] sm:$0xff]  }
  0x11   :  { %v2225_v47 = vld [vmem:[%s2968_s0 + $0x1d0] sm:$0xff]   ;;  %v2227_v49 = vld [vmem:[%s2968_s0 + $0x1d8] sm:$0xff]   ;;  %v2228_v50 = vld [vmem:[%s2968_s0 + $0xc0] sm:$0xff]  }
  0x12   :  { %2035 = vmatmul.mubr.msk.bf16.gmra.mxu0 %vm535_vm0, %v2186_v8  ;;  %2107 = vmatmul.mubr.msk.bf16.gmra.mxu1 %vm535_vm0, %v2187_v9  ;;  %v2229_v51 = vld [vmem:[%s2968_s0 + $0x1e0] sm:$0xff]   ;;  %v2230_v52 = vld [vmem:[%s2968_s0 + $0xc8] sm:$0xff]   ;;  %v2232_v54 = vld [vmem:[%s2968_s0 + $0xd0] sm:$0xff]  }
  0x13   :  { %2038 = vmatprep.mubr.msk.bf16.mxu0 %vm535_vm0, %v2188_v10  ;;  %2110 = vmatprep.mubr.msk.bf16.mxu1 %vm535_vm0, %v2189_v11  ;;  %v2231_v53 = vld [vmem:[%s2968_s0 + $0x1e8] sm:$0xff]   ;;  %v2233_v55 = vld [vmem:[%s2968_s0 + $0x1f0] sm:$0xff]   ;;  %v2234_v56 = vld [vmem:[%s2968_s0 + $0xd8] sm:$0xff]  }
  0x14   :  { %v2235_v57 = vld [vmem:[%s2968_s0 + $0x1f8] sm:$0xff]   ;;  %v2236_v58 = vld [vmem:[%s2968_s0 + $0xe0] sm:$0xff]   ;;  %v2238_v60 = vld [vmem:[%s2968_s0 + $0xe8] sm:$0xff]  }
  0x15   :  { %v2237_v59 = vld [vmem:[%s2968_s0 + $0x200] sm:$0xff]   ;;  %v2239_v61 = vld [vmem:[%s2968_s0 + $0x208] sm:$0xff]   ;;  %v2240_v62 = vld [vmem:[%s2968_s0 + $0xf0] sm:$0xff]  }
  0x16   :  { %v2241_v63 = vld [vmem:[%s2968_s0 + $0x210] sm:$0xff]   ;;  %v2242_v0 = vld [vmem:[%s2968_s0 + $0xf8] sm:$0xff]   ;;  %v2244_v2 = vld [vmem:[%s2968_s0 + $0x100] sm:$0xff]  }
  0x17   :  { %v2243_v1 = vld [vmem:[%s2968_s0 + $0x218] sm:$0xff]   ;;  %v2245_v3 = vld [vmem:[%s2968_s0 + $0x220] sm:$0xff]   ;;  %v2246_v4 = vld [vmem:[%s2968_s0 + $0x108] sm:$0xff]  }
  0x18   :  { %v2247_v5 = vld [vmem:[%s2968_s0 + $0x228] sm:$0xff]   ;;  %v2248_v6 = vld [vmem:[%s2968_s0 + $0x110] sm:$0xff]   ;;  %v2250_v8 = vld [vmem:[%s2968_s0 + $0x118] sm:$0xff]  }
  0x19   :  { %v2249_v7 = vld [vmem:[%s2968_s0 + $0x230] sm:$0xff]   ;;  %v2251_v9 = vld [vmem:[%s2968_s0 + $0x238] sm:$0xff]  }
  0x1a   :  { %2039 = vmatmul.mubr.msk.bf16.gmra.mxu0 %vm535_vm0, %v2190_v12  ;;  %2111 = vmatmul.mubr.msk.bf16.gmra.mxu1 %vm535_vm0, %v2191_v13 }
  0x1b   :  { %2042 = vmatprep.mubr.msk.bf16.mxu0 %vm535_vm0, %v2192_v14  ;;  %2114 = vmatprep.mubr.msk.bf16.mxu1 %vm535_vm0, %v2193_v15 }
  0x22   :  { %2043 = vmatmul.mubr.msk.bf16.gmra.mxu0 %vm535_vm0, %v2194_v16  ;;  %2115 = vmatmul.mubr.msk.bf16.gmra.mxu1 %vm535_vm0, %v2195_v17 }
  0x23   :  { %2046 = vmatprep.mubr.msk.bf16.mxu0 %vm535_vm0, %v2196_v18  ;;  %2118 = vmatprep.mubr.msk.bf16.mxu1 %vm535_vm0, %v2197_v19 }
  0x2a   :  { %2047 = vmatmul.mubr.msk.bf16.gmra.mxu0 %vm535_vm0, %v2198_v20  ;;  %2119 = vmatmul.mubr.msk.bf16.gmra.mxu1 %vm535_vm0, %v2199_v21 }
  0x2b   :  { %2050 = vmatprep.mubr.msk.bf16.mxu0 %vm535_vm0, %v2200_v22  ;;  %2122 = vmatprep.mubr.msk.bf16.mxu1 %vm535_vm0, %v2201_v23 }
  0x32   :  { %2051 = vmatmul.mubr.msk.bf16.gmra.mxu0 %vm535_vm0, %v2202_v24  ;;  %2123 = vmatmul.mubr.msk.bf16.gmra.mxu1 %vm535_vm0, %v2203_v25 }
  0x33   :  { %2054 = vmatprep.mubr.msk.bf16.mxu0 %vm535_vm0, %v2204_v26  ;;  %2126 = vmatprep.mubr.msk.bf16.mxu1 %vm535_vm0, %v2205_v27 }
  0x3a   :  { %2055 = vmatmul.mubr.msk.bf16.gmra.mxu0 %vm535_vm0, %v2206_v28  ;;  %2127 = vmatmul.mubr.msk.bf16.gmra.mxu1 %vm535_vm0, %v2207_v29 }
  0x3b   :  { %2058 = vmatprep.mubr.msk.bf16.mxu0 %vm535_vm0, %v2208_v30  ;;  %2130 = vmatprep.mubr.msk.bf16.mxu1 %vm535_vm0, %v2209_v31 }
  0x42   :  { %2059 = vmatmul.mubr.msk.bf16.gmra.mxu0 %vm535_vm0, %v2210_v32  ;;  %2131 = vmatmul.mubr.msk.bf16.gmra.mxu1 %vm535_vm0, %v2211_v33 }
  0x43   :  { %2062 = vmatprep.mubr.msk.bf16.mxu0 %vm535_vm0, %v2212_v34  ;;  %2134 = vmatprep.mubr.msk.bf16.mxu1 %vm535_vm0, %v2213_v35 }
  0x4a   :  { %2063 = vmatmul.mubr.msk.bf16.gmra.mxu0 %vm535_vm0, %v2214_v36  ;;  %2135 = vmatmul.mubr.msk.bf16.gmra.mxu1 %vm535_vm0, %v2215_v37 }
  0x4b   :  { %2066 = vmatprep.mubr.msk.bf16.mxu0 %vm535_vm0, %v2216_v38  ;;  %2138 = vmatprep.mubr.msk.bf16.mxu1 %vm535_vm0, %v2217_v39 }
  0x52   :  { %2067 = vmatmul.mubr.msk.bf16.gmra.mxu0 %vm535_vm0, %v2218_v40  ;;  %2139 = vmatmul.mubr.msk.bf16.gmra.mxu1 %vm535_vm0, %v2219_v41 }
  0x53   :  { %2070 = vmatprep.mubr.msk.bf16.mxu0 %vm535_vm0, %v2220_v42  ;;  %2142 = vmatprep.mubr.msk.bf16.mxu1 %vm535_vm0, %v2221_v43 }
  0x5a   :  { %2071 = vmatmul.mubr.msk.bf16.gmra.mxu0 %vm535_vm0, %v2222_v44  ;;  %2143 = vmatmul.mubr.msk.bf16.gmra.mxu1 %vm535_vm0, %v2223_v45 }
  0x5b   :  { %2074 = vmatprep.mubr.msk.bf16.mxu0 %vm535_vm0, %v2224_v46  ;;  %2146 = vmatprep.mubr.msk.bf16.mxu1 %vm535_vm0, %v2225_v47 }
  0x62   :  { %2075 = vmatmul.mubr.msk.bf16.gmra.mxu0 %vm535_vm0, %v2226_v48  ;;  %2147 = vmatmul.mubr.msk.bf16.gmra.mxu1 %vm535_vm0, %v2227_v49 }
  0x63   :  { %2078 = vmatprep.mubr.msk.bf16.mxu0 %vm535_vm0, %v2228_v50  ;;  %2150 = vmatprep.mubr.msk.bf16.mxu1 %vm535_vm0, %v2229_v51 }
  0x6a   :  { %2079 = vmatmul.mubr.msk.bf16.gmra.mxu0 %vm535_vm0, %v2230_v52  ;;  %2151 = vmatmul.mubr.msk.bf16.gmra.mxu1 %vm535_vm0, %v2231_v53 }
  0x6b   :  { %2082 = vmatprep.mubr.msk.bf16.mxu0 %vm535_vm0, %v2232_v54  ;;  %2154 = vmatprep.mubr.msk.bf16.mxu1 %vm535_vm0, %v2233_v55 }
  0x72   :  { %2083 = vmatmul.mubr.msk.bf16.gmra.mxu0 %vm535_vm0, %v2234_v56  ;;  %2155 = vmatmul.mubr.msk.bf16.gmra.mxu1 %vm535_vm0, %v2235_v57 }
  0x73   :  { %2086 = vmatprep.mubr.msk.bf16.mxu0 %vm535_vm0, %v2236_v58  ;;  %2158 = vmatprep.mubr.msk.bf16.mxu1 %vm535_vm0, %v2237_v59 }
  0x7a   :  { %2087 = vmatmul.mubr.msk.bf16.gmra.mxu0 %vm535_vm0, %v2238_v60  ;;  %2159 = vmatmul.mubr.msk.bf16.gmra.mxu1 %vm535_vm0, %v2239_v61 }
  0x7b   :  { %2090 = vmatprep.mubr.msk.bf16.mxu0 %vm535_vm0, %v2240_v62  ;;  %2162 = vmatprep.mubr.msk.bf16.mxu1 %vm535_vm0, %v2241_v63 }
  0x82   :  { %2091 = vmatmul.mubr.msk.bf16.gmra.mxu0 %vm535_vm0, %v2242_v0  ;;  %2163 = vmatmul.mubr.msk.bf16.gmra.mxu1 %vm535_vm0, %v2243_v1 }
  0x83   :  { %2094 = vmatprep.mubr.msk.bf16.mxu0 %vm535_vm0, %v2244_v2  ;;  %2166 = vmatprep.mubr.msk.bf16.mxu1 %vm535_vm0, %v2245_v3 }
  0x8a   :  { %2095 = vmatmul.mubr.msk.bf16.gmra.mxu0 %vm535_vm0, %v2246_v4  ;;  %2167 = vmatmul.mubr.msk.bf16.gmra.mxu1 %vm535_vm0, %v2247_v5 }
  0x8b   :  { %2098 = vmatprep.mubr.msk.bf16.mxu0 %vm535_vm0, %v2248_v6  ;;  %2170 = vmatprep.mubr.msk.bf16.mxu1 %vm535_vm0, %v2249_v7 }
  0x92   :  { %2099 = vmatmul.mubr.msk.bf16.gmra.mxu0 %vm535_vm0, %v2250_v8  ;;  %2171 = vmatmul.mubr.msk.bf16.gmra.mxu1 %vm535_vm0, %v2251_v9 }
  0xca   :  { %v2566_v10 = vpop.f32.mrf.mxu0  ;;  %v2568_v11 = vpop.f32.mrf.mxu1 }
  0xcc   :  { %v2570_v12 = vpop.f32.mrf.mxu0  ;;  %v2572_v13 = vpop.f32.mrf.mxu1 }
  0xce   :  { %v2574_v14 = vpop.f32.mrf.mxu0  ;;  %v2576_v15 = vpop.f32.mrf.mxu1 }
  0xd0   :  { %v2578_v16 = vpop.f32.mrf.mxu0  ;;  %v2580_v17 = vpop.f32.mrf.mxu1 }
  0xd2   :  { %v2582_v18 = vpop.f32.mrf.mxu0  ;;  %v2584_v19 = vpop.f32.mrf.mxu1 }
  0xd4   :  { %v2586_v20 = vpop.f32.mrf.mxu0  ;;  %v2588_v21 = vpop.f32.mrf.mxu1 }
  0xd6   :  { %v2590_v22 = vpop.f32.mrf.mxu0  ;;  %v2592_v23 = vpop.f32.mrf.mxu1 }
  0xd8   :  { %v2594_v24 = vpop.f32.mrf.mxu0  ;;  %v2596_v25 = vpop.f32.mrf.mxu1 }
  0xda   :  { %v2598_v26 = vpop.f32.mrf.mxu0  ;;  %v2600_v27 = vpop.f32.mrf.mxu1 }
  0xdc   :  { %v2602_v28 = vpop.f32.mrf.mxu0  ;;  %v2604_v29 = vpop.f32.mrf.mxu1 }
  0xde   :  { %v2606_v30 = vpop.f32.mrf.mxu0  ;;  %v2608_v31 = vpop.f32.mrf.mxu1 }
  0xe0   :  { %v2610_v32 = vpop.f32.mrf.mxu0  ;;  %v2612_v33 = vpop.f32.mrf.mxu1 }
  0xe2   :  { %v2614_v34 = vpop.f32.mrf.mxu0  ;;  %v2616_v35 = vpop.f32.mrf.mxu1 }
  0xe4   :  { %v2618_v36 = vpop.f32.mrf.mxu0  ;;  %v2620_v37 = vpop.f32.mrf.mxu1 }
  0xe6   :  { %v2622_v38 = vpop.f32.mrf.mxu0  ;;  %v2624_v39 = vpop.f32.mrf.mxu1 }
  0xe8   :  { %v2626_v40 = vpop.f32.mrf.mxu0  ;;  %v2628_v41 = vpop.f32.mrf.mxu1 }
  0xea   :  { %v2630_v42 = vpop.f32.mrf.mxu0  ;;  %v2632_v43 = vpop.f32.mrf.mxu1 }
  0xec   :  { %v2634_v44 = vpop.f32.mrf.mxu0  ;;  %v2636_v45 = vpop.f32.mrf.mxu1 }
  0xee   :  { %v2638_v46 = vpop.f32.mrf.mxu0  ;;  %v2640_v47 = vpop.f32.mrf.mxu1 }
  0xf0   :  { %v2642_v48 = vpop.f32.mrf.mxu0  ;;  %v2644_v49 = vpop.f32.mrf.mxu1 }
  0xf2   :  { %v2646_v50 = vpop.f32.mrf.mxu0  ;;  %v2648_v51 = vpop.f32.mrf.mxu1 }
  0xf4   :  { %v2650_v52 = vpop.f32.mrf.mxu0  ;;  %v2652_v53 = vpop.f32.mrf.mxu1 }
  0xf6   :  { %v2654_v54 = vpop.f32.mrf.mxu0  ;;  %v2656_v55 = vpop.f32.mrf.mxu1 }
  0xf8   :  { %v2658_v56 = vpop.f32.mrf.mxu0  ;;  %v2660_v57 = vpop.f32.mrf.mxu1 }
  0xf9   :  { %2971 = vst [vmem:[#allocation2_spill] sm:$0xff] %v2660_v57 }
  0xfa   :  { %v2662_v58 = vpop.f32.mrf.mxu0  ;;  %v2664_v59 = vpop.f32.mrf.mxu1 }
  0xfb   :  { %2972 = vst [vmem:[#allocation3_spill] sm:$0xff] %v2662_v58  ;;  %2973 = vst [vmem:[#allocation4_spill] sm:$0xff] %v2664_v59 }
  0xfc   :  { %v2666_v60 = vpop.f32.mrf.mxu0  ;;  %v2668_v61 = vpop.f32.mrf.mxu1 }
  0xfd   :  { %2974 = vst [vmem:[#allocation5_spill] sm:$0xff] %v2666_v60  ;;  %2975 = vst [vmem:[#allocation6_spill] sm:$0xff] %v2668_v61 }
  0xfe   :  { %v2670_v62 = vpop.f32.mrf.mxu0  ;;  %v2672_v63 = vpop.f32.mrf.mxu1 }
  0xff   :  { %2976 = vst [vmem:[#allocation7_spill] sm:$0xff] %v2670_v62  ;;  %2977 = vst [vmem:[#allocation8_spill] sm:$0xff] %v2672_v63 }
 0x100   :  { %v2674_v0 = vpop.f32.mrf.mxu0  ;;  %v2676_v1 = vpop.f32.mrf.mxu1 }
 0x101   :  { %2978 = vst [vmem:[#allocation9_spill] sm:$0xff] %v2674_v0  ;;  %2979 = vst [vmem:[#allocation10_spill] sm:$0xff] %v2676_v1 }
 0x102   :  { %v2678_v2 = vpop.f32.mrf.mxu0  ;;  %v2680_v3 = vpop.f32.mrf.mxu1 }
 0x103   :  { %2980 = vst [vmem:[#allocation11_spill] sm:$0xff] %v2678_v2  ;;  %2981 = vst [vmem:[#allocation12_spill] sm:$0xff] %v2680_v3 }
 0x104   :  { %v2682_v4 = vpop.f32.mrf.mxu0  ;;  %v2684_v5 = vpop.f32.mrf.mxu1 }
 0x105   :  { %2982 = vst [vmem:[#allocation13_spill] sm:$0xff] %v2682_v4  ;;  %2983 = vst [vmem:[#allocation14_spill] sm:$0xff] %v2684_v5 }
 0x106   :  { %v2686_v6 = vpop.f32.mrf.mxu0  ;;  %v2688_v7 = vpop.f32.mrf.mxu1 }
 0x107   :  { %2984 = vst [vmem:[#allocation15_spill] sm:$0xff] %v2686_v6  ;;  %2985 = vst [vmem:[#allocation16_spill] sm:$0xff] %v2688_v7 }
 0x108   :  { %v2690_v8 = vpop.f32.mrf.mxu0  ;;  %v2692_v9 = vpop.f32.mrf.mxu1 }
 0x109   :  { %2986 = vst [vmem:[#allocation17_spill] sm:$0xff] %v2690_v8  ;;  %2987 = vst [vmem:[#allocation18_spill] sm:$0xff] %v2692_v9 }
 0x10a   :  { %v2694_v63 = vpop.f32.mrf.mxu0  ;;  %v2696_v0 = vpop.f32.mrf.mxu1 }
 0x10b   :  { %2988 = vst [vmem:[#allocation19_spill] sm:$0xff] %v2694_v63  ;;  %2989 = vst [vmem:[#allocation20_spill] sm:$0xff] %v2696_v0 }
 0x10c   :  { %v2698_v1 = vpop.f32.mrf.mxu0  ;;  %v2700_v2 = vpop.f32.mrf.mxu1 }
 0x10d   :  { %2990 = vst [vmem:[#allocation21_spill] sm:$0xff] %v2698_v1  ;;  %2991 = vst [vmem:[#allocation22_spill] sm:$0xff] %v2700_v2  ;;  %v2715_v1 = vld [vmem:[%s2969_s2] ss:$0 sm:$0xff] }
 0x10e   :  { %v2702_v3 = vpop.f32.mrf.mxu0  ;;  %v2704_v4 = vpop.f32.mrf.mxu1 }
 0x10f   :  { %2992 = vst [vmem:[#allocation23_spill] sm:$0xff] %v2702_v3  ;;  %2993 = vst [vmem:[#allocation24_spill] sm:$0xff] %v2704_v4 }
 0x110   :  { %v2706_v5 = vpop.f32.mrf.mxu0  ;;  %v2708_v6 = vpop.f32.mrf.mxu1 }
 0x111   :  { %2994 = vst [vmem:[#allocation25_spill] sm:$0xff] %v2706_v5  ;;  %2995 = vst [vmem:[#allocation26_spill] sm:$0xff] %v2708_v6 }
 0x112   :  { %v2068_v7 = vpop.f32.mrf.mxu0  ;;  %v2140_v8 = vpop.f32.mrf.mxu1 }
 0x113   :  { %v1363_v9 = vmax.f32 %v2566_v10, %v2068_v7  ;;  %v1399_v63 = vmax.f32 %v2568_v11, %v2140_v8 }
 0x114   :  { %v930_v2 = vpop.f32.mrf.mxu0  ;;  %v1218_v0 = vpop.f32.mrf.mxu1 }
 0x115   :  { %v1435_v3 = vmax.f32 %v1363_v9, %v1399_v63  ;;  %v1361_v4 = vmax.f32 %v2570_v12, %v930_v2  ;;  %v1397_v5 = vmax.f32 %v2572_v13, %v1218_v0 }
 0x116   :  { %v2069_v62 = vpop.f32.mrf.mxu0  ;;  %v2141_v6 = vpop.f32.mrf.mxu1 }
 0x117   :  { %v1478_v61 = vadd.f32 %v2715_v1, %v1435_v3  ;;  %v1433_v60 = vmax.f32 %v1361_v4, %v1397_v5  ;;  %v1364_v10 = vmax.f32 %v2574_v14, %v2069_v62  ;;  %v1400_v11 = vmax.f32 %v2576_v15, %v2141_v6 }
 0x118   :  { %v933_v7 = vpop.f32.mrf.mxu0  ;;  %v1221_v8 = vpop.f32.mrf.mxu1 }
 0x119   :  { %v1514_v59 = vmax.f32 %v1478_v61, 0.0  ;;  %v1476_v58 = vadd.f32 %v2715_v1, %v1433_v60  ;;  %v1436_v57 = vmax.f32 %v1364_v10, %v1400_v11  ;;  %v1362_v63 = vmax.f32 %v2578_v16, %v933_v7 }
 0x11a   :  { %v1398_v12 = vmax.f32 %v2580_v17, %v1221_v8  ;;  %v2072_v13 = vpop.f32.mrf.mxu0  ;;  %v2144_v0 = vpop.f32.mrf.mxu1 }
 0x11b   :  { %v1918_v2 = vpack.c.bf16 %v1514_v59, %v1514_v59  ;;  %v1512_v3 = vmax.f32 %v1476_v58, 0.0  ;;  %v1479_v4 = vadd.f32 %v2715_v1, %v1436_v57  ;;  %v1367_v14 = vmax.f32 %v2582_v18, %v2072_v13 }
 0x11c   :  { %v1434_v15 = vmax.f32 %v1362_v63, %v1398_v12  ;;  %v1403_v62 = vmax.f32 %v2584_v19, %v2144_v0  ;;  %v946_v61 = vpop.f32.mrf.mxu0  ;;  %v1234_v5 = vpop.f32.mrf.mxu1 }
 0x11d   :  { %1695 = vst.msk [vmem:[%s2970_s3 + $0x8] sm:$0xf] %vm1692_vm1, %v1918_v2  ;;  %v1916_v16 = vpack.c.bf16 %v1512_v3, %v1512_v3  ;;  %v1515_v17 = vmax.f32 %v1479_v4, 0.0  ;;  %v1365_v60 = vmax.f32 %v2586_v20, %v946_v61  ;;  %v1401_v58 = vmax.f32 %v2588_v21, %v1234_v5 }
 0x11e   :  { %v1477_v57 = vadd.f32 %v2715_v1, %v1434_v15  ;;  %v1439_v59 = vmax.f32 %v1367_v14, %v1403_v62  ;;  %v2073_v18 = vpop.f32.mrf.mxu0  ;;  %v2145_v6 = vpop.f32.mrf.mxu1 }
 0x11f   :  { %1693 = vst.msk [vmem:[%s2970_s3] sm:$0xf] %vm1692_vm1, %v1916_v16  ;;  %v1919_v19 = vpack.c.bf16 %v1515_v17, %v1515_v17  ;;  %v1437_v9 = vmax.f32 %v1365_v60, %v1401_v58  ;;  %v1368_v10 = vmax.f32 %v2590_v22, %v2073_v18  ;;  %v1404_v11 = vmax.f32 %v2592_v23, %v2145_v6 }
 0x120   :  { %v1513_v7 = vmax.f32 %v1477_v57, 0.0  ;;  %v1482_v20 = vadd.f32 %v2715_v1, %v1439_v59  ;;  %v949_v21 = vpop.f32.mrf.mxu0  ;;  %v1237_v8 = vpop.f32.mrf.mxu1 }
 0x121   :  { %1696 = vst.msk [vmem:[%s2970_s3 + $0xc] sm:$0xf] %vm1692_vm1, %v1919_v19  ;;  %v1480_v63 = vadd.f32 %v2715_v1, %v1437_v9  ;;  %v1440_v12 = vmax.f32 %v1368_v10, %v1404_v11  ;;  %v1366_v13 = vmax.f32 %v2594_v24, %v949_v21  ;;  %v1402_v0 = vmax.f32 %v2596_v25, %v1237_v8 }
 0x122   :  { %v1917_v22 = vpack.c.bf16 %v1513_v7, %v1513_v7  ;;  %v1518_v2 = vmax.f32 %v1482_v20, 0.0  ;;  %v2076_v23 = vpop.f32.mrf.mxu0  ;;  %v2148_v3 = vpop.f32.mrf.mxu1 }
 0x123   :  { %v1516_v4 = vmax.f32 %v1480_v63, 0.0  ;;  %v1483_v14 = vadd.f32 %v2715_v1, %v1440_v12  ;;  %v1438_v15 = vmax.f32 %v1366_v13, %v1402_v0  ;;  %v1371_v62 = vmax.f32 %v2598_v26, %v2076_v23 }
 0x124   :  { %1694 = vst.msk [vmem:[%s2970_s3 + $0x4] sm:$0xf] %vm1692_vm1, %v1917_v22  ;;  %v1922_v61 = vpack.c.bf16 %v1518_v2, %v1518_v2  ;;  %v1407_v24 = vmax.f32 %v2600_v27, %v2148_v3  ;;  %v962_v5 = vpop.f32.mrf.mxu0  ;;  %v1250_v25 = vpop.f32.mrf.mxu1 }
 0x125   :  { %v1920_v16 = vpack.c.bf16 %v1516_v4, %v1516_v4  ;;  %v1519_v17 = vmax.f32 %v1483_v14, 0.0  ;;  %v1481_v60 = vadd.f32 %v2715_v1, %v1438_v15  ;;  %v1369_v58 = vmax.f32 %v2602_v28, %v962_v5 }
 0x126   :  { %1699 = vst.msk [vmem:[%s2970_s3 + $0x18] sm:$0xf] %vm1692_vm1, %v1922_v61  ;;  %v1443_v26 = vmax.f32 %v1371_v62, %v1407_v24  ;;  %v1405_v57 = vmax.f32 %v2604_v29, %v1250_v25  ;;  %v2077_v59 = vpop.f32.mrf.mxu0  ;;  %v2149_v18 = vpop.f32.mrf.mxu1 }
 0x127   :  { %1697 = vst.msk [vmem:[%s2970_s3 + $0x10] sm:$0xf] %vm1692_vm1, %v1920_v16  ;;  %v1923_v27 = vpack.c.bf16 %v1519_v17, %v1519_v17  ;;  %v1517_v6 = vmax.f32 %v1481_v60, 0.0  ;;  %v1372_v19 = vmax.f32 %v2606_v30, %v2077_v59  ;;  %v1408_v28 = vmax.f32 %v2608_v31, %v2149_v18 }
 0x128   :  { %v1486_v9 = vadd.f32 %v2715_v1, %v1443_v26  ;;  %v1441_v10 = vmax.f32 %v1369_v58, %v1405_v57  ;;  %v965_v11 = vpop.f32.mrf.mxu0  ;;  %v1253_v7 = vpop.f32.mrf.mxu1 }
 0x129   :  { %1700 = vst.msk [vmem:[%s2970_s3 + $0x1c] sm:$0xf] %vm1692_vm1, %v1923_v27  ;;  %v1921_v29 = vpack.c.bf16 %v1517_v6, %v1517_v6  ;;  %v1444_v20 = vmax.f32 %v1372_v19, %v1408_v28  ;;  %v1370_v21 = vmax.f32 %v2610_v32, %v965_v11  ;;  %v1406_v8 = vmax.f32 %v2612_v33, %v1253_v7 }
 0x12a   :  { %v1522_v63 = vmax.f32 %v1486_v9, 0.0  ;;  %v1484_v30 = vadd.f32 %v2715_v1, %v1441_v10  ;;  %v2080_v31 = vpop.f32.mrf.mxu0  ;;  %v2152_v12 = vpop.f32.mrf.mxu1 }
 0x12b   :  { %1698 = vst.msk [vmem:[%s2970_s3 + $0x14] sm:$0xf] %vm1692_vm1, %v1921_v29  ;;  %v1487_v13 = vadd.f32 %v2715_v1, %v1444_v20  ;;  %v1442_v0 = vmax.f32 %v1370_v21, %v1406_v8  ;;  %v1375_v22 = vmax.f32 %v2614_v34, %v2080_v31  ;;  %v1411_v2 = vmax.f32 %v2616_v35, %v2152_v12 }
 0x12c   :  { %v1926_v32 = vpack.c.bf16 %v1522_v63, %v1522_v63  ;;  %v1520_v23 = vmax.f32 %v1484_v30, 0.0  ;;  %v978_v33 = vpop.f32.mrf.mxu0  ;;  %v1266_v3 = vpop.f32.mrf.mxu1 }
 0x12d   :  { %v1523_v4 = vmax.f32 %v1487_v13, 0.0  ;;  %v1485_v14 = vadd.f32 %v2715_v1, %v1442_v0  ;;  %v1447_v15 = vmax.f32 %v1375_v22, %v1411_v2  ;;  %v1373_v62 = vmax.f32 %v2618_v36, %v978_v33 }
 0x12e   :  { %1703 = vst.msk [vmem:[%s2970_s3 + $0x28] sm:$0xf] %vm1692_vm1, %v1926_v32  ;;  %v1924_v61 = vpack.c.bf16 %v1520_v23, %v1520_v23  ;;  %v1409_v34 = vmax.f32 %v2620_v37, %v1266_v3  ;;  %v2081_v24 = vpop.f32.mrf.mxu0  ;;  %v2153_v35 = vpop.f32.mrf.mxu1 }
 0x12f   :  { %v1927_v5 = vpack.c.bf16 %v1523_v4, %v1523_v4  ;;  %v1521_v25 = vmax.f32 %v1485_v14, 0.0  ;;  %v1490_v16 = vadd.f32 %v2715_v1, %v1447_v15  ;;  %v1376_v17 = vmax.f32 %v2622_v38, %v2081_v24 }
 0x130   :  { %1701 = vst.msk [vmem:[%s2970_s3 + $0x20] sm:$0xf] %vm1692_vm1, %v1924_v61  ;;  %v1445_v36 = vmax.f32 %v1373_v62, %v1409_v34  ;;  %v1412_v60 = vmax.f32 %v2624_v39, %v2153_v35  ;;  %v981_v58 = vpop.f32.mrf.mxu0  ;;  %v1269_v26 = vpop.f32.mrf.mxu1 }
 0x131   :  { %1704 = vst.msk [vmem:[%s2970_s3 + $0x2c] sm:$0xf] %vm1692_vm1, %v1927_v5  ;;  %v1925_v37 = vpack.c.bf16 %v1521_v25, %v1521_v25  ;;  %v1526_v57 = vmax.f32 %v1490_v16, 0.0  ;;  %v1374_v59 = vmax.f32 %v2626_v40, %v981_v58  ;;  %v1410_v38 = vmax.f32 %v2628_v41, %v1269_v26 }
 0x132   :  { %v1488_v18 = vadd.f32 %v2715_v1, %v1445_v36  ;;  %v1448_v27 = vmax.f32 %v1376_v17, %v1412_v60  ;;  %v2084_v6 = vpop.f32.mrf.mxu0  ;;  %v2156_v19 = vpop.f32.mrf.mxu1 }
 0x133   :  { %1702 = vst.msk [vmem:[%s2970_s3 + $0x24] sm:$0xf] %vm1692_vm1, %v1925_v37  ;;  %v1930_v39 = vpack.c.bf16 %v1526_v57, %v1526_v57  ;;  %v1446_v28 = vmax.f32 %v1374_v59, %v1410_v38  ;;  %v1379_v9 = vmax.f32 %v2630_v42, %v2084_v6  ;;  %v1415_v10 = vmax.f32 %v2632_v43, %v2156_v19 }
 0x134   :  { %v1524_v11 = vmax.f32 %v1488_v18, 0.0  ;;  %v1491_v40 = vadd.f32 %v2715_v1, %v1448_v27  ;;  %v994_v41 = vpop.f32.mrf.mxu0  ;;  %v1282_v7 = vpop.f32.mrf.mxu1 }
 0x135   :  { %1707 = vst.msk [vmem:[%s2970_s3 + $0x38] sm:$0xf] %vm1692_vm1, %v1930_v39  ;;  %v1489_v29 = vadd.f32 %v2715_v1, %v1446_v28  ;;  %v1451_v20 = vmax.f32 %v1379_v9, %v1415_v10  ;;  %v1377_v21 = vmax.f32 %v2634_v44, %v994_v41  ;;  %v1413_v8 = vmax.f32 %v2636_v45, %v1282_v7  ;;  %v2996_v28 = vld [vmem:[#allocation2_spill] sm:$0xff]  ;;  %v2997_v41 = vld [vmem:[#allocation3_spill] sm:$0xff] }
 0x136   :  { %v1928_v42 = vpack.c.bf16 %v1524_v11, %v1524_v11  ;;  %v1527_v63 = vmax.f32 %v1491_v40, 0.0  ;;  %v2085_v43 = vpop.f32.mrf.mxu0  ;;  %v2157_v30 = vpop.f32.mrf.mxu1 }
 0x137   :  { %v1525_v31 = vmax.f32 %v1489_v29, 0.0  ;;  %v1494_v12 = vadd.f32 %v2715_v1, %v1451_v20  ;;  %v1449_v13 = vmax.f32 %v1377_v21, %v1413_v8  ;;  %v1380_v0 = vmax.f32 %v2638_v46, %v2085_v43  ;;  %v2998_v29 = vld [vmem:[#allocation4_spill] sm:$0xff]  ;;  %v2999_v43 = vld [vmem:[#allocation5_spill] sm:$0xff] }
 0x138   :  { %1705 = vst.msk [vmem:[%s2970_s3 + $0x30] sm:$0xf] %vm1692_vm1, %v1928_v42  ;;  %v1931_v22 = vpack.c.bf16 %v1527_v63, %v1527_v63  ;;  %v1416_v44 = vmax.f32 %v2640_v47, %v2157_v30  ;;  %v997_v2 = vpop.f32.mrf.mxu0  ;;  %v1285_v45 = vpop.f32.mrf.mxu1 }
 0x139   :  { %v1929_v32 = vpack.c.bf16 %v1525_v31, %v1525_v31  ;;  %v1530_v23 = vmax.f32 %v1494_v12, 0.0  ;;  %v1492_v33 = vadd.f32 %v2715_v1, %v1449_v13  ;;  %v1378_v3 = vmax.f32 %v2642_v48, %v997_v2  ;;  %v3000_v31 = vld [vmem:[#allocation6_spill] sm:$0xff] }
 0x13a   :  { %1708 = vst.msk [vmem:[%s2970_s3 + $0x3c] sm:$0xf] %vm1692_vm1, %v1931_v22  ;;  %v1452_v46 = vmax.f32 %v1380_v0, %v1416_v44  ;;  %v1414_v4 = vmax.f32 %v2644_v49, %v1285_v45  ;;  %v2088_v14 = vpop.f32.mrf.mxu0  ;;  %v2160_v15 = vpop.f32.mrf.mxu1 }
 0x13b   :  { %1706 = vst.msk [vmem:[%s2970_s3 + $0x34] sm:$0xf] %vm1692_vm1, %v1929_v32  ;;  %v1934_v47 = vpack.c.bf16 %v1530_v23, %v1530_v23  ;;  %v1528_v62 = vmax.f32 %v1492_v33, 0.0  ;;  %v1383_v61 = vmax.f32 %v2646_v50, %v2088_v14  ;;  %v1419_v48 = vmax.f32 %v2648_v51, %v2160_v15  ;;  %v3001_v32 = vld [vmem:[#allocation7_spill] sm:$0xff]  ;;  %v3002_v33 = vld [vmem:[#allocation8_spill] sm:$0xff] }
 0x13c   :  { %v1495_v34 = vadd.f32 %v2715_v1, %v1452_v46  ;;  %v1450_v24 = vmax.f32 %v1378_v3, %v1414_v4  ;;  %v1010_v35 = vpop.f32.mrf.mxu0  ;;  %v1298_v5 = vpop.f32.mrf.mxu1 }
 0x13d   :  { %1711 = vst.msk [vmem:[%s2970_s3 + $0x48] sm:$0xf] %vm1692_vm1, %v1934_v47  ;;  %v1932_v49 = vpack.c.bf16 %v1528_v62, %v1528_v62  ;;  %v1455_v25 = vmax.f32 %v1383_v61, %v1419_v48  ;;  %v1381_v16 = vmax.f32 %v2650_v52, %v1010_v35  ;;  %v1417_v17 = vmax.f32 %v2652_v53, %v1298_v5  ;;  %v3003_v61 = vld [vmem:[#allocation9_spill] sm:$0xff] }
 0x13e   :  { %v1531_v36 = vmax.f32 %v1495_v34, 0.0  ;;  %v1493_v50 = vadd.f32 %v2715_v1, %v1450_v24  ;;  %v2089_v51 = vpop.f32.mrf.mxu0  ;;  %v2161_v60 = vpop.f32.mrf.mxu1  ;;  %v3004_v34 = vld [vmem:[#allocation10_spill] sm:$0xff] }
 0x13f   :  { %1709 = vst.msk [vmem:[%s2970_s3 + $0x40] sm:$0xf] %vm1692_vm1, %v1932_v49  ;;  %v1498_v58 = vadd.f32 %v2715_v1, %v1455_v25  ;;  %v1453_v26 = vmax.f32 %v1381_v16, %v1417_v17  ;;  %v1384_v37 = vmax.f32 %v2654_v54, %v2089_v51  ;;  %v1420_v57 = vmax.f32 %v2656_v55, %v2161_v60 }
 0x140   :  { %v1935_v52 = vpack.c.bf16 %v1531_v36, %v1531_v36  ;;  %v1529_v59 = vmax.f32 %v1493_v50, 0.0  ;;  %v1013_v53 = vpop.f32.mrf.mxu0  ;;  %v1301_v38 = vpop.f32.mrf.mxu1  ;;  %v3005_v50 = vld [vmem:[#allocation11_spill] sm:$0xff] }
 0x141   :  { %v1534_v18 = vmax.f32 %v1498_v58, 0.0  ;;  %v1496_v27 = vadd.f32 %v2715_v1, %v1453_v26  ;;  %v1456_v6 = vmax.f32 %v1384_v37, %v1420_v57  ;;  %v1382_v19 = vmax.f32 %v2658_v56, %v1013_v53  ;;  %v3006_v58 = vld [vmem:[#allocation12_spill] sm:$0xff] }
 0x142   :  { %1712 = vst.msk [vmem:[%s2970_s3 + $0x4c] sm:$0xf] %vm1692_vm1, %v1935_v52  ;;  %v1933_v39 = vpack.c.bf16 %v1529_v59, %v1529_v59  ;;  %v1418_v54 = vmax.f32 %v2996_v28, %v1301_v38  ;;  %v2092_v9 = vpop.f32.mrf.mxu0  ;;  %v2164_v55 = vpop.f32.mrf.mxu1  ;;  %v3007_v38 = vld [vmem:[#allocation13_spill] sm:$0xff] }
 0x143   :  { %v1938_v10 = vpack.c.bf16 %v1534_v18, %v1534_v18  ;;  %v1532_v11 = vmax.f32 %v1496_v27, 0.0  ;;  %v1499_v40 = vadd.f32 %v2715_v1, %v1456_v6  ;;  %v1387_v7 = vmax.f32 %v2997_v41, %v2092_v9  ;;  %v3008_v6 = vld [vmem:[#allocation14_spill] sm:$0xff] }
 0x144   :  { %1710 = vst.msk [vmem:[%s2970_s3 + $0x44] sm:$0xf] %vm1692_vm1, %v1933_v39  ;;  %v1454_v56 = vmax.f32 %v1382_v19, %v1418_v54  ;;  %v1423_v20 = vmax.f32 %v2998_v29, %v2164_v55  ;;  %v1026_v21 = vpop.f32.mrf.mxu0  ;;  %v1314_v8 = vpop.f32.mrf.mxu1  ;;  %v3009_v55 = vld [vmem:[#allocation15_spill] sm:$0xff] }
 0x145   :  { %1715 = vst.msk [vmem:[%s2970_s3 + $0x58] sm:$0xf] %vm1692_vm1, %v1938_v10  ;;  %v1936_v42 = vpack.c.bf16 %v1532_v11, %v1532_v11  ;;  %v1535_v63 = vmax.f32 %v1499_v40, 0.0  ;;  %v1385_v30 = vmax.f32 %v2999_v43, %v1026_v21  ;;  %v1421_v12 = vmax.f32 %v3000_v31, %v1314_v8  ;;  %v3010_v11 = vld [vmem:[#allocation16_spill] sm:$0xff]  ;;  %v3011_v8 = vld [vmem:[#allocation17_spill] sm:$0xff] }
 0x146   :  { %v1497_v13 = vadd.f32 %v2715_v1, %v1454_v56  ;;  %v1459_v0 = vmax.f32 %v1387_v7, %v1423_v20  ;;  %v2093_v22 = vpop.f32.mrf.mxu0  ;;  %v2165_v44 = vpop.f32.mrf.mxu1 }
 0x147   :  { %1713 = vst.msk [vmem:[%s2970_s3 + $0x50] sm:$0xf] %vm1692_vm1, %v1936_v42  ;;  %v1939_v2 = vpack.c.bf16 %v1535_v63, %v1535_v63  ;;  %v1457_v45 = vmax.f32 %v1385_v30, %v1421_v12  ;;  %v1388_v23 = vmax.f32 %v3001_v32, %v2093_v22  ;;  %v1424_v3 = vmax.f32 %v3002_v33, %v2165_v44  ;;  %v3012_v63 = vld [vmem:[#allocation18_spill] sm:$0xff]  ;;  %v3013_v44 = vld [vmem:[#allocation19_spill] sm:$0xff] }
 0x148   :  { %v1533_v46 = vmax.f32 %v1497_v13, 0.0  ;;  %v1502_v4 = vadd.f32 %v2715_v1, %v1459_v0  ;;  %v1029_v14 = vpop.f32.mrf.mxu0  ;;  %v1317_v15 = vpop.f32.mrf.mxu1 }
 0x149   :  { %1716 = vst.msk [vmem:[%s2970_s3 + $0x5c] sm:$0xf] %vm1692_vm1, %v1939_v2  ;;  %v1500_v47 = vadd.f32 %v2715_v1, %v1457_v45  ;;  %v1460_v62 = vmax.f32 %v1388_v23, %v1424_v3  ;;  %v1386_v48 = vmax.f32 %v3003_v61, %v1029_v14  ;;  %v1422_v24 = vmax.f32 %v3004_v34, %v1317_v15  ;;  %v3014_v45 = vld [vmem:[#allocation20_spill] sm:$0xff] }
 0x14a   :  { %v1937_v35 = vpack.c.bf16 %v1533_v46, %v1533_v46  ;;  %v1538_v5 = vmax.f32 %v1502_v4, 0.0  ;;  %v2096_v49 = vpop.f32.mrf.mxu0  ;;  %v2168_v25 = vpop.f32.mrf.mxu1 }
 0x14b   :  { %v1536_v16 = vmax.f32 %v1500_v47, 0.0  ;;  %v1503_v17 = vadd.f32 %v2715_v1, %v1460_v62  ;;  %v1458_v36 = vmax.f32 %v1386_v48, %v1422_v24  ;;  %v1391_v51 = vmax.f32 %v3005_v50, %v2096_v49  ;;  %v3015_v47 = vld [vmem:[#allocation21_spill] sm:$0xff]  ;;  %v3016_v48 = vld [vmem:[#allocation22_spill] sm:$0xff]  ;;  %v3018_v50 = vld [vmem:[#allocation24_spill] sm:$0xff] }
 0x14c   :  { %1714 = vst.msk [vmem:[%s2970_s3 + $0x54] sm:$0xf] %vm1692_vm1, %v1937_v35  ;;  %v1942_v60 = vpack.c.bf16 %v1538_v5, %v1538_v5  ;;  %v1427_v26 = vmax.f32 %v3006_v58, %v2168_v25  ;;  %v1042_v37 = vpop.f32.mrf.mxu0  ;;  %v1330_v57 = vpop.f32.mrf.mxu1 }
 0x14d   :  { %v1940_v52 = vpack.c.bf16 %v1536_v16, %v1536_v16  ;;  %v1539_v59 = vmax.f32 %v1503_v17, 0.0  ;;  %v1501_v53 = vadd.f32 %v2715_v1, %v1458_v36  ;;  %v1389_v18 = vmax.f32 %v3007_v38, %v1042_v37  ;;  %v3017_v16 = vld [vmem:[#allocation23_spill] sm:$0xff] }
 0x14e   :  { %1719 = vst.msk [vmem:[%s2970_s3 + $0x68] sm:$0xf] %vm1692_vm1, %v1942_v60  ;;  %v1463_v27 = vmax.f32 %v1391_v51, %v1427_v26  ;;  %v1425_v19 = vmax.f32 %v3008_v6, %v1330_v57  ;;  %v2097_v39 = vpop.f32.mrf.mxu0  ;;  %v2169_v28 = vpop.f32.mrf.mxu1  ;;  %v3019_v57 = vld [vmem:[#allocation25_spill] sm:$0xff] }
 0x14f   :  { %1717 = vst.msk [vmem:[%s2970_s3 + $0x60] sm:$0xf] %vm1692_vm1, %v1940_v52  ;;  %v1943_v54 = vpack.c.bf16 %v1539_v59, %v1539_v59  ;;  %v1537_v9 = vmax.f32 %v1501_v53, 0.0  ;;  %v1392_v10 = vmax.f32 %v3009_v55, %v2097_v39  ;;  %v1428_v40 = vmax.f32 %v3010_v11, %v2169_v28  ;;  %v3020_v59 = vld [vmem:[#allocation26_spill] sm:$0xff] }
 0x150   :  { %v1506_v41 = vadd.f32 %v2715_v1, %v1463_v27  ;;  %v1461_v7 = vmax.f32 %v1389_v18, %v1425_v19  ;;  %v1045_v56 = vpop.f32.mrf.mxu0  ;;  %v1333_v29 = vpop.f32.mrf.mxu1 }
 0x151   :  { %1720 = vst.msk [vmem:[%s2970_s3 + $0x6c] sm:$0xf] %vm1692_vm1, %v1943_v54  ;;  %v1941_v20 = vpack.c.bf16 %v1537_v9, %v1537_v9  ;;  %v1464_v21 = vmax.f32 %v1392_v10, %v1428_v40  ;;  %v1390_v42 = vmax.f32 %v3011_v8, %v1045_v56  ;;  %v1426_v43 = vmax.f32 %v3012_v63, %v1333_v29 }
 0x152   :  { %v1542_v30 = vmax.f32 %v1506_v41, 0.0  ;;  %v1504_v31 = vadd.f32 %v2715_v1, %v1461_v7  ;;  %v2100_v12 = vpop.f32.mrf.mxu0  ;;  %v2172_v13 = vpop.f32.mrf.mxu1 }
 0x153   :  { %1718 = vst.msk [vmem:[%s2970_s3 + $0x64] sm:$0xf] %vm1692_vm1, %v1941_v20  ;;  %v1507_v0 = vadd.f32 %v2715_v1, %v1464_v21  ;;  %v1462_v22 = vmax.f32 %v1390_v42, %v1426_v43  ;;  %v1395_v2 = vmax.f32 %v3013_v44, %v2100_v12  ;;  %v1431_v32 = vmax.f32 %v3014_v45, %v2172_v13 }
 0x154   :  { %v1946_v23 = vpack.c.bf16 %v1542_v30, %v1542_v30  ;;  %v1540_v33 = vmax.f32 %v1504_v31, 0.0  ;;  %v1058_v3 = vpop.f32.mrf.mxu0  ;;  %v1346_v46 = vpop.f32.mrf.mxu1 }
 0x155   :  { %v1543_v4 = vmax.f32 %v1507_v0, 0.0  ;;  %v1505_v14 = vadd.f32 %v2715_v1, %v1462_v22  ;;  %v1467_v15 = vmax.f32 %v1395_v2, %v1431_v32  ;;  %v1393_v62 = vmax.f32 %v3015_v47, %v1058_v3 }
 0x156   :  { %1723 = vst.msk [vmem:[%s2970_s3 + $0x78] sm:$0xf] %vm1692_vm1, %v1946_v23  ;;  %v1944_v61 = vpack.c.bf16 %v1540_v33, %v1540_v33  ;;  %v1429_v34 = vmax.f32 %v3016_v48, %v1346_v46  ;;  %v2101_v24 = vpop.f32.mrf.mxu0  ;;  %v2173_v35 = vpop.f32.mrf.mxu1 }
 0x157   :  { %v1947_v5 = vpack.c.bf16 %v1543_v4, %v1543_v4  ;;  %v1541_v49 = vmax.f32 %v1505_v14, 0.0  ;;  %v1510_v25 = vadd.f32 %v2715_v1, %v1467_v15  ;;  %v1396_v17 = vmax.f32 %v3017_v16, %v2101_v24 }
 0x158   :  { %1721 = vst.msk [vmem:[%s2970_s3 + $0x70] sm:$0xf] %vm1692_vm1, %v1944_v61  ;;  %v1465_v36 = vmax.f32 %v1393_v62, %v1429_v34  ;;  %v1432_v51 = vmax.f32 %v3018_v50, %v2173_v35  ;;  %v1061_v60 = vpop.f32.mrf.mxu0  ;;  %v1349_v58 = vpop.f32.mrf.mxu1 }
 0x159   :  { %1724 = vst.msk [vmem:[%s2970_s3 + $0x7c] sm:$0xf] %vm1692_vm1, %v1947_v5  ;;  %v1945_v26 = vpack.c.bf16 %v1541_v49, %v1541_v49  ;;  %v1546_v37 = vmax.f32 %v1510_v25, 0.0  ;;  %v1394_v52 = vmax.f32 %v3019_v57, %v1061_v60  ;;  %v1430_v53 = vmax.f32 %v3020_v59, %v1349_v58 }
 0x15a   :  { %v1508_v38 = vadd.f32 %v2715_v1, %v1465_v36  ;;  %v1468_v18 = vmax.f32 %v1396_v17, %v1432_v51 }
 0x15b   :  { %1722 = vst.msk [vmem:[%s2970_s3 + $0x74] sm:$0xf] %vm1692_vm1, %v1945_v26  ;;  %v1950_v27 = vpack.c.bf16 %v1546_v37, %v1546_v37  ;;  %v1466_v6 = vmax.f32 %v1394_v52, %v1430_v53 }
 0x15c   :  { %v1544_v19 = vmax.f32 %v1508_v38, 0.0  ;;  %v1511_v39 = vadd.f32 %v2715_v1, %v1468_v18 }
 0x15d   :  { %1727 = vst.msk [vmem:[%s2970_s3 + $0x88] sm:$0xf] %vm1692_vm1, %v1950_v27  ;;  %v1509_v28 = vadd.f32 %v2715_v1, %v1466_v6 }
 0x15e   :  { %v1948_v54 = vpack.c.bf16 %v1544_v19, %v1544_v19  ;;  %v1547_v9 = vmax.f32 %v1511_v39, 0.0 }
 0x15f   :  { %v1545_v55 = vmax.f32 %v1509_v28, 0.0 }
 0x160   :  { %1725 = vst.msk [vmem:[%s2970_s3 + $0x80] sm:$0xf] %vm1692_vm1, %v1948_v54  ;;  %v1951_v10 = vpack.c.bf16 %v1547_v9, %v1547_v9 }
 0x161   :  { %v1949_v11 = vpack.c.bf16 %v1545_v55, %v1545_v55 }
 0x162   :  { %1728 = vst.msk [vmem:[%s2970_s3 + $0x8c] sm:$0xf] %vm1692_vm1, %v1951_v10 }
 0x163   :  { %1726 = vst.msk [vmem:[%s2970_s3 + $0x84] sm:$0xf] %vm1692_vm1, %v1949_v11 }

// kernel: conv_network_forward.3
= control target key start
LH: loop header
LB: loop body
LE: loop exit
PB: predicated region body
PF: predicated region fallthrough
CT: control target
= control target key end

     0   :  { %12 = vsyncpa [#allocation6], 0  ;;  %s5988_s24 = smov 0   ;;  %s5990_s25 = smov 0   ;;  %s7475_s0 = inlined_call_operand.vmem [shape: bf16[128,800], index: 0, kind: input, shape index: {}]   ;;  %s7476_s1 = inlined_call_operand.vmem [shape: bf16[800,64], index: 1, kind: input, shape index: {}]   ;;  %s7477_s2 = inlined_call_operand.vmem [shape: f32[1,64], index: 2, kind: input, shape index: {}]   ;;  %s7478_s3 = inlined_call_operand.vmem [shape: bf16[1024,2048], index: 3, kind: input, shape index: {}]   ;;  %s7479_s4 = inlined_call_operand.vmem [shape: f32[1,2048], index: 4, kind: input, shape index: {}]   ;;  %s7480_s5 = inlined_call_operand.vmem [shape: bf16[2048,128], index: 5, kind: input, shape index: {}]   ;;  %s7481_s6 = inlined_call_operand.vmem [shape: f32[1,128], index: 6, kind: input, shape index: {}]   ;;  %s7482_s7 = inlined_call_operand.hbm [shape: f32[2,128], index: 7, kind: output, shape index: {}]  }
   0x1   :  { %s5992_s26 = smov 0  }
   0x2 LB: > { %s6004_s27 = sadd.s32 4294967295, %s5942_s26   ;;  %s6007_s28 = sadd.s32 1, %s5942_s26   ;;  %s5942_s26 = sphi %s5992_s26, %s7501_s26   ;;  %s5938_s25 = sphi %s5990_s25, %s7500_s25   ;;  %s5934_s24 = sphi %s5988_s24, %s7499_s24  }
   0x3   : > { %s85_s29 = ssub.s32 %s5942_s26, %s6007_s28  ;;  %s88_s30 = sadd.s32 1, %s5938_s25 }
   0x4   : > { %p86_p0 = scmp.eq.s32.totalorder %s85_s29, 0  ;;  %p95_p1 = scmp.ne.s32.totalorder %s5938_s25, %s5934_s24 }
   0x5   : > { %p96_p2 = scmp.eq.s32.totalorder %s5942_s26, 0  ;;  %p4608_p4 = scmp.ge.s32.totalorder %s5942_s26, 4 }
   0x6   : > { %s6016_s8 = scalar_select %p86_p0, %s5938_s25, %s88_s30  }
   0x7   : > { %p97_p3 = por %p96_p2, %p95_p1  ;;  %227 = sbr.rel (%p4608_p4) target bundleno = 144 (0x90), region = 32 }
   0xc   : > { %230 = sbr.rel (!%p97_p3) target bundleno = 144 (0x90), region = 36  ;;  %s232_s9 = sand.u32 (%p97_p3), 1, %s5938_s25  }
   0xd   : > { %s5028_s10 = sshll.u32 (%p97_p3), %s5942_s26, 4  ;;  %s4609_s11 = sshll.u32 (%p97_p3), %s232_s9, 11 }
   0xe   : > { %s6024_s14 = scalar_lea.vmem (%p97_p3), %s7478_s3, %s5028_s10  ;;  %s6029_s15 = scalar_lea.vmem (%p97_p3), [#allocation4], %s4609_s11 }
   0xf   : > { %v250_v0 = vld [vmem:[%s6024_s14] sm:$0xff] (%p97_p3)  ;;  %v252_v1 = vld [vmem:[%s6024_s14 + $0x8] sm:$0xff] (%p97_p3) }
  0x10   : > { %v254_v2 = vld [vmem:[%s6024_s14 + $0x40] sm:$0xff] (%p97_p3)  ;;  %251 = vst [vmem:[%s6029_s15] sm:$0xff] (%p97_p3), %v250_v0  ;;  %253 = vst [vmem:[%s6029_s15 + $0x8] sm:$0xff] (%p97_p3), %v252_v1  ;;  %v256_v3 = vld [vmem:[%s6024_s14 + $0x48] sm:$0xff] (%p97_p3) }
  0x11   : > { %255 = vst [vmem:[%s6029_s15 + $0x10] sm:$0xff] %v254_v2  ;;  %v258_v4 = vld [vmem:[%s6024_s14 + $0x80] sm:$0xff]  ;;  %v260_v5 = vld [vmem:[%s6024_s14 + $0x88] sm:$0xff]  ;;  %257 = vst [vmem:[%s6029_s15 + $0x18] sm:$0xff] %v256_v3 }
  0x12   : > { %259 = vst [vmem:[%s6029_s15 + $0x20] sm:$0xff] %v258_v4  ;;  %261 = vst [vmem:[%s6029_s15 + $0x28] sm:$0xff] %v260_v5  ;;  %v262_v6 = vld [vmem:[%s6024_s14 + $0xc0] sm:$0xff]  ;;  %v264_v7 = vld [vmem:[%s6024_s14 + $0xc8] sm:$0xff] }
  0x13   : > { %v266_v8 = vld [vmem:[%s6024_s14 + $0x100] sm:$0xff]  ;;  %263 = vst [vmem:[%s6029_s15 + $0x30] sm:$0xff] %v262_v6  ;;  %265 = vst [vmem:[%s6029_s15 + $0x38] sm:$0xff] %v264_v7  ;;  %v268_v9 = vld [vmem:[%s6024_s14 + $0x108] sm:$0xff] }
  0x14   : > { %267 = vst [vmem:[%s6029_s15 + $0x40] sm:$0xff] %v266_v8  ;;  %v270_v10 = vld [vmem:[%s6024_s14 + $0x140] sm:$0xff]  ;;  %v272_v11 = vld [vmem:[%s6024_s14 + $0x148] sm:$0xff]  ;;  %269 = vst [vmem:[%s6029_s15 + $0x48] sm:$0xff] %v268_v9 }
  0x15   : > { %271 = vst [vmem:[%s6029_s15 + $0x50] sm:$0xff] %v270_v10  ;;  %273 = vst [vmem:[%s6029_s15 + $0x58] sm:$0xff] %v272_v11  ;;  %v274_v12 = vld [vmem:[%s6024_s14 + $0x180] sm:$0xff]  ;;  %v276_v13 = vld [vmem:[%s6024_s14 + $0x188] sm:$0xff] }
  0x16   : > { %v278_v14 = vld [vmem:[%s6024_s14 + $0x1c0] sm:$0xff]  ;;  %275 = vst [vmem:[%s6029_s15 + $0x60] sm:$0xff] %v274_v12  ;;  %277 = vst [vmem:[%s6029_s15 + $0x68] sm:$0xff] %v276_v13  ;;  %v280_v15 = vld [vmem:[%s6024_s14 + $0x1c8] sm:$0xff] }
  0x17   : > { %279 = vst [vmem:[%s6029_s15 + $0x70] sm:$0xff] %v278_v14  ;;  %v282_v16 = vld [vmem:[%s6024_s14 + $0x200] sm:$0xff]  ;;  %v284_v17 = vld [vmem:[%s6024_s14 + $0x208] sm:$0xff]  ;;  %281 = vst [vmem:[%s6029_s15 + $0x78] sm:$0xff] %v280_v15 }
  0x18   : > { %283 = vst [vmem:[%s6029_s15 + $0x80] sm:$0xff] %v282_v16  ;;  %285 = vst [vmem:[%s6029_s15 + $0x88] sm:$0xff] %v284_v17  ;;  %v286_v18 = vld [vmem:[%s6024_s14 + $0x240] sm:$0xff]  ;;  %v288_v19 = vld [vmem:[%s6024_s14 + $0x248] sm:$0xff] }
  0x19   : > { %v290_v20 = vld [vmem:[%s6024_s14 + $0x280] sm:$0xff]  ;;  %287 = vst [vmem:[%s6029_s15 + $0x90] sm:$0xff] %v286_v18  ;;  %289 = vst [vmem:[%s6029_s15 + $0x98] sm:$0xff] %v288_v19  ;;  %v292_v21 = vld [vmem:[%s6024_s14 + $0x288] sm:$0xff] }
  0x1a   : > { %291 = vst [vmem:[%s6029_s15 + $0xa0] sm:$0xff] %v290_v20  ;;  %v294_v22 = vld [vmem:[%s6024_s14 + $0x2c0] sm:$0xff]  ;;  %v296_v23 = vld [vmem:[%s6024_s14 + $0x2c8] sm:$0xff]  ;;  %293 = vst [vmem:[%s6029_s15 + $0xa8] sm:$0xff] %v292_v21 }
  0x1b   : > { %295 = vst [vmem:[%s6029_s15 + $0xb0] sm:$0xff] %v294_v22  ;;  %297 = vst [vmem:[%s6029_s15 + $0xb8] sm:$0xff] %v296_v23  ;;  %v298_v24 = vld [vmem:[%s6024_s14 + $0x300] sm:$0xff]  ;;  %v300_v25 = vld [vmem:[%s6024_s14 + $0x308] sm:$0xff] }
  0x1c   : > { %v302_v26 = vld [vmem:[%s6024_s14 + $0x340] sm:$0xff]  ;;  %299 = vst [vmem:[%s6029_s15 + $0xc0] sm:$0xff] %v298_v24  ;;  %301 = vst [vmem:[%s6029_s15 + $0xc8] sm:$0xff] %v300_v25  ;;  %v304_v27 = vld [vmem:[%s6024_s14 + $0x348] sm:$0xff] }
  0x1d   : > { %303 = vst [vmem:[%s6029_s15 + $0xd0] sm:$0xff] %v302_v26  ;;  %v306_v28 = vld [vmem:[%s6024_s14 + $0x380] sm:$0xff]  ;;  %v308_v29 = vld [vmem:[%s6024_s14 + $0x388] sm:$0xff]  ;;  %305 = vst [vmem:[%s6029_s15 + $0xd8] sm:$0xff] %v304_v27 }
  0x1e   : > { %307 = vst [vmem:[%s6029_s15 + $0xe0] sm:$0xff] %v306_v28  ;;  %309 = vst [vmem:[%s6029_s15 + $0xe8] sm:$0xff] %v308_v29  ;;  %v310_v30 = vld [vmem:[%s6024_s14 + $0x3c0] sm:$0xff]  ;;  %v312_v31 = vld [vmem:[%s6024_s14 + $0x3c8] sm:$0xff] }
  0x1f   : > { %v314_v32 = vld [vmem:[%s6024_s14 + $0x400] sm:$0xff]  ;;  %311 = vst [vmem:[%s6029_s15 + $0xf0] sm:$0xff] %v310_v30  ;;  %313 = vst [vmem:[%s6029_s15 + $0xf8] sm:$0xff] %v312_v31  ;;  %v316_v33 = vld [vmem:[%s6024_s14 + $0x408] sm:$0xff] }
  0x20   : > { %315 = vst [vmem:[%s6029_s15 + $0x100] sm:$0xff] %v314_v32  ;;  %v318_v34 = vld [vmem:[%s6024_s14 + $0x440] sm:$0xff]  ;;  %v320_v35 = vld [vmem:[%s6024_s14 + $0x448] sm:$0xff]  ;;  %317 = vst [vmem:[%s6029_s15 + $0x108] sm:$0xff] %v316_v33 }
  0x21   : > { %319 = vst [vmem:[%s6029_s15 + $0x110] sm:$0xff] %v318_v34  ;;  %321 = vst [vmem:[%s6029_s15 + $0x118] sm:$0xff] %v320_v35  ;;  %v322_v36 = vld [vmem:[%s6024_s14 + $0x480] sm:$0xff]  ;;  %v324_v37 = vld [vmem:[%s6024_s14 + $0x488] sm:$0xff] }
  0x22   : > { %v326_v38 = vld [vmem:[%s6024_s14 + $0x4c0] sm:$0xff]  ;;  %323 = vst [vmem:[%s6029_s15 + $0x120] sm:$0xff] %v322_v36  ;;  %325 = vst [vmem:[%s6029_s15 + $0x128] sm:$0xff] %v324_v37  ;;  %v328_v39 = vld [vmem:[%s6024_s14 + $0x4c8] sm:$0xff] }
  0x23   : > { %327 = vst [vmem:[%s6029_s15 + $0x130] sm:$0xff] %v326_v38  ;;  %v330_v40 = vld [vmem:[%s6024_s14 + $0x500] sm:$0xff]  ;;  %v332_v41 = vld [vmem:[%s6024_s14 + $0x508] sm:$0xff]  ;;  %329 = vst [vmem:[%s6029_s15 + $0x138] sm:$0xff] %v328_v39 }
  0x24   : > { %331 = vst [vmem:[%s6029_s15 + $0x140] sm:$0xff] %v330_v40  ;;  %333 = vst [vmem:[%s6029_s15 + $0x148] sm:$0xff] %v332_v41  ;;  %v334_v42 = vld [vmem:[%s6024_s14 + $0x540] sm:$0xff]  ;;  %v336_v43 = vld [vmem:[%s6024_s14 + $0x548] sm:$0xff] }
  0x25   : > { %v338_v44 = vld [vmem:[%s6024_s14 + $0x580] sm:$0xff]  ;;  %335 = vst [vmem:[%s6029_s15 + $0x150] sm:$0xff] %v334_v42  ;;  %337 = vst [vmem:[%s6029_s15 + $0x158] sm:$0xff] %v336_v43  ;;  %v340_v45 = vld [vmem:[%s6024_s14 + $0x588] sm:$0xff] }
  0x26   : > { %339 = vst [vmem:[%s6029_s15 + $0x160] sm:$0xff] %v338_v44  ;;  %v342_v46 = vld [vmem:[%s6024_s14 + $0x5c0] sm:$0xff]  ;;  %v344_v47 = vld [vmem:[%s6024_s14 + $0x5c8] sm:$0xff]  ;;  %341 = vst [vmem:[%s6029_s15 + $0x168] sm:$0xff] %v340_v45 }
  0x27   : > { %343 = vst [vmem:[%s6029_s15 + $0x170] sm:$0xff] %v342_v46  ;;  %345 = vst [vmem:[%s6029_s15 + $0x178] sm:$0xff] %v344_v47  ;;  %v346_v48 = vld [vmem:[%s6024_s14 + $0x600] sm:$0xff]  ;;  %v348_v49 = vld [vmem:[%s6024_s14 + $0x608] sm:$0xff] }
  0x28   : > { %v350_v50 = vld [vmem:[%s6024_s14 + $0x640] sm:$0xff]  ;;  %347 = vst [vmem:[%s6029_s15 + $0x180] sm:$0xff] %v346_v48  ;;  %349 = vst [vmem:[%s6029_s15 + $0x188] sm:$0xff] %v348_v49  ;;  %v352_v51 = vld [vmem:[%s6024_s14 + $0x648] sm:$0xff] }
  0x29   : > { %351 = vst [vmem:[%s6029_s15 + $0x190] sm:$0xff] %v350_v50  ;;  %v354_v52 = vld [vmem:[%s6024_s14 + $0x680] sm:$0xff]  ;;  %v356_v53 = vld [vmem:[%s6024_s14 + $0x688] sm:$0xff]  ;;  %353 = vst [vmem:[%s6029_s15 + $0x198] sm:$0xff] %v352_v51 }
  0x2a   : > { %355 = vst [vmem:[%s6029_s15 + $0x1a0] sm:$0xff] %v354_v52  ;;  %357 = vst [vmem:[%s6029_s15 + $0x1a8] sm:$0xff] %v356_v53  ;;  %v358_v54 = vld [vmem:[%s6024_s14 + $0x6c0] sm:$0xff]  ;;  %v360_v55 = vld [vmem:[%s6024_s14 + $0x6c8] sm:$0xff] }
  0x2b   : > { %v362_v56 = vld [vmem:[%s6024_s14 + $0x700] sm:$0xff]  ;;  %359 = vst [vmem:[%s6029_s15 + $0x1b0] sm:$0xff] %v358_v54  ;;  %361 = vst [vmem:[%s6029_s15 + $0x1b8] sm:$0xff] %v360_v55  ;;  %v364_v57 = vld [vmem:[%s6024_s14 + $0x708] sm:$0xff] }
  0x2c   : > { %363 = vst [vmem:[%s6029_s15 + $0x1c0] sm:$0xff] %v362_v56  ;;  %v366_v58 = vld [vmem:[%s6024_s14 + $0x740] sm:$0xff]  ;;  %v368_v59 = vld [vmem:[%s6024_s14 + $0x748] sm:$0xff]  ;;  %365 = vst [vmem:[%s6029_s15 + $0x1c8] sm:$0xff] %v364_v57 }
  0x2d   : > { %367 = vst [vmem:[%s6029_s15 + $0x1d0] sm:$0xff] %v366_v58  ;;  %369 = vst [vmem:[%s6029_s15 + $0x1d8] sm:$0xff] %v368_v59  ;;  %v370_v60 = vld [vmem:[%s6024_s14 + $0x780] sm:$0xff]  ;;  %v372_v61 = vld [vmem:[%s6024_s14 + $0x788] sm:$0xff] }
  0x2e   : > { %v374_v62 = vld [vmem:[%s6024_s14 + $0x7c0] sm:$0xff]  ;;  %371 = vst [vmem:[%s6029_s15 + $0x1e0] sm:$0xff] %v370_v60  ;;  %373 = vst [vmem:[%s6029_s15 + $0x1e8] sm:$0xff] %v372_v61  ;;  %v376_v63 = vld [vmem:[%s6024_s14 + $0x7c8] sm:$0xff] }
  0x2f   : > { %375 = vst [vmem:[%s6029_s15 + $0x1f0] sm:$0xff] %v374_v62  ;;  %v378_v0 = vld [vmem:[%s6024_s14 + $0x800] sm:$0xff]  ;;  %v380_v1 = vld [vmem:[%s6024_s14 + $0x808] sm:$0xff]  ;;  %377 = vst [vmem:[%s6029_s15 + $0x1f8] sm:$0xff] %v376_v63 }
  0x30   : > { %379 = vst [vmem:[%s6029_s15 + $0x200] sm:$0xff] %v378_v0  ;;  %381 = vst [vmem:[%s6029_s15 + $0x208] sm:$0xff] %v380_v1  ;;  %v382_v2 = vld [vmem:[%s6024_s14 + $0x840] sm:$0xff]  ;;  %v384_v3 = vld [vmem:[%s6024_s14 + $0x848] sm:$0xff] }
  0x31   : > { %v386_v4 = vld [vmem:[%s6024_s14 + $0x880] sm:$0xff]  ;;  %383 = vst [vmem:[%s6029_s15 + $0x210] sm:$0xff] %v382_v2  ;;  %385 = vst [vmem:[%s6029_s15 + $0x218] sm:$0xff] %v384_v3  ;;  %v388_v5 = vld [vmem:[%s6024_s14 + $0x888] sm:$0xff] }
  0x32   : > { %387 = vst [vmem:[%s6029_s15 + $0x220] sm:$0xff] %v386_v4  ;;  %v390_v6 = vld [vmem:[%s6024_s14 + $0x8c0] sm:$0xff]  ;;  %v392_v7 = vld [vmem:[%s6024_s14 + $0x8c8] sm:$0xff]  ;;  %389 = vst [vmem:[%s6029_s15 + $0x228] sm:$0xff] %v388_v5 }
  0x33   : > { %391 = vst [vmem:[%s6029_s15 + $0x230] sm:$0xff] %v390_v6  ;;  %393 = vst [vmem:[%s6029_s15 + $0x238] sm:$0xff] %v392_v7  ;;  %v394_v8 = vld [vmem:[%s6024_s14 + $0x900] sm:$0xff]  ;;  %v396_v9 = vld [vmem:[%s6024_s14 + $0x908] sm:$0xff] }
  0x34   : > { %v398_v10 = vld [vmem:[%s6024_s14 + $0x940] sm:$0xff]  ;;  %395 = vst [vmem:[%s6029_s15 + $0x240] sm:$0xff] %v394_v8  ;;  %397 = vst [vmem:[%s6029_s15 + $0x248] sm:$0xff] %v396_v9  ;;  %v400_v11 = vld [vmem:[%s6024_s14 + $0x948] sm:$0xff] }
  0x35   : > { %399 = vst [vmem:[%s6029_s15 + $0x250] sm:$0xff] %v398_v10  ;;  %v402_v12 = vld [vmem:[%s6024_s14 + $0x980] sm:$0xff]  ;;  %v404_v13 = vld [vmem:[%s6024_s14 + $0x988] sm:$0xff]  ;;  %401 = vst [vmem:[%s6029_s15 + $0x258] sm:$0xff] %v400_v11 }
  0x36   : > { %403 = vst [vmem:[%s6029_s15 + $0x260] sm:$0xff] %v402_v12  ;;  %405 = vst [vmem:[%s6029_s15 + $0x268] sm:$0xff] %v404_v13  ;;  %v406_v14 = vld [vmem:[%s6024_s14 + $0x9c0] sm:$0xff]  ;;  %v408_v15 = vld [vmem:[%s6024_s14 + $0x9c8] sm:$0xff] }
  0x37   : > { %v410_v16 = vld [vmem:[%s6024_s14 + $0xa00] sm:$0xff]  ;;  %407 = vst [vmem:[%s6029_s15 + $0x270] sm:$0xff] %v406_v14  ;;  %409 = vst [vmem:[%s6029_s15 + $0x278] sm:$0xff] %v408_v15  ;;  %v412_v17 = vld [vmem:[%s6024_s14 + $0xa08] sm:$0xff] }
  0x38   : > { %411 = vst [vmem:[%s6029_s15 + $0x280] sm:$0xff] %v410_v16  ;;  %v414_v18 = vld [vmem:[%s6024_s14 + $0xa40] sm:$0xff]  ;;  %v416_v19 = vld [vmem:[%s6024_s14 + $0xa48] sm:$0xff]  ;;  %413 = vst [vmem:[%s6029_s15 + $0x288] sm:$0xff] %v412_v17 }
  0x39   : > { %415 = vst [vmem:[%s6029_s15 + $0x290] sm:$0xff] %v414_v18  ;;  %417 = vst [vmem:[%s6029_s15 + $0x298] sm:$0xff] %v416_v19  ;;  %v418_v20 = vld [vmem:[%s6024_s14 + $0xa80] sm:$0xff]  ;;  %v420_v21 = vld [vmem:[%s6024_s14 + $0xa88] sm:$0xff] }
  0x3a   : > { %v422_v22 = vld [vmem:[%s6024_s14 + $0xac0] sm:$0xff]  ;;  %419 = vst [vmem:[%s6029_s15 + $0x2a0] sm:$0xff] %v418_v20  ;;  %421 = vst [vmem:[%s6029_s15 + $0x2a8] sm:$0xff] %v420_v21  ;;  %v424_v23 = vld [vmem:[%s6024_s14 + $0xac8] sm:$0xff] }
  0x3b   : > { %423 = vst [vmem:[%s6029_s15 + $0x2b0] sm:$0xff] %v422_v22  ;;  %v426_v24 = vld [vmem:[%s6024_s14 + $0xb00] sm:$0xff]  ;;  %v428_v25 = vld [vmem:[%s6024_s14 + $0xb08] sm:$0xff]  ;;  %425 = vst [vmem:[%s6029_s15 + $0x2b8] sm:$0xff] %v424_v23 }
  0x3c   : > { %427 = vst [vmem:[%s6029_s15 + $0x2c0] sm:$0xff] %v426_v24  ;;  %429 = vst [vmem:[%s6029_s15 + $0x2c8] sm:$0xff] %v428_v25  ;;  %v430_v26 = vld [vmem:[%s6024_s14 + $0xb40] sm:$0xff]  ;;  %v432_v27 = vld [vmem:[%s6024_s14 + $0xb48] sm:$0xff] }
  0x3d   : > { %v434_v28 = vld [vmem:[%s6024_s14 + $0xb80] sm:$0xff]  ;;  %431 = vst [vmem:[%s6029_s15 + $0x2d0] sm:$0xff] %v430_v26  ;;  %433 = vst [vmem:[%s6029_s15 + $0x2d8] sm:$0xff] %v432_v27  ;;  %v436_v29 = vld [vmem:[%s6024_s14 + $0xb88] sm:$0xff] }
  0x3e   : > { %435 = vst [vmem:[%s6029_s15 + $0x2e0] sm:$0xff] %v434_v28  ;;  %v438_v30 = vld [vmem:[%s6024_s14 + $0xbc0] sm:$0xff]  ;;  %v440_v31 = vld [vmem:[%s6024_s14 + $0xbc8] sm:$0xff]  ;;  %437 = vst [vmem:[%s6029_s15 + $0x2e8] sm:$0xff] %v436_v29 }
  0x3f   : > { %439 = vst [vmem:[%s6029_s15 + $0x2f0] sm:$0xff] %v438_v30  ;;  %441 = vst [vmem:[%s6029_s15 + $0x2f8] sm:$0xff] %v440_v31  ;;  %v442_v32 = vld [vmem:[%s6024_s14 + $0xc00] sm:$0xff]  ;;  %v444_v33 = vld [vmem:[%s6024_s14 + $0xc08] sm:$0xff] }
  0x40   : > { %v446_v34 = vld [vmem:[%s6024_s14 + $0xc40] sm:$0xff]  ;;  %443 = vst [vmem:[%s6029_s15 + $0x300] sm:$0xff] %v442_v32  ;;  %445 = vst [vmem:[%s6029_s15 + $0x308] sm:$0xff] %v444_v33  ;;  %v448_v35 = vld [vmem:[%s6024_s14 + $0xc48] sm:$0xff] }
  0x41   : > { %447 = vst [vmem:[%s6029_s15 + $0x310] sm:$0xff] %v446_v34  ;;  %v450_v36 = vld [vmem:[%s6024_s14 + $0xc80] sm:$0xff]  ;;  %v452_v37 = vld [vmem:[%s6024_s14 + $0xc88] sm:$0xff]  ;;  %449 = vst [vmem:[%s6029_s15 + $0x318] sm:$0xff] %v448_v35 }
  0x42   : > { %451 = vst [vmem:[%s6029_s15 + $0x320] sm:$0xff] %v450_v36  ;;  %453 = vst [vmem:[%s6029_s15 + $0x328] sm:$0xff] %v452_v37  ;;  %v454_v38 = vld [vmem:[%s6024_s14 + $0xcc0] sm:$0xff]  ;;  %v456_v39 = vld [vmem:[%s6024_s14 + $0xcc8] sm:$0xff] }
  0x43   : > { %v458_v40 = vld [vmem:[%s6024_s14 + $0xd00] sm:$0xff]  ;;  %455 = vst [vmem:[%s6029_s15 + $0x330] sm:$0xff] %v454_v38  ;;  %457 = vst [vmem:[%s6029_s15 + $0x338] sm:$0xff] %v456_v39  ;;  %v460_v41 = vld [vmem:[%s6024_s14 + $0xd08] sm:$0xff] }
  0x44   : > { %459 = vst [vmem:[%s6029_s15 + $0x340] sm:$0xff] %v458_v40  ;;  %v462_v42 = vld [vmem:[%s6024_s14 + $0xd40] sm:$0xff]  ;;  %v464_v43 = vld [vmem:[%s6024_s14 + $0xd48] sm:$0xff]  ;;  %461 = vst [vmem:[%s6029_s15 + $0x348] sm:$0xff] %v460_v41 }
  0x45   : > { %463 = vst [vmem:[%s6029_s15 + $0x350] sm:$0xff] %v462_v42  ;;  %465 = vst [vmem:[%s6029_s15 + $0x358] sm:$0xff] %v464_v43  ;;  %v466_v44 = vld [vmem:[%s6024_s14 + $0xd80] sm:$0xff]  ;;  %v468_v45 = vld [vmem:[%s6024_s14 + $0xd88] sm:$0xff] }
  0x46   : > { %v470_v46 = vld [vmem:[%s6024_s14 + $0xdc0] sm:$0xff]  ;;  %467 = vst [vmem:[%s6029_s15 + $0x360] sm:$0xff] %v466_v44  ;;  %469 = vst [vmem:[%s6029_s15 + $0x368] sm:$0xff] %v468_v45  ;;  %v472_v47 = vld [vmem:[%s6024_s14 + $0xdc8] sm:$0xff] }
  0x47   : > { %471 = vst [vmem:[%s6029_s15 + $0x370] sm:$0xff] %v470_v46  ;;  %v474_v48 = vld [vmem:[%s6024_s14 + $0xe00] sm:$0xff]  ;;  %v476_v49 = vld [vmem:[%s6024_s14 + $0xe08] sm:$0xff]  ;;  %473 = vst [vmem:[%s6029_s15 + $0x378] sm:$0xff] %v472_v47 }
  0x48   : > { %475 = vst [vmem:[%s6029_s15 + $0x380] sm:$0xff] %v474_v48  ;;  %477 = vst [vmem:[%s6029_s15 + $0x388] sm:$0xff] %v476_v49  ;;  %v478_v50 = vld [vmem:[%s6024_s14 + $0xe40] sm:$0xff]  ;;  %v480_v51 = vld [vmem:[%s6024_s14 + $0xe48] sm:$0xff] }
  0x49   : > { %v482_v52 = vld [vmem:[%s6024_s14 + $0xe80] sm:$0xff]  ;;  %479 = vst [vmem:[%s6029_s15 + $0x390] sm:$0xff] %v478_v50  ;;  %481 = vst [vmem:[%s6029_s15 + $0x398] sm:$0xff] %v480_v51  ;;  %v484_v53 = vld [vmem:[%s6024_s14 + $0xe88] sm:$0xff] }
  0x4a   : > { %483 = vst [vmem:[%s6029_s15 + $0x3a0] sm:$0xff] %v482_v52  ;;  %v486_v54 = vld [vmem:[%s6024_s14 + $0xec0] sm:$0xff]  ;;  %v488_v55 = vld [vmem:[%s6024_s14 + $0xec8] sm:$0xff]  ;;  %485 = vst [vmem:[%s6029_s15 + $0x3a8] sm:$0xff] %v484_v53 }
  0x4b   : > { %487 = vst [vmem:[%s6029_s15 + $0x3b0] sm:$0xff] %v486_v54  ;;  %489 = vst [vmem:[%s6029_s15 + $0x3b8] sm:$0xff] %v488_v55  ;;  %v490_v56 = vld [vmem:[%s6024_s14 + $0xf00] sm:$0xff]  ;;  %v492_v57 = vld [vmem:[%s6024_s14 + $0xf08] sm:$0xff] }
  0x4c   : > { %v494_v58 = vld [vmem:[%s6024_s14 + $0xf40] sm:$0xff]  ;;  %491 = vst [vmem:[%s6029_s15 + $0x3c0] sm:$0xff] %v490_v56  ;;  %493 = vst [vmem:[%s6029_s15 + $0x3c8] sm:$0xff] %v492_v57  ;;  %v496_v59 = vld [vmem:[%s6024_s14 + $0xf48] sm:$0xff] }
  0x4d   : > { %495 = vst [vmem:[%s6029_s15 + $0x3d0] sm:$0xff] %v494_v58  ;;  %v498_v60 = vld [vmem:[%s6024_s14 + $0xf80] sm:$0xff]  ;;  %v500_v61 = vld [vmem:[%s6024_s14 + $0xf88] sm:$0xff]  ;;  %497 = vst [vmem:[%s6029_s15 + $0x3d8] sm:$0xff] %v496_v59 }
  0x4e   : > { %499 = vst [vmem:[%s6029_s15 + $0x3e0] sm:$0xff] %v498_v60  ;;  %501 = vst [vmem:[%s6029_s15 + $0x3e8] sm:$0xff] %v500_v61  ;;  %v502_v62 = vld [vmem:[%s6024_s14 + $0xfc0] sm:$0xff]  ;;  %v504_v63 = vld [vmem:[%s6024_s14 + $0xfc8] sm:$0xff] }
  0x4f   : > { %v506_v0 = vld [vmem:[%s6024_s14 + $0x1000] sm:$0xff]  ;;  %503 = vst [vmem:[%s6029_s15 + $0x3f0] sm:$0xff] %v502_v62  ;;  %505 = vst [vmem:[%s6029_s15 + $0x3f8] sm:$0xff] %v504_v63  ;;  %v508_v1 = vld [vmem:[%s6024_s14 + $0x1008] sm:$0xff] }
  0x50   : > { %507 = vst [vmem:[%s6029_s15 + $0x400] sm:$0xff] %v506_v0  ;;  %v510_v2 = vld [vmem:[%s6024_s14 + $0x1040] sm:$0xff]  ;;  %v512_v3 = vld [vmem:[%s6024_s14 + $0x1048] sm:$0xff]  ;;  %509 = vst [vmem:[%s6029_s15 + $0x408] sm:$0xff] %v508_v1 }
  0x51   : > { %511 = vst [vmem:[%s6029_s15 + $0x410] sm:$0xff] %v510_v2  ;;  %513 = vst [vmem:[%s6029_s15 + $0x418] sm:$0xff] %v512_v3  ;;  %v514_v4 = vld [vmem:[%s6024_s14 + $0x1080] sm:$0xff]  ;;  %v516_v5 = vld [vmem:[%s6024_s14 + $0x1088] sm:$0xff] }
  0x52   : > { %v518_v6 = vld [vmem:[%s6024_s14 + $0x10c0] sm:$0xff]  ;;  %515 = vst [vmem:[%s6029_s15 + $0x420] sm:$0xff] %v514_v4  ;;  %517 = vst [vmem:[%s6029_s15 + $0x428] sm:$0xff] %v516_v5  ;;  %v520_v7 = vld [vmem:[%s6024_s14 + $0x10c8] sm:$0xff] }
  0x53   : > { %519 = vst [vmem:[%s6029_s15 + $0x430] sm:$0xff] %v518_v6  ;;  %v522_v8 = vld [vmem:[%s6024_s14 + $0x1100] sm:$0xff]  ;;  %v524_v9 = vld [vmem:[%s6024_s14 + $0x1108] sm:$0xff]  ;;  %521 = vst [vmem:[%s6029_s15 + $0x438] sm:$0xff] %v520_v7 }
  0x54   : > { %523 = vst [vmem:[%s6029_s15 + $0x440] sm:$0xff] %v522_v8  ;;  %525 = vst [vmem:[%s6029_s15 + $0x448] sm:$0xff] %v524_v9  ;;  %v526_v10 = vld [vmem:[%s6024_s14 + $0x1140] sm:$0xff]  ;;  %v528_v11 = vld [vmem:[%s6024_s14 + $0x1148] sm:$0xff] }
  0x55   : > { %v530_v12 = vld [vmem:[%s6024_s14 + $0x1180] sm:$0xff]  ;;  %527 = vst [vmem:[%s6029_s15 + $0x450] sm:$0xff] %v526_v10  ;;  %529 = vst [vmem:[%s6029_s15 + $0x458] sm:$0xff] %v528_v11  ;;  %v532_v13 = vld [vmem:[%s6024_s14 + $0x1188] sm:$0xff] }
  0x56   : > { %531 = vst [vmem:[%s6029_s15 + $0x460] sm:$0xff] %v530_v12  ;;  %v534_v14 = vld [vmem:[%s6024_s14 + $0x11c0] sm:$0xff]  ;;  %v536_v15 = vld [vmem:[%s6024_s14 + $0x11c8] sm:$0xff]  ;;  %533 = vst [vmem:[%s6029_s15 + $0x468] sm:$0xff] %v532_v13 }
  0x57   : > { %535 = vst [vmem:[%s6029_s15 + $0x470] sm:$0xff] %v534_v14  ;;  %537 = vst [vmem:[%s6029_s15 + $0x478] sm:$0xff] %v536_v15  ;;  %v538_v16 = vld [vmem:[%s6024_s14 + $0x1200] sm:$0xff]  ;;  %v540_v17 = vld [vmem:[%s6024_s14 + $0x1208] sm:$0xff] }
  0x58   : > { %v542_v18 = vld [vmem:[%s6024_s14 + $0x1240] sm:$0xff]  ;;  %539 = vst [vmem:[%s6029_s15 + $0x480] sm:$0xff] %v538_v16  ;;  %541 = vst [vmem:[%s6029_s15 + $0x488] sm:$0xff] %v540_v17  ;;  %v544_v19 = vld [vmem:[%s6024_s14 + $0x1248] sm:$0xff] }
  0x59   : > { %543 = vst [vmem:[%s6029_s15 + $0x490] sm:$0xff] %v542_v18  ;;  %v546_v20 = vld [vmem:[%s6024_s14 + $0x1280] sm:$0xff]  ;;  %v548_v21 = vld [vmem:[%s6024_s14 + $0x1288] sm:$0xff]  ;;  %545 = vst [vmem:[%s6029_s15 + $0x498] sm:$0xff] %v544_v19 }
  0x5a   : > { %547 = vst [vmem:[%s6029_s15 + $0x4a0] sm:$0xff] %v546_v20  ;;  %549 = vst [vmem:[%s6029_s15 + $0x4a8] sm:$0xff] %v548_v21  ;;  %v550_v22 = vld [vmem:[%s6024_s14 + $0x12c0] sm:$0xff]  ;;  %v552_v23 = vld [vmem:[%s6024_s14 + $0x12c8] sm:$0xff] }
  0x5b   : > { %v554_v24 = vld [vmem:[%s6024_s14 + $0x1300] sm:$0xff]  ;;  %551 = vst [vmem:[%s6029_s15 + $0x4b0] sm:$0xff] %v550_v22  ;;  %553 = vst [vmem:[%s6029_s15 + $0x4b8] sm:$0xff] %v552_v23  ;;  %v556_v25 = vld [vmem:[%s6024_s14 + $0x1308] sm:$0xff] }
  0x5c   : > { %555 = vst [vmem:[%s6029_s15 + $0x4c0] sm:$0xff] %v554_v24  ;;  %v558_v26 = vld [vmem:[%s6024_s14 + $0x1340] sm:$0xff]  ;;  %v560_v27 = vld [vmem:[%s6024_s14 + $0x1348] sm:$0xff]  ;;  %557 = vst [vmem:[%s6029_s15 + $0x4c8] sm:$0xff] %v556_v25 }
  0x5d   : > { %559 = vst [vmem:[%s6029_s15 + $0x4d0] sm:$0xff] %v558_v26  ;;  %561 = vst [vmem:[%s6029_s15 + $0x4d8] sm:$0xff] %v560_v27  ;;  %v562_v28 = vld [vmem:[%s6024_s14 + $0x1380] sm:$0xff]  ;;  %v564_v29 = vld [vmem:[%s6024_s14 + $0x1388] sm:$0xff] }
  0x5e   : > { %v566_v30 = vld [vmem:[%s6024_s14 + $0x13c0] sm:$0xff]  ;;  %563 = vst [vmem:[%s6029_s15 + $0x4e0] sm:$0xff] %v562_v28  ;;  %565 = vst [vmem:[%s6029_s15 + $0x4e8] sm:$0xff] %v564_v29  ;;  %v568_v31 = vld [vmem:[%s6024_s14 + $0x13c8] sm:$0xff] }
  0x5f   : > { %567 = vst [vmem:[%s6029_s15 + $0x4f0] sm:$0xff] %v566_v30  ;;  %v570_v32 = vld [vmem:[%s6024_s14 + $0x1400] sm:$0xff]  ;;  %v572_v33 = vld [vmem:[%s6024_s14 + $0x1408] sm:$0xff]  ;;  %569 = vst [vmem:[%s6029_s15 + $0x4f8] sm:$0xff] %v568_v31 }
  0x60   : > { %571 = vst [vmem:[%s6029_s15 + $0x500] sm:$0xff] %v570_v32  ;;  %573 = vst [vmem:[%s6029_s15 + $0x508] sm:$0xff] %v572_v33  ;;  %v574_v34 = vld [vmem:[%s6024_s14 + $0x1440] sm:$0xff]  ;;  %v576_v35 = vld [vmem:[%s6024_s14 + $0x1448] sm:$0xff] }
  0x61   : > { %v578_v36 = vld [vmem:[%s6024_s14 + $0x1480] sm:$0xff]  ;;  %575 = vst [vmem:[%s6029_s15 + $0x510] sm:$0xff] %v574_v34  ;;  %577 = vst [vmem:[%s6029_s15 + $0x518] sm:$0xff] %v576_v35  ;;  %v580_v37 = vld [vmem:[%s6024_s14 + $0x1488] sm:$0xff] }
  0x62   : > { %579 = vst [vmem:[%s6029_s15 + $0x520] sm:$0xff] %v578_v36  ;;  %v582_v38 = vld [vmem:[%s6024_s14 + $0x14c0] sm:$0xff]  ;;  %v584_v39 = vld [vmem:[%s6024_s14 + $0x14c8] sm:$0xff]  ;;  %581 = vst [vmem:[%s6029_s15 + $0x528] sm:$0xff] %v580_v37 }
  0x63   : > { %583 = vst [vmem:[%s6029_s15 + $0x530] sm:$0xff] %v582_v38  ;;  %585 = vst [vmem:[%s6029_s15 + $0x538] sm:$0xff] %v584_v39  ;;  %v586_v40 = vld [vmem:[%s6024_s14 + $0x1500] sm:$0xff]  ;;  %v588_v41 = vld [vmem:[%s6024_s14 + $0x1508] sm:$0xff] }
  0x64   : > { %v590_v42 = vld [vmem:[%s6024_s14 + $0x1540] sm:$0xff]  ;;  %587 = vst [vmem:[%s6029_s15 + $0x540] sm:$0xff] %v586_v40  ;;  %589 = vst [vmem:[%s6029_s15 + $0x548] sm:$0xff] %v588_v41  ;;  %v592_v43 = vld [vmem:[%s6024_s14 + $0x1548] sm:$0xff] }
  0x65   : > { %591 = vst [vmem:[%s6029_s15 + $0x550] sm:$0xff] %v590_v42  ;;  %v594_v44 = vld [vmem:[%s6024_s14 + $0x1580] sm:$0xff]  ;;  %v596_v45 = vld [vmem:[%s6024_s14 + $0x1588] sm:$0xff]  ;;  %593 = vst [vmem:[%s6029_s15 + $0x558] sm:$0xff] %v592_v43 }
  0x66   : > { %595 = vst [vmem:[%s6029_s15 + $0x560] sm:$0xff] %v594_v44  ;;  %597 = vst [vmem:[%s6029_s15 + $0x568] sm:$0xff] %v596_v45  ;;  %v598_v46 = vld [vmem:[%s6024_s14 + $0x15c0] sm:$0xff]  ;;  %v600_v47 = vld [vmem:[%s6024_s14 + $0x15c8] sm:$0xff] }
  0x67   : > { %v602_v48 = vld [vmem:[%s6024_s14 + $0x1600] sm:$0xff]  ;;  %599 = vst [vmem:[%s6029_s15 + $0x570] sm:$0xff] %v598_v46  ;;  %601 = vst [vmem:[%s6029_s15 + $0x578] sm:$0xff] %v600_v47  ;;  %v604_v49 = vld [vmem:[%s6024_s14 + $0x1608] sm:$0xff] }
  0x68   : > { %603 = vst [vmem:[%s6029_s15 + $0x580] sm:$0xff] %v602_v48  ;;  %v606_v50 = vld [vmem:[%s6024_s14 + $0x1640] sm:$0xff]  ;;  %v608_v51 = vld [vmem:[%s6024_s14 + $0x1648] sm:$0xff]  ;;  %605 = vst [vmem:[%s6029_s15 + $0x588] sm:$0xff] %v604_v49 }
  0x69   : > { %607 = vst [vmem:[%s6029_s15 + $0x590] sm:$0xff] %v606_v50  ;;  %609 = vst [vmem:[%s6029_s15 + $0x598] sm:$0xff] %v608_v51  ;;  %v610_v52 = vld [vmem:[%s6024_s14 + $0x1680] sm:$0xff]  ;;  %v612_v53 = vld [vmem:[%s6024_s14 + $0x1688] sm:$0xff] }
  0x6a   : > { %v614_v54 = vld [vmem:[%s6024_s14 + $0x16c0] sm:$0xff]  ;;  %611 = vst [vmem:[%s6029_s15 + $0x5a0] sm:$0xff] %v610_v52  ;;  %613 = vst [vmem:[%s6029_s15 + $0x5a8] sm:$0xff] %v612_v53  ;;  %v616_v55 = vld [vmem:[%s6024_s14 + $0x16c8] sm:$0xff] }
  0x6b   : > { %615 = vst [vmem:[%s6029_s15 + $0x5b0] sm:$0xff] %v614_v54  ;;  %v618_v56 = vld [vmem:[%s6024_s14 + $0x1700] sm:$0xff]  ;;  %v620_v57 = vld [vmem:[%s6024_s14 + $0x1708] sm:$0xff]  ;;  %617 = vst [vmem:[%s6029_s15 + $0x5b8] sm:$0xff] %v616_v55 }
  0x6c   : > { %619 = vst [vmem:[%s6029_s15 + $0x5c0] sm:$0xff] %v618_v56  ;;  %621 = vst [vmem:[%s6029_s15 + $0x5c8] sm:$0xff] %v620_v57  ;;  %v622_v58 = vld [vmem:[%s6024_s14 + $0x1740] sm:$0xff]  ;;  %v624_v59 = vld [vmem:[%s6024_s14 + $0x1748] sm:$0xff] }
  0x6d   : > { %v626_v60 = vld [vmem:[%s6024_s14 + $0x1780] sm:$0xff]  ;;  %623 = vst [vmem:[%s6029_s15 + $0x5d0] sm:$0xff] %v622_v58  ;;  %625 = vst [vmem:[%s6029_s15 + $0x5d8] sm:$0xff] %v624_v59  ;;  %v628_v61 = vld [vmem:[%s6024_s14 + $0x1788] sm:$0xff] }
  0x6e   : > { %627 = vst [vmem:[%s6029_s15 + $0x5e0] sm:$0xff] %v626_v60  ;;  %v630_v62 = vld [vmem:[%s6024_s14 + $0x17c0] sm:$0xff]  ;;  %v632_v63 = vld [vmem:[%s6024_s14 + $0x17c8] sm:$0xff]  ;;  %629 = vst [vmem:[%s6029_s15 + $0x5e8] sm:$0xff] %v628_v61 }
  0x6f   : > { %631 = vst [vmem:[%s6029_s15 + $0x5f0] sm:$0xff] %v630_v62  ;;  %633 = vst [vmem:[%s6029_s15 + $0x5f8] sm:$0xff] %v632_v63  ;;  %v634_v0 = vld [vmem:[%s6024_s14 + $0x1800] sm:$0xff]  ;;  %v636_v1 = vld [vmem:[%s6024_s14 + $0x1808] sm:$0xff] }
  0x70   : > { %v638_v2 = vld [vmem:[%s6024_s14 + $0x1840] sm:$0xff]  ;;  %635 = vst [vmem:[%s6029_s15 + $0x600] sm:$0xff] %v634_v0  ;;  %637 = vst [vmem:[%s6029_s15 + $0x608] sm:$0xff] %v636_v1  ;;  %v640_v3 = vld [vmem:[%s6024_s14 + $0x1848] sm:$0xff] }
  0x71   : > { %639 = vst [vmem:[%s6029_s15 + $0x610] sm:$0xff] %v638_v2  ;;  %v642_v4 = vld [vmem:[%s6024_s14 + $0x1880] sm:$0xff]  ;;  %v644_v5 = vld [vmem:[%s6024_s14 + $0x1888] sm:$0xff]  ;;  %641 = vst [vmem:[%s6029_s15 + $0x618] sm:$0xff] %v640_v3 }
  0x72   : > { %643 = vst [vmem:[%s6029_s15 + $0x620] sm:$0xff] %v642_v4  ;;  %645 = vst [vmem:[%s6029_s15 + $0x628] sm:$0xff] %v644_v5  ;;  %v646_v6 = vld [vmem:[%s6024_s14 + $0x18c0] sm:$0xff]  ;;  %v648_v7 = vld [vmem:[%s6024_s14 + $0x18c8] sm:$0xff] }
  0x73   : > { %v650_v8 = vld [vmem:[%s6024_s14 + $0x1900] sm:$0xff]  ;;  %647 = vst [vmem:[%s6029_s15 + $0x630] sm:$0xff] %v646_v6  ;;  %649 = vst [vmem:[%s6029_s15 + $0x638] sm:$0xff] %v648_v7  ;;  %v652_v9 = vld [vmem:[%s6024_s14 + $0x1908] sm:$0xff] }
  0x74   : > { %651 = vst [vmem:[%s6029_s15 + $0x640] sm:$0xff] %v650_v8  ;;  %v654_v10 = vld [vmem:[%s6024_s14 + $0x1940] sm:$0xff]  ;;  %v656_v11 = vld [vmem:[%s6024_s14 + $0x1948] sm:$0xff]  ;;  %653 = vst [vmem:[%s6029_s15 + $0x648] sm:$0xff] %v652_v9 }
  0x75   : > { %655 = vst [vmem:[%s6029_s15 + $0x650] sm:$0xff] %v654_v10  ;;  %657 = vst [vmem:[%s6029_s15 + $0x658] sm:$0xff] %v656_v11  ;;  %v658_v12 = vld [vmem:[%s6024_s14 + $0x1980] sm:$0xff]  ;;  %v660_v13 = vld [vmem:[%s6024_s14 + $0x1988] sm:$0xff] }
  0x76   : > { %v662_v14 = vld [vmem:[%s6024_s14 + $0x19c0] sm:$0xff]  ;;  %659 = vst [vmem:[%s6029_s15 + $0x660] sm:$0xff] %v658_v12  ;;  %661 = vst [vmem:[%s6029_s15 + $0x668] sm:$0xff] %v660_v13  ;;  %v664_v15 = vld [vmem:[%s6024_s14 + $0x19c8] sm:$0xff] }
  0x77   : > { %663 = vst [vmem:[%s6029_s15 + $0x670] sm:$0xff] %v662_v14  ;;  %v666_v16 = vld [vmem:[%s6024_s14 + $0x1a00] sm:$0xff]  ;;  %v668_v17 = vld [vmem:[%s6024_s14 + $0x1a08] sm:$0xff]  ;;  %665 = vst [vmem:[%s6029_s15 + $0x678] sm:$0xff] %v664_v15 }
  0x78   : > { %667 = vst [vmem:[%s6029_s15 + $0x680] sm:$0xff] %v666_v16  ;;  %669 = vst [vmem:[%s6029_s15 + $0x688] sm:$0xff] %v668_v17  ;;  %v670_v18 = vld [vmem:[%s6024_s14 + $0x1a40] sm:$0xff]  ;;  %v672_v19 = vld [vmem:[%s6024_s14 + $0x1a48] sm:$0xff] }
  0x79   : > { %v674_v20 = vld [vmem:[%s6024_s14 + $0x1a80] sm:$0xff]  ;;  %671 = vst [vmem:[%s6029_s15 + $0x690] sm:$0xff] %v670_v18  ;;  %673 = vst [vmem:[%s6029_s15 + $0x698] sm:$0xff] %v672_v19  ;;  %v676_v21 = vld [vmem:[%s6024_s14 + $0x1a88] sm:$0xff] }
  0x7a   : > { %675 = vst [vmem:[%s6029_s15 + $0x6a0] sm:$0xff] %v674_v20  ;;  %v678_v22 = vld [vmem:[%s6024_s14 + $0x1ac0] sm:$0xff]  ;;  %v680_v23 = vld [vmem:[%s6024_s14 + $0x1ac8] sm:$0xff]  ;;  %677 = vst [vmem:[%s6029_s15 + $0x6a8] sm:$0xff] %v676_v21 }
  0x7b   : > { %679 = vst [vmem:[%s6029_s15 + $0x6b0] sm:$0xff] %v678_v22  ;;  %681 = vst [vmem:[%s6029_s15 + $0x6b8] sm:$0xff] %v680_v23  ;;  %v682_v24 = vld [vmem:[%s6024_s14 + $0x1b00] sm:$0xff]  ;;  %v684_v25 = vld [vmem:[%s6024_s14 + $0x1b08] sm:$0xff] }
  0x7c   : > { %v686_v26 = vld [vmem:[%s6024_s14 + $0x1b40] sm:$0xff]  ;;  %683 = vst [vmem:[%s6029_s15 + $0x6c0] sm:$0xff] %v682_v24  ;;  %685 = vst [vmem:[%s6029_s15 + $0x6c8] sm:$0xff] %v684_v25  ;;  %v688_v27 = vld [vmem:[%s6024_s14 + $0x1b48] sm:$0xff] }
  0x7d   : > { %687 = vst [vmem:[%s6029_s15 + $0x6d0] sm:$0xff] %v686_v26  ;;  %v690_v28 = vld [vmem:[%s6024_s14 + $0x1b80] sm:$0xff]  ;;  %v692_v29 = vld [vmem:[%s6024_s14 + $0x1b88] sm:$0xff]  ;;  %689 = vst [vmem:[%s6029_s15 + $0x6d8] sm:$0xff] %v688_v27 }
  0x7e   : > { %691 = vst [vmem:[%s6029_s15 + $0x6e0] sm:$0xff] %v690_v28  ;;  %693 = vst [vmem:[%s6029_s15 + $0x6e8] sm:$0xff] %v692_v29  ;;  %v694_v30 = vld [vmem:[%s6024_s14 + $0x1bc0] sm:$0xff]  ;;  %v696_v31 = vld [vmem:[%s6024_s14 + $0x1bc8] sm:$0xff] }
  0x7f   : > { %v698_v32 = vld [vmem:[%s6024_s14 + $0x1c00] sm:$0xff]  ;;  %695 = vst [vmem:[%s6029_s15 + $0x6f0] sm:$0xff] %v694_v30  ;;  %697 = vst [vmem:[%s6029_s15 + $0x6f8] sm:$0xff] %v696_v31  ;;  %v700_v33 = vld [vmem:[%s6024_s14 + $0x1c08] sm:$0xff] }
  0x80   : > { %699 = vst [vmem:[%s6029_s15 + $0x700] sm:$0xff] %v698_v32  ;;  %v702_v34 = vld [vmem:[%s6024_s14 + $0x1c40] sm:$0xff]  ;;  %v704_v35 = vld [vmem:[%s6024_s14 + $0x1c48] sm:$0xff]  ;;  %701 = vst [vmem:[%s6029_s15 + $0x708] sm:$0xff] %v700_v33 }
  0x81   : > { %703 = vst [vmem:[%s6029_s15 + $0x710] sm:$0xff] %v702_v34  ;;  %705 = vst [vmem:[%s6029_s15 + $0x718] sm:$0xff] %v704_v35  ;;  %v706_v36 = vld [vmem:[%s6024_s14 + $0x1c80] sm:$0xff]  ;;  %v708_v37 = vld [vmem:[%s6024_s14 + $0x1c88] sm:$0xff] }
  0x82   : > { %v710_v38 = vld [vmem:[%s6024_s14 + $0x1cc0] sm:$0xff]  ;;  %707 = vst [vmem:[%s6029_s15 + $0x720] sm:$0xff] %v706_v36  ;;  %709 = vst [vmem:[%s6029_s15 + $0x728] sm:$0xff] %v708_v37  ;;  %v712_v39 = vld [vmem:[%s6024_s14 + $0x1cc8] sm:$0xff] }
  0x83   : > { %711 = vst [vmem:[%s6029_s15 + $0x730] sm:$0xff] %v710_v38  ;;  %v714_v40 = vld [vmem:[%s6024_s14 + $0x1d00] sm:$0xff]  ;;  %v716_v41 = vld [vmem:[%s6024_s14 + $0x1d08] sm:$0xff]  ;;  %713 = vst [vmem:[%s6029_s15 + $0x738] sm:$0xff] %v712_v39 }
  0x84   : > { %715 = vst [vmem:[%s6029_s15 + $0x740] sm:$0xff] %v714_v40  ;;  %717 = vst [vmem:[%s6029_s15 + $0x748] sm:$0xff] %v716_v41  ;;  %v718_v42 = vld [vmem:[%s6024_s14 + $0x1d40] sm:$0xff]  ;;  %v720_v43 = vld [vmem:[%s6024_s14 + $0x1d48] sm:$0xff] }
  0x85   : > { %v722_v44 = vld [vmem:[%s6024_s14 + $0x1d80] sm:$0xff]  ;;  %719 = vst [vmem:[%s6029_s15 + $0x750] sm:$0xff] %v718_v42  ;;  %721 = vst [vmem:[%s6029_s15 + $0x758] sm:$0xff] %v720_v43  ;;  %v724_v45 = vld [vmem:[%s6024_s14 + $0x1d88] sm:$0xff] }
  0x86   : > { %723 = vst [vmem:[%s6029_s15 + $0x760] sm:$0xff] %v722_v44  ;;  %v726_v46 = vld [vmem:[%s6024_s14 + $0x1dc0] sm:$0xff]  ;;  %v728_v47 = vld [vmem:[%s6024_s14 + $0x1dc8] sm:$0xff]  ;;  %725 = vst [vmem:[%s6029_s15 + $0x768] sm:$0xff] %v724_v45 }
  0x87   : > { %727 = vst [vmem:[%s6029_s15 + $0x770] sm:$0xff] %v726_v46  ;;  %729 = vst [vmem:[%s6029_s15 + $0x778] sm:$0xff] %v728_v47  ;;  %v730_v48 = vld [vmem:[%s6024_s14 + $0x1e00] sm:$0xff]  ;;  %v732_v49 = vld [vmem:[%s6024_s14 + $0x1e08] sm:$0xff] }
  0x88   : > { %v734_v50 = vld [vmem:[%s6024_s14 + $0x1e40] sm:$0xff]  ;;  %731 = vst [vmem:[%s6029_s15 + $0x780] sm:$0xff] %v730_v48  ;;  %733 = vst [vmem:[%s6029_s15 + $0x788] sm:$0xff] %v732_v49  ;;  %v736_v51 = vld [vmem:[%s6024_s14 + $0x1e48] sm:$0xff] }
  0x89   : > { %735 = vst [vmem:[%s6029_s15 + $0x790] sm:$0xff] %v734_v50  ;;  %v738_v52 = vld [vmem:[%s6024_s14 + $0x1e80] sm:$0xff]  ;;  %v740_v53 = vld [vmem:[%s6024_s14 + $0x1e88] sm:$0xff]  ;;  %737 = vst [vmem:[%s6029_s15 + $0x798] sm:$0xff] %v736_v51 }
  0x8a   : > { %739 = vst [vmem:[%s6029_s15 + $0x7a0] sm:$0xff] %v738_v52  ;;  %741 = vst [vmem:[%s6029_s15 + $0x7a8] sm:$0xff] %v740_v53  ;;  %v742_v54 = vld [vmem:[%s6024_s14 + $0x1ec0] sm:$0xff]  ;;  %v744_v55 = vld [vmem:[%s6024_s14 + $0x1ec8] sm:$0xff] }
  0x8b   : > { %v746_v56 = vld [vmem:[%s6024_s14 + $0x1f00] sm:$0xff]  ;;  %743 = vst [vmem:[%s6029_s15 + $0x7b0] sm:$0xff] %v742_v54  ;;  %745 = vst [vmem:[%s6029_s15 + $0x7b8] sm:$0xff] %v744_v55  ;;  %v748_v57 = vld [vmem:[%s6024_s14 + $0x1f08] sm:$0xff] }
  0x8c   : > { %747 = vst [vmem:[%s6029_s15 + $0x7c0] sm:$0xff] %v746_v56  ;;  %v750_v58 = vld [vmem:[%s6024_s14 + $0x1f40] sm:$0xff]  ;;  %v752_v59 = vld [vmem:[%s6024_s14 + $0x1f48] sm:$0xff]  ;;  %749 = vst [vmem:[%s6029_s15 + $0x7c8] sm:$0xff] %v748_v57 }
  0x8d   : > { %751 = vst [vmem:[%s6029_s15 + $0x7d0] sm:$0xff] %v750_v58  ;;  %753 = vst [vmem:[%s6029_s15 + $0x7d8] sm:$0xff] %v752_v59  ;;  %v754_v60 = vld [vmem:[%s6024_s14 + $0x1f80] sm:$0xff]  ;;  %v756_v61 = vld [vmem:[%s6024_s14 + $0x1f88] sm:$0xff] }
  0x8e   : > { %v758_v62 = vld [vmem:[%s6024_s14 + $0x1fc0] sm:$0xff]  ;;  %755 = vst [vmem:[%s6029_s15 + $0x7e0] sm:$0xff] %v754_v60  ;;  %757 = vst [vmem:[%s6029_s15 + $0x7e8] sm:$0xff] %v756_v61  ;;  %v760_v63 = vld [vmem:[%s6024_s14 + $0x1fc8] sm:$0xff] }
  0x8f   : > { %759 = vst [vmem:[%s6029_s15 + $0x7f0] sm:$0xff] %v758_v62  ;;  %761 = vst [vmem:[%s6029_s15 + $0x7f8] sm:$0xff] %v760_v63 }
  0x90 PF: > { %p4612_p5 = scmp.ge.s32.totalorder %s5942_s26, 1  ;;  %p783_p6 = scmp.lt.s32.totalorder %s5942_s26, 5 }
  0x92   : > { %p784_p7 = pnand %p4612_p5, %p783_p6 }
  0x93   : > { %s790_s16 = sand.u32 (!%p784_p7), 1, %s5934_s24   ;;  %s4614_s17 = sshll.u32 (!%p784_p7), %s6004_s27, 2 }
  0x94   : > { %787 = sbr.rel (%p784_p7) target bundleno = 1340 (0x53c), region = 67  ;;  %s4613_s18 = sshll.u32 (!%p784_p7), %s790_s16, 11 }
  0x95   : > { %p827_p8 = scmp.lt.s32.totalorder (!%p784_p7), %s4614_s17, 15  ;;  %s4615_s19 = sshll.u32 (!%p784_p7), %s6004_s27, 6 }
  0x96   : > { %p832_p9 = scmp.lt.s32.totalorder (!%p784_p7), %s4615_s19, 255  ;;  %s6556_s24 = scalar_lea.vmem (!%p784_p7), [#allocation4], %s4613_s18 }
  0x97   : > { %p4617_p10 = scmp.ne.s32.totalorder (!%p784_p7), %s6004_s27, 0 }
  0x99   : > { %s7503_s17 = smov (!%p827_p8, %s4614_s17), 15  ;;  %s7505_s19 = smov (!%p832_p9, %s4615_s19), 255 }
  0x9a   : > { %s829_s22 = scalar_lea.vmem %s7479_s4, %s7503_s17  ;;  %s4616_s23 = sshll.u32 %s7505_s19, 2 }
  0x9b   : > { %s6554_s30 = scalar_lea.vmem %s7480_s5, %s4616_s23  ;;  %841 = sbr.rel (%p4617_p10) target bundleno = 650 (0x28a), region = 75 }
  0xa0   : > { %v5345_v0 = vld [vmem:[%s7476_s1 + $0x78] sm:$0xff]   ;;  %v5349_v4 = vld [vmem:[%s7476_s1 + $0x70] sm:$0xff]   ;;  %v5353_v8 = vld [vmem:[%s7476_s1 + $0x68] sm:$0xff]   ;;  %vm1586_vm0 = vcmask 261120   ;;  %vm2026_vm1 = vcmask 523264   ;;  %vm2033_vm2 = vcmask 516096  }
  0xa1   : > { %v5346_v1 = vld [vmem:[%s7476_s1 + $0xf8] sm:$0xff]   ;;  %5029 = vmatprep.subr.bf16.mxu0 %v5345_v0  ;;  %v5350_v5 = vld [vmem:[%s7476_s1 + $0xf0] sm:$0xff]   ;;  %v5354_v9 = vld [vmem:[%s7476_s1 + $0xe8] sm:$0xff]   ;;  %s5945_s13 = smov 64   ;;  %vm2055_vm3 = vcmask 1040896  }
  0xa2   : > { %v5347_v2 = vld [vmem:[%s7476_s1 + $0x38] sm:$0xff]   ;;  %5093 = vmatprep.subr.bf16.mxu1 %v5346_v1  ;;  %v5351_v6 = vld [vmem:[%s7476_s1 + $0x30] sm:$0xff]   ;;  %v5355_v10 = vld [vmem:[%s7476_s1 + $0x28] sm:$0xff]  }
  0xa3   : > { %v5348_v3 = vld [vmem:[%s7476_s1 + $0xb8] sm:$0xff]   ;;  %5030 = vmatpush3.bf16.msra.mxu0 %v5347_v2  ;;  %v5352_v7 = vld [vmem:[%s7476_s1 + $0xb0] sm:$0xff]   ;;  %v5356_v11 = vld [vmem:[%s7476_s1 + $0xa8] sm:$0xff]  }
  0xa4   : > { %5094 = vmatpush3.bf16.msra.mxu1 %v5348_v3  ;;  %5031 = vmatprep.subr.bf16.mxu0 %v5349_v4  ;;  %v5357_v12 = vld [vmem:[%s7476_s1 + $0x60] sm:$0xff]   ;;  %v5361_v16 = vld [vmem:[%s7476_s1 + $0x58] sm:$0xff]   ;;  %v5365_v20 = vld [vmem:[%s7476_s1 + $0x50] sm:$0xff]  }
  0xa5   : > { %5095 = vmatprep.subr.bf16.mxu1 %v5350_v5  ;;  %v5358_v13 = vld [vmem:[%s7476_s1 + $0xe0] sm:$0xff]   ;;  %v5362_v17 = vld [vmem:[%s7476_s1 + $0xd8] sm:$0xff]   ;;  %v5366_v21 = vld [vmem:[%s7476_s1 + $0xd0] sm:$0xff]  }
  0xa6   : > { %v5359_v14 = vld [vmem:[%s7476_s1 + $0x20] sm:$0xff]   ;;  %v5363_v18 = vld [vmem:[%s7476_s1 + $0x18] sm:$0xff]   ;;  %v5367_v22 = vld [vmem:[%s7476_s1 + $0x10] sm:$0xff]  }
  0xa7   : > { %5032 = vmatpush3.bf16.msra.mxu0 %v5351_v6  ;;  %v5360_v15 = vld [vmem:[%s7476_s1 + $0xa0] sm:$0xff]   ;;  %v5364_v19 = vld [vmem:[%s7476_s1 + $0x98] sm:$0xff]   ;;  %v5368_v23 = vld [vmem:[%s7476_s1 + $0x90] sm:$0xff]  }
  0xa8   : > { %5096 = vmatpush3.bf16.msra.mxu1 %v5352_v7  ;;  %5033 = vmatprep.subr.bf16.mxu0 %v5353_v8  ;;  %v5369_v24 = vld [vmem:[%s7476_s1 + $0x48] sm:$0xff]   ;;  %v5373_v28 = vld [vmem:[%s7476_s1 + $0x40] sm:$0xff]   ;;  %v5383_v36 = vld [vmem:[%s7476_s1 + $0x178] sm:$0xff]  }
  0xa9   : > { %5097 = vmatprep.subr.bf16.mxu1 %v5354_v9  ;;  %v5370_v25 = vld [vmem:[%s7476_s1 + $0xc8] sm:$0xff]   ;;  %v5374_v29 = vld [vmem:[%s7476_s1 + $0xc0] sm:$0xff]   ;;  %v5384_v37 = vld [vmem:[%s7476_s1 + $0x138] sm:$0xff]  }
  0xaa   : > { %v5371_v26 = vld [vmem:[%s7476_s1 + $0x8] sm:$0xff]   ;;  %v5375_v30 = vld [vmem:[%s7476_s1] sm:$0xff]   ;;  %v5385_v38 = vld [vmem:[%s7475_s0 + $0x3c] ss:$28 sps:$4 sm:$0xff]  }
  0xab   : > { %5034 = vmatpush3.bf16.msra.mxu0 %v5355_v10  ;;  %v5372_v27 = vld [vmem:[%s7476_s1 + $0x88] sm:$0xff]   ;;  %v5376_v31 = vld [vmem:[%s7476_s1 + $0x80] sm:$0xff]   ;;  %v5389_v40 = vld [vmem:[%s7475_s0 + $0x38] ss:$28 sps:$4 sm:$0xff]  }
  0xac   : > { %5098 = vmatpush3.bf16.msra.mxu1 %v5356_v11  ;;  %5035 = vmatprep.subr.bf16.mxu0 %v5357_v12  ;;  %v5377_v32 = vld [vmem:[%s7475_s0] ss:$28 sps:$4 sm:$0xff]   ;;  %v5380_v34 = vld [vmem:[%s7475_s0 + $0x8] ss:$28 sps:$4 sm:$0xff]   ;;  %v5391_v42 = vld [vmem:[%s7476_s1 + $0x170] sm:$0xff]  }
  0xad   : > { %5099 = vmatprep.subr.bf16.mxu1 %v5358_v13  ;;  %v5379_v33 = vld [vmem:[%s7475_s0 + $0x4] ss:$28 sps:$4 sm:$0xff]   ;;  %v5382_v35 = vld [vmem:[%s7475_s0 + $0xc] ss:$28 sps:$4 sm:$0xff]   ;;  %v5392_v43 = vld [vmem:[%s7476_s1 + $0x130] sm:$0xff]  }
  0xae   : > { %1643 = vmatprep.mubr.bf16.mxu0 %v5379_v33  ;;  %1740 = vmatprep.mubr.bf16.mxu1 %v5382_v35  ;;  %v5387_v39 = vld [vmem:[%s7475_s0 + $0x44] ss:$28 sps:$4 sm:$0xff]   ;;  %v5393_v44 = vld [vmem:[%s7475_s0 + $0x74] ss:$28 sps:$4 sm:$0xff]   ;;  %v5395_v45 = vld [vmem:[%s7475_s0 + $0x7c] ss:$28 sps:$4 sm:$0xff]  }
  0xaf   : > { %5036 = vmatpush3.bf16.msra.mxu0 %v5359_v14  ;;  %v5390_v41 = vld [vmem:[%s7475_s0 + $0x40] ss:$28 sps:$4 sm:$0xff]   ;;  %v5399_v46 = vld [vmem:[%s7476_s1 + $0x168] sm:$0xff]   ;;  %v5398_v49 = vld [vmem:[%s7475_s0 + $0x78] ss:$28 sps:$4 sm:$0xff]  }
  0xb0   : > { %5100 = vmatpush3.bf16.msra.mxu1 %v5360_v15  ;;  %5037 = vmatprep.subr.bf16.mxu0 %v5361_v16  ;;  %v5400_v47 = vld [vmem:[%s7476_s1 + $0x128] sm:$0xff]   ;;  %v5403_v51 = vld [vmem:[%s7475_s0 + $0xb4] ss:$28 sps:$4 sm:$0xff]   ;;  %v5407_v52 = vld [vmem:[%s7476_s1 + $0x160] sm:$0xff]  }
  0xb1   : > { %5101 = vmatprep.subr.bf16.mxu1 %v5362_v17  ;;  %v5397_v48 = vld [vmem:[%s7475_s0 + $0x70] ss:$28 sps:$4 sm:$0xff]   ;;  %v5408_v53 = vld [vmem:[%s7476_s1 + $0x120] sm:$0xff]   ;;  %v5415_v54 = vld [vmem:[%s7476_s1 + $0x158] sm:$0xff]  }
  0xb2   : > { %v5401_v50 = vld [vmem:[%s7475_s0 + $0xac] ss:$28 sps:$4 sm:$0xff]   ;;  %v5416_v55 = vld [vmem:[%s7476_s1 + $0x118] sm:$0xff]   ;;  %v5409_v58 = vld [vmem:[%s7475_s0 + $0xe4] ss:$28 sps:$4 sm:$0xff]  }
  0xb3   : > { %5038 = vmatpush3.bf16.msra.mxu0 %v5363_v18  ;;  %v5405_v56 = vld [vmem:[%s7475_s0 + $0xa8] ss:$28 sps:$4 sm:$0xff]   ;;  %v5406_v57 = vld [vmem:[%s7475_s0 + $0xb0] ss:$28 sps:$4 sm:$0xff]   ;;  %v5413_v62 = vld [vmem:[%s7475_s0 + $0xe0] ss:$28 sps:$4 sm:$0xff]  }
  0xb4   : > { %5102 = vmatpush3.bf16.msra.mxu1 %v5364_v19  ;;  %5039 = vmatprep.subr.bf16.mxu0 %v5365_v20  ;;  %v5411_v59 = vld [vmem:[%s7475_s0 + $0xec] ss:$28 sps:$4 sm:$0xff]   ;;  %v5423_v60 = vld [vmem:[%s7476_s1 + $0x150] sm:$0xff]   ;;  %v5417_v2 = vld [vmem:[%s7475_s0 + $0x11c] ss:$28 sps:$4 sm:$0xff]  }
  0xb5   : > { %5103 = vmatprep.subr.bf16.mxu1 %v5366_v21  ;;  %v5424_v61 = vld [vmem:[%s7476_s1 + $0x110] sm:$0xff]   ;;  %v5414_v63 = vld [vmem:[%s7475_s0 + $0xe8] ss:$28 sps:$4 sm:$0xff]   ;;  %v5422_v7 = vld [vmem:[%s7475_s0 + $0x120] ss:$28 sps:$4 sm:$0xff]  }
  0xb6   : > { %v5431_v0 = vld [vmem:[%s7476_s1 + $0x148] sm:$0xff]   ;;  %v5419_v3 = vld [vmem:[%s7475_s0 + $0x124] ss:$28 sps:$4 sm:$0xff]   ;;  %v5421_v6 = vld [vmem:[%s7475_s0 + $0x118] ss:$28 sps:$4 sm:$0xff]  }
  0xb7   : > { %5040 = vmatpush3.bf16.msra.mxu0 %v5367_v22  ;;  %v5432_v1 = vld [vmem:[%s7476_s1 + $0x108] sm:$0xff]   ;;  %v5439_v4 = vld [vmem:[%s7476_s1 + $0x140] sm:$0xff]   ;;  %v5425_v9 = vld [vmem:[%s7475_s0 + $0x154] ss:$28 sps:$4 sm:$0xff]  }
  0xb8   : > { %5104 = vmatpush3.bf16.msra.mxu1 %v5368_v23  ;;  %5041 = vmatprep.subr.bf16.mxu0 %v5369_v24  ;;  %v5440_v5 = vld [vmem:[%s7476_s1 + $0x100] sm:$0xff]   ;;  %v5447_v8 = vld [vmem:[%s7476_s1 + $0x188] sm:$0xff]   ;;  %v5427_v10 = vld [vmem:[%s7475_s0 + $0x15c] ss:$28 sps:$4 sm:$0xff]  }
  0xb9   : > { %5105 = vmatprep.subr.bf16.mxu1 %v5370_v25  ;;  %v5429_v11 = vld [vmem:[%s7475_s0 + $0x150] ss:$28 sps:$4 sm:$0xff]   ;;  %v5430_v12 = vld [vmem:[%s7475_s0 + $0x158] ss:$28 sps:$4 sm:$0xff]   ;;  %v5437_v15 = vld [vmem:[%s7475_s0 + $0x188] ss:$28 sps:$4 sm:$0xff]  }
  0xba   : > { %v5433_v13 = vld [vmem:[%s7475_s0 + $0x18c] ss:$28 sps:$4 sm:$0xff]   ;;  %v5435_v14 = vld [vmem:[%s7475_s0 + $0x194] ss:$28 sps:$4 sm:$0xff]   ;;  %v5446_v18 = vld [vmem:[%s7475_s0 + $0x164] ss:$28 sps:$4 sm:$0xff]  }
  0xbb   : > { %5042 = vmatpush3.bf16.msra.mxu0 %v5371_v26  ;;  %v5438_v16 = vld [vmem:[%s7475_s0 + $0x190] ss:$28 sps:$4 sm:$0xff]   ;;  %v5444_v20 = vld [vmem:[%s7475_s0 + $0x160] ss:$28 sps:$4 sm:$0xff]   ;;  %v5452_v24 = vld [vmem:[%s7475_s0 + $0x48] ss:$28 sps:$4 sm:$0xff]  }
  0xbc   : > { %5106 = vmatpush3.bf16.msra.mxu1 %v5372_v27  ;;  %5043 = vmatprep.subr.bf16.mxu0 %v5373_v28  ;;  %v5443_v17 = vld [vmem:[%s7475_s0 + $0x14] ss:$28 sps:$4 sm:$0xff]   ;;  %v5448_v21 = vld [vmem:[%s7475_s0 + $0x4c] ss:$28 sps:$4 sm:$0xff]   ;;  %v5450_v22 = vld [vmem:[%s7475_s0 + $0x19c] ss:$28 sps:$4 sm:$0xff]  }
  0xbd   : > { %5107 = vmatprep.subr.bf16.mxu1 %v5374_v29  ;;  %v5441_v19 = vld [vmem:[%s7475_s0 + $0x10] ss:$28 sps:$4 sm:$0xff]   ;;  %v5454_v23 = vld [vmem:[%s7476_s1 + $0x180] sm:$0xff]   ;;  %v5453_v25 = vld [vmem:[%s7475_s0 + $0x198] ss:$28 sps:$4 sm:$0xff]  }
  0xbe   : > { %v5455_v26 = vld [vmem:[%s7475_s0 + $0x84] ss:$28 sps:$4 sm:$0xff]   ;;  %v5457_v27 = vld [vmem:[%s7475_s0 + $0x18] ss:$28 sps:$4 sm:$0xff]   ;;  %v5459_v29 = vld [vmem:[%s7475_s0 + $0x50] ss:$28 sps:$4 sm:$0xff]  }
  0xbf   : > { %5044 = vmatpush3.bf16.msra.mxu0 %v5375_v30  ;;  %v5458_v28 = vld [vmem:[%s7475_s0 + $0x80] ss:$28 sps:$4 sm:$0xff]   ;;  %v5467_v35 = vld [vmem:[%s7475_s0 + $0xf8] ss:$28 sps:$4 sm:$0xff]  }
  0xc0   : > { %5108 = vmatpush3.bf16.msra.mxu1 %v5376_v31  ;;  %5157 = vmatprep.subr.bf16.mxu0 %v5383_v36  ;;  %v5460_v30 = vld [vmem:[%s7475_s0 + $0xbc] ss:$28 sps:$4 sm:$0xff]   ;;  %v5462_v31 = vld [vmem:[%s7475_s0 + $0x88] ss:$28 sps:$4 sm:$0xff]  }
  0xc1   : > { %5295 = vmatprep.subr.bf16.mxu1 %v5383_v36  ;;  %v5464_v33 = vld [vmem:[%s7475_s0 + $0xc0] ss:$28 sps:$4 sm:$0xff]   ;;  %v5468_v36 = vld [vmem:[%s7475_s0 + $0xf0] ss:$28 sps:$4 sm:$0xff]  }
  0xc2   : > { %1644 = vmatmul.mubr.bf16.vlgmr.msra.gmra.mxu0 %v5377_v32  ;;  %v5463_v32 = vld [vmem:[%s7475_s0 + $0xb8] ss:$28 sps:$4 sm:$0xff]  }
  0xc3   : > { %1741 = vmatmul.mubr.bf16.vlgmr.msra.gmra.mxu1 %v5380_v34  ;;  %5158 = vmatpush3.bf16.msra.mxu0 %v5384_v37  ;;  %v5465_v34 = vld [vmem:[%s7475_s0 + $0xf4] ss:$28 sps:$4 sm:$0xff]  }
  0xc4   : > { %5303 = vmatpush3.bf16.msra.mxu1 %v5384_v37  ;;  %1651 = vmatprep.mubr.bf16.mxu0 %v5385_v38  ;;  %v5469_v37 = vld [vmem:[%s7475_s0 + $0x130] ss:$28 sps:$4 sm:$0xff]  }
  0xc5   : > { %1748 = vmatprep.mubr.bf16.mxu1 %v5387_v39  ;;  %5296 = vmatprep.subr.bf16.mxu1 %v5391_v42  ;;  %v5470_v38 = vld [vmem:[%s7475_s0 + $0x12c] ss:$28 sps:$4 sm:$0xff]  }
  0xc6   : > { %5159 = vmatprep.subr.bf16.mxu0 %v5391_v42  ;;  %v5472_v39 = vld [vmem:[%s7475_s0 + $0x168] ss:$28 sps:$4 sm:$0xff]  }
  0xc7   : > { %5160 = vmatpush3.bf16.msra.mxu0 %v5392_v43 }
  0xc8   : > { %5304 = vmatpush3.bf16.msra.mxu1 %v5392_v43  ;;  %5161 = vmatprep.subr.bf16.mxu0 %v5399_v46 }
  0xc9   : > { %5297 = vmatprep.subr.bf16.mxu1 %v5399_v46 }
  0xca   : > { %1652 = vmatmul.mubr.bf16.gmra.mxu0 %v5389_v40  ;;  %v5473_v40 = vld [vmem:[%s7475_s0 + $0x128] ss:$28 sps:$4 sm:$0xff]  }
  0xcb   : > { %1749 = vmatmul.mubr.bf16.gmra.mxu1 %v5390_v41  ;;  %1659 = vmatprep.mubr.bf16.mxu0 %v5393_v44  ;;  %v5474_v41 = vld [vmem:[%s7475_s0 + $0x1a0] ss:$28 sps:$4 sm:$0xff]  }
  0xcc   : > { %1756 = vmatprep.mubr.bf16.mxu1 %v5395_v45  ;;  %5305 = vmatpush3.bf16.msra.mxu1 %v5400_v47 }
  0xcd   : > { %5162 = vmatpush3.bf16.msra.mxu0 %v5400_v47  ;;  %5298 = vmatprep.subr.bf16.mxu1 %v5407_v52 }
  0xce   : > { %5163 = vmatprep.subr.bf16.mxu0 %v5407_v52 }
  0xd0   : > { %5306 = vmatpush3.bf16.msra.mxu1 %v5408_v53 }
  0xd1   : > { %5164 = vmatpush3.bf16.msra.mxu0 %v5408_v53  ;;  %5299 = vmatprep.subr.bf16.mxu1 %v5415_v54 }
  0xd2   : > { %1660 = vmatmul.mubr.bf16.gmra.mxu0 %v5397_v48  ;;  %5165 = vmatprep.subr.bf16.mxu0 %v5415_v54 }
  0xd3   : > { %1757 = vmatmul.mubr.bf16.gmra.mxu1 %v5398_v49  ;;  %1667 = vmatprep.mubr.bf16.mxu0 %v5401_v50 }
  0xd4   : > { %1764 = vmatprep.mubr.bf16.mxu1 %v5403_v51  ;;  %5307 = vmatpush3.bf16.msra.mxu1 %v5416_v55 }
  0xd5   : > { %5166 = vmatpush3.bf16.msra.mxu0 %v5416_v55  ;;  %5300 = vmatprep.subr.bf16.mxu1 %v5423_v60 }
  0xd6   : > { %5167 = vmatprep.subr.bf16.mxu0 %v5423_v60 }
  0xd8   : > { %5308 = vmatpush3.bf16.msra.mxu1 %v5424_v61 }
  0xd9   : > { %5168 = vmatpush3.bf16.msra.mxu0 %v5424_v61  ;;  %5301 = vmatprep.subr.bf16.mxu1 %v5431_v0 }
  0xda   : > { %1668 = vmatmul.mubr.bf16.gmra.mxu0 %v5405_v56  ;;  %5169 = vmatprep.subr.bf16.mxu0 %v5431_v0 }
  0xdb   : > { %1765 = vmatmul.mubr.bf16.gmra.mxu1 %v5406_v57  ;;  %1675 = vmatprep.mubr.bf16.mxu0 %v5409_v58 }
  0xdc   : > { %1772 = vmatprep.mubr.bf16.mxu1 %v5411_v59  ;;  %5309 = vmatpush3.bf16.msra.mxu1 %v5432_v1 }
  0xdd   : > { %5170 = vmatpush3.bf16.msra.mxu0 %v5432_v1  ;;  %5302 = vmatprep.subr.bf16.mxu1 %v5439_v4 }
  0xde   : > { %5171 = vmatprep.subr.bf16.mxu0 %v5439_v4 }
  0xe0   : > { %5310 = vmatpush3.bf16.msra.mxu1 %v5440_v5 }
  0xe1   : > { %5172 = vmatpush3.bf16.msra.mxu0 %v5440_v5  ;;  %5275 = vmatprep.subr.bf16.mxu1 %v5447_v8 }
  0xe2   : > { %1676 = vmatmul.mubr.bf16.gmra.mxu0 %v5413_v62 }
  0xe3   : > { %1773 = vmatmul.mubr.bf16.gmra.mxu1 %v5414_v63  ;;  %1683 = vmatprep.mubr.bf16.mxu0 %v5417_v2 }
  0xe4   : > { %1780 = vmatprep.mubr.bf16.mxu1 %v5419_v3 }
  0xea   : > { %1684 = vmatmul.mubr.bf16.gmra.mxu0 %v5421_v6 }
  0xeb   : > { %1781 = vmatmul.mubr.bf16.gmra.mxu1 %v5422_v7  ;;  %1691 = vmatprep.mubr.bf16.mxu0 %v5425_v9 }
  0xec   : > { %1788 = vmatprep.mubr.bf16.mxu1 %v5427_v10 }
  0xf2   : > { %1692 = vmatmul.mubr.bf16.gmra.mxu0 %v5429_v11 }
  0xf3   : > { %1789 = vmatmul.mubr.bf16.gmra.mxu1 %v5430_v12  ;;  %1699 = vmatprep.mubr.bf16.mxu0 %v5433_v13 }
  0xf4   : > { %1796 = vmatprep.mubr.bf16.mxu1 %v5435_v14 }
  0xfa   : > { %1700 = vmatmul.mubr.bf16.gmra.mxu0 %v5437_v15 }
  0xfb   : > { %1797 = vmatmul.mubr.bf16.gmra.mxu1 %v5438_v16  ;;  %1837 = vmatprep.mubr.bf16.mxu0 %v5443_v17 }
  0xfc   : > { %1885 = vmatprep.mubr.bf16.mxu1 %v5446_v18 }
 0x102   : > { %1838 = vmatmul.mubr.bf16.vlgmr.msra.gmra.mxu0 %v5441_v19 }
 0x103   : > { %1886 = vmatmul.mubr.bf16.vlgmr.msra.gmra.mxu1 %v5444_v20  ;;  %1845 = vmatprep.mubr.bf16.mxu0 %v5448_v21 }
 0x104   : > { %5276 = vmatpush3.bf16.msra.mxu1 %v5447_v8  ;;  %1893 = vmatprep.mubr.bf16.mxu1 %v5450_v22 }
 0x105   : > { %5277 = vmatprep.subr.bf16.mxu1 %v5454_v23 }
 0x108   : > { %5278 = vmatpush3.bf16.msra.mxu1 %v5454_v23 }
 0x10a   : > { %1846 = vmatmul.mubr.bf16.gmra.mxu0 %v5452_v24 }
 0x10b   : > { %1894 = vmatmul.mubr.bf16.gmra.mxu1 %v5453_v25  ;;  %1853 = vmatprep.mubr.bf16.mxu0 %v5455_v26 }
 0x10c   : > { %5279 = vmatprep.mubr.msk.bf16.mxu1 %vm1586_vm0, %v5457_v27 }
 0x112   : > { %1854 = vmatmul.mubr.bf16.gmra.mxu0 %v5458_v28 }
 0x113   : > { %5280 = vmatmul.mubr.msk.bf16.vlgmr.msra.gmra.mxu1 %vm1586_vm0, %v5459_v29  ;;  %1861 = vmatprep.mubr.bf16.mxu0 %v5460_v30 }
 0x114   : > { %5283 = vmatprep.mubr.msk.bf16.mxu1 %vm1586_vm0, %v5462_v31 }
 0x11a   : > { %1862 = vmatmul.mubr.bf16.gmra.mxu0 %v5463_v32 }
 0x11b   : > { %5284 = vmatmul.mubr.msk.bf16.gmra.mxu1 %vm1586_vm0, %v5464_v33  ;;  %1869 = vmatprep.mubr.bf16.mxu0 %v5465_v34 }
 0x11c   : > { %5287 = vmatprep.mubr.msk.bf16.mxu1 %vm1586_vm0, %v5467_v35 }
 0x122   : > { %1870 = vmatmul.mubr.bf16.gmra.mxu0 %v5468_v36 }
 0x123   : > { %5288 = vmatmul.mubr.msk.bf16.gmra.mxu1 %vm1586_vm0, %v5469_v37  ;;  %1877 = vmatprep.mubr.bf16.mxu0 %v5470_v38 }
 0x124   : > { %5291 = vmatprep.mubr.msk.bf16.mxu1 %vm1586_vm0, %v5472_v39 }
 0x12a   : > { %1878 = vmatmul.mubr.bf16.gmra.mxu0 %v5473_v40 }
 0x12b   : > { %5292 = vmatmul.mubr.msk.bf16.gmra.mxu1 %vm1586_vm0, %v5474_v41 }
 0x182   : > { %v5045_v42 = vpop.f32.mrf.mxu0 }
 0x183   : > { %v5109_v43 = vpop.f32.mrf.mxu1 }
 0x184   : > { %v5046_v44 = vpop.f32.mrf.mxu0 }
 0x185   : > { %v5047_v45 = vadd.f32 %v5046_v44, %v5045_v42  ;;  %v5110_v46 = vpop.f32.mrf.mxu1 }
 0x186   : > { %v5111_v47 = vadd.f32 %v5110_v46, %v5109_v43  ;;  %v5048_v48 = vpop.f32.mrf.mxu0 }
 0x187   : > { %v5112_v49 = vpop.f32.mrf.mxu1 }
 0x188   : > { %v6887_v50 = vadd.f32 %v5111_v47, %v5047_v45  ;;  %v5049_v51 = vpop.f32.mrf.mxu0 }
 0x189   : > { %v5050_v52 = vadd.f32 %v5049_v51, %v5048_v48  ;;  %v5113_v53 = vpop.f32.mrf.mxu1 }
 0x18a   : > { %v5114_v54 = vadd.f32 %v5113_v53, %v5112_v49  ;;  %v5051_v55 = vpop.f32.mrf.mxu0 }
 0x18b   : > { %v5115_v56 = vpop.f32.mrf.mxu1 }
 0x18c   : > { %v6889_v57 = vadd.f32 %v5114_v54, %v5050_v52  ;;  %v5052_v58 = vpop.f32.mrf.mxu0 }
 0x18d   : > { %v5053_v59 = vadd.f32 %v5052_v58, %v5051_v55  ;;  %v5116_v60 = vpop.f32.mrf.mxu1 }
 0x18e   : > { %v5117_v61 = vadd.f32 %v5116_v60, %v5115_v56  ;;  %v5054_v62 = vpop.f32.mrf.mxu0 }
 0x18f   : > { %v5118_v63 = vpop.f32.mrf.mxu1 }
 0x190   : > { %v6891_v0 = vadd.f32 %v5117_v61, %v5053_v59  ;;  %v5055_v1 = vpop.f32.mrf.mxu0 }
 0x191   : > { %v5056_v2 = vadd.f32 %v5055_v1, %v5054_v62  ;;  %v5119_v3 = vpop.f32.mrf.mxu1 }
 0x192   : > { %v5120_v4 = vadd.f32 %v5119_v3, %v5118_v63  ;;  %v5057_v5 = vpop.f32.mrf.mxu0 }
 0x193   : > { %v5121_v6 = vpop.f32.mrf.mxu1 }
 0x194   : > { %v6893_v7 = vadd.f32 %v5120_v4, %v5056_v2  ;;  %v5058_v8 = vpop.f32.mrf.mxu0 }
 0x195   : > { %v5059_v9 = vadd.f32 %v5058_v8, %v5057_v5  ;;  %v5122_v10 = vpop.f32.mrf.mxu1 }
 0x196   : > { %v5123_v11 = vadd.f32 %v5122_v10, %v5121_v6  ;;  %v5060_v12 = vpop.f32.mrf.mxu0 }
 0x197   : > { %v5124_v13 = vpop.f32.mrf.mxu1 }
 0x198   : > { %v6895_v14 = vadd.f32 %v5123_v11, %v5059_v9  ;;  %v5061_v15 = vpop.f32.mrf.mxu0 }
 0x199   : > { %v5062_v16 = vadd.f32 %v5061_v15, %v5060_v12  ;;  %v5125_v17 = vpop.f32.mrf.mxu1 }
 0x19a   : > { %v5126_v18 = vadd.f32 %v5125_v17, %v5124_v13  ;;  %v5063_v19 = vpop.f32.mrf.mxu0 }
 0x19b   : > { %v5127_v20 = vpop.f32.mrf.mxu1 }
 0x19c   : > { %v6897_v21 = vadd.f32 %v5126_v18, %v5062_v16  ;;  %v5064_v22 = vpop.f32.mrf.mxu0 }
 0x19d   : > { %v5065_v23 = vadd.f32 %v5064_v22, %v5063_v19  ;;  %v5128_v24 = vpop.f32.mrf.mxu1 }
 0x19e   : > { %v5129_v25 = vadd.f32 %v5128_v24, %v5127_v20  ;;  %v5066_v26 = vpop.f32.mrf.mxu0 }
 0x19f   : > { %v5130_v27 = vpop.f32.mrf.mxu1 }
 0x1a0   : > { %v6899_v28 = vadd.f32 %v5129_v25, %v5065_v23  ;;  %v5067_v29 = vpop.f32.mrf.mxu0 }
 0x1a1   : > { %v5068_v30 = vadd.f32 %v5067_v29, %v5066_v26  ;;  %v5131_v31 = vpop.f32.mrf.mxu1 }
 0x1a2   : > { %v5132_v32 = vadd.f32 %v5131_v31, %v5130_v27  ;;  %v5069_v33 = vpop.f32.mrf.mxu0 }
 0x1a3   : > { %v5133_v34 = vpop.f32.mrf.mxu1 }
 0x1a4   : > { %v6901_v35 = vadd.f32 %v5132_v32, %v5068_v30  ;;  %v5070_v36 = vpop.f32.mrf.mxu0 }
 0x1a5   : > { %v5071_v37 = vadd.f32 %v5070_v36, %v5069_v33  ;;  %v5134_v38 = vpop.f32.mrf.mxu1 }
 0x1a6   : > { %v5135_v39 = vadd.f32 %v5134_v38, %v5133_v34  ;;  %v5072_v40 = vpop.f32.mrf.mxu0 }
 0x1a7   : > { %v5136_v41 = vpop.f32.mrf.mxu1 }
 0x1a8   : > { %v6903_v42 = vadd.f32 %v5135_v39, %v5071_v37  ;;  %v5073_v43 = vpop.f32.mrf.mxu0 }
 0x1a9   : > { %v5074_v44 = vadd.f32 %v5073_v43, %v5072_v40  ;;  %v5137_v45 = vpop.f32.mrf.mxu1 }
 0x1aa   : > { %v5138_v46 = vadd.f32 %v5137_v45, %v5136_v41  ;;  %v6905_v47 = vpop.f32.mrf.mxu0 }
 0x1ab   : > { %v6907_v48 = vpop.f32.mrf.mxu1 }
 0x1ac   : > { %v6909_v49 = vadd.f32 %v5138_v46, %v5074_v44  ;;  %v6911_v51 = vpop.f32.mrf.mxu0 }
 0x1ad   : > { %v6913_v52 = vpop.f32.mrf.mxu1 }
 0x1ae   : > { %7483 = vst [vmem:[#allocation8_spill] sm:$0xff] %v6909_v49  ;;  %v6915_v53 = vpop.f32.mrf.mxu0 }
 0x1af   : > { %v6917_v54 = vpop.f32.mrf.mxu1 }
 0x1b0   : > { %v6919_v55 = vpop.f32.mrf.mxu0 }
 0x1b1   : > { %v6921_v56 = vpop.f32.mrf.mxu1 }
 0x1b2   : > { %v6923_v58 = vpop.f32.mrf.mxu0 }
 0x1b3   : > { %v6925_v59 = vpop.f32.mrf.mxu1 }
 0x1b4   : > { %v6927_v60 = vpop.f32.mrf.mxu0 }
 0x1b5   : > { %v6929_v61 = vpop.f32.mrf.mxu1 }
 0x1b6   : > { %v6931_v62 = vpop.f32.mrf.mxu0 }
 0x1b7   : > { %v6933_v63 = vpop.f32.mrf.mxu1 }
 0x1b8   : > { %v6935_v1 = vpop.f32.mrf.mxu0 }
 0x1b9   : > { %v6937_v2 = vpop.f32.mrf.mxu1 }
 0x1ba   : > { %v6939_v3 = vpop.f32.mrf.mxu0 }
 0x1bb   : > { %v6941_v4 = vpop.f32.mrf.mxu1 }
 0x1bc   : > { %v6943_v5 = vpop.f32.mrf.mxu0 }
 0x1bd   : > { %v6945_v6 = vpop.f32.mrf.mxu1 }
 0x1be   : > { %v6947_v8 = vpop.f32.mrf.mxu0 }
 0x1bf   : > { %7484 = vst [vmem:[#allocation9_spill] sm:$0xff] %v6947_v8  ;;  %v6949_v9 = vpop.f32.mrf.mxu1 }
 0x1c0   : > { %7485 = vst [vmem:[#allocation10_spill] sm:$0xff] %v6949_v9  ;;  %v6951_v10 = vpop.f32.mrf.mxu0 }
 0x1c1   : > { %7486 = vst [vmem:[#allocation11_spill] sm:$0xff] %v6951_v10  ;;  %v6953_v11 = vpop.f32.mrf.mxu1 }
 0x1c2   : > { %7487 = vst [vmem:[#allocation12_spill] sm:$0xff] %v6953_v11  ;;  %v5173_v12 = vpop.f32.mrf.mxu0 }
 0x1c3   : > { %v6955_v13 = vpop.f32.mrf.mxu1 }
 0x1c4   : > { %v5174_v15 = vpop.f32.mrf.mxu0 }
 0x1c5   : > { %v6957_v16 = vpop.f32.mrf.mxu1  ;;  %v5175_v38 = vadd.f32 %v5174_v15, %v5173_v12 }
 0x1c6   : > { %v5176_v17 = vpop.f32.mrf.mxu0 }
 0x1c7   : > { %v6959_v18 = vpop.f32.mrf.mxu1  ;;  %v1840_v49 = vadd.f32 %v5175_v38, %v6887_v50 }
 0x1c8   : > { %v5177_v19 = vpop.f32.mrf.mxu0 }
 0x1c9   : > { %v6961_v20 = vpop.f32.mrf.mxu1  ;;  %v5178_v46 = vadd.f32 %v5177_v19, %v5176_v17 }
 0x1ca   : > { %7488 = vst [vmem:[#allocation13_spill] sm:$0xff] %v6961_v20  ;;  %v5179_v22 = vpop.f32.mrf.mxu0 }
 0x1cb   : > { %v6963_v23 = vpop.f32.mrf.mxu1  ;;  %v1843_v17 = vadd.f32 %v5178_v46, %v6889_v57 }
 0x1cc   : > { %v5180_v24 = vpop.f32.mrf.mxu0 }
 0x1cd   : > { %v6965_v25 = vpop.f32.mrf.mxu1  ;;  %v5181_v44 = vadd.f32 %v5180_v24, %v5179_v22 }
 0x1ce   : > { %v5182_v26 = vpop.f32.mrf.mxu0 }
 0x1cf   : > { %v6967_v27 = vpop.f32.mrf.mxu1 }
 0x1d0   : > { %7489 = vst [vmem:[#allocation14_spill] sm:$0xff] %v6967_v27  ;;  %v5183_v29 = vpop.f32.mrf.mxu0 }
 0x1d1   : > { %v6969_v30 = vpop.f32.mrf.mxu1  ;;  %v5184_v15 = vadd.f32 %v5183_v29, %v5182_v26 }
 0x1d2   : > { %7490 = vst [vmem:[#allocation15_spill] sm:$0xff] %v6969_v30  ;;  %v5185_v31 = vpop.f32.mrf.mxu0 }
 0x1d3   : > { %v5281_v32 = vpop.f32.mrf.mxu1 }
 0x1d4   : > { %v5186_v33 = vpop.f32.mrf.mxu0 }
 0x1d5   : > { %v1936_v34 = vpop.f32.mrf.mxu1  ;;  %v5187_v39 = vadd.f32 %v5186_v33, %v5185_v31  ;;  %v1848_v31 = vadd.f32 %v5181_v44, %v6891_v0  ;;  %v5153_v44 = vadd.f32 %v6945_v6, %v6941_v4  ;;  %v5144_v4 = vadd.f32 %v6921_v56, %v6917_v54  ;;  %v7493_v6 = vld [vmem:[#allocation11_spill] sm:$0xff] }
 0x1d6   : > { %v5188_v36 = vpop.f32.mrf.mxu0  ;;  %v6973_v8 = vadd.f32 %v1936_v34, %v1840_v49  ;;  %v5147_v34 = vadd.f32 %v6929_v61, %v6925_v59  ;;  %v5211_v59 = vadd.f32 %v6957_v16, %v6955_v13  ;;  %v5217_v16 = vadd.f32 %v6965_v25, %v6963_v23 }
 0x1d7   : > { %v5282_v37 = vpop.f32.mrf.mxu1  ;;  %v1856_v30 = vadd.f32 %v5187_v39, %v6895_v14  ;;  %v7497_v56 = vld [vmem:[#allocation14_spill] sm:$0xff] }
 0x1d8   : > { %v5189_v40 = vpop.f32.mrf.mxu0 }
 0x1d9   : > { %v1939_v41 = vpop.f32.mrf.mxu1  ;;  %v5190_v27 = vadd.f32 %v5189_v40, %v5188_v36 }
 0x1da   : > { %v5191_v43 = vpop.f32.mrf.mxu0  ;;  %v6987_v26 = vadd.f32 %v1939_v41, %v1843_v17  ;;  %v5141_v41 = vadd.f32 %v6913_v52, %v6907_v48  ;;  %v5150_v48 = vadd.f32 %v6937_v2, %v6933_v63 }
 0x1db   : > { %v5285_v45 = vpop.f32.mrf.mxu1  ;;  %v1859_v14 = vadd.f32 %v5190_v27, %v6897_v21 }
 0x1dc   : > { %v5192_v11 = vpop.f32.mrf.mxu0 }
 0x1dd   : > { %v5193_v9 = vadd.f32 %v5192_v11, %v5191_v43  ;;  %v1952_v10 = vpop.f32.mrf.mxu1  ;;  %v6983_v11 = vadd.f32 %v5281_v32, %v1848_v31  ;;  %v5083_v32 = vadd.f32 %v6927_v60, %v6923_v58  ;;  %v7494_v31 = vld [vmem:[#allocation10_spill] sm:$0xff] }
 0x1de   : > { %v6975_v20 = vadd.f32 %v1952_v10, %v1856_v30  ;;  %v5194_v12 = vpop.f32.mrf.mxu0 }
 0x1df   : > { %v1864_v22 = vadd.f32 %v5193_v9, %v6899_v28  ;;  %v5286_v24 = vpop.f32.mrf.mxu1  ;;  %v1851_v9 = vadd.f32 %v5184_v15, %v6893_v7  ;;  %v1791_v61 = vadd.f32 %v5147_v34, %v5083_v32 }
 0x1e0   : > { %v1999_v50 = vmax.f32 %v6973_v8, %v6975_v20  ;;  %v5195_v19 = vpop.f32.mrf.mxu0  ;;  %v5944_v8 = vmov 1966171168  }
 0x1e1   : > { %v6985_v49 = vadd.f32 %v5285_v45, %v1864_v22  ;;  %v5196_v10 = vadd.f32 %v5195_v19, %v5194_v12  ;;  %v1955_v30 = vpop.f32.mrf.mxu1  ;;  %v7001_v36 = vadd.f32 %v5282_v37, %v1851_v9  ;;  %v5089_v37 = vadd.f32 %v6943_v5, %v6939_v3  ;;  %v7495_v22 = vld [vmem:[#allocation12_spill] sm:$0xff] }
 0x1e2   : > { %v6989_v0 = vadd.f32 %v1955_v30, %v1859_v14  ;;  %v5197_v28 = vpop.f32.mrf.mxu0  ;;  %v5080_v3 = vadd.f32 %v6919_v55, %v6915_v53  ;;  %v1888_v63 = vadd.f32 %v5211_v59, %v1791_v61  ;;  %v7496_v53 = vld [vmem:[#allocation8_spill] sm:$0xff]  ;;  %v2039_v20 = vunpack.c.l.s4 %v5944_v8 }
 0x1e3   : > { %v2001_v57 = vmax.f32 %v6983_v11, %v6985_v49  ;;  %v1867_v29 = vadd.f32 %v5196_v10, %v6901_v35  ;;  %v5289_v33 = vpop.f32.mrf.mxu1  ;;  %v5077_v35 = vadd.f32 %v6911_v51, %v6905_v47  ;;  %v5086_v47 = vadd.f32 %v6935_v1, %v6931_v62  ;;  %v7491_v62 = vld [vmem:[#allocation13_spill] sm:$0xff]  ;;  %v7498_v10 = vld [vmem:[#allocation15_spill] sm:$0xff] }
 0x1e4   : > { %v2000_v21 = vmax.f32 %v6987_v26, %v6989_v0  ;;  %v5198_v27 = vpop.f32.mrf.mxu0  ;;  %v5214_v1 = vadd.f32 %v7491_v62, %v6959_v18  ;;  %v1799_v2 = vadd.f32 %v5153_v44, %v5089_v37  ;;  %v5220_v18 = vadd.f32 %v7498_v10, %v7497_v56 }
 0x1e5   : > { %v7003_v38 = vadd.f32 %v5286_v24, %v1867_v29  ;;  %v1968_v7 = vpop.f32.mrf.mxu1  ;;  %v5199_v39 = vadd.f32 %v5198_v27, %v5197_v28  ;;  %v1783_v13 = vadd.f32 %v5141_v41, %v5077_v35  ;;  %v5156_v24 = vadd.f32 %v7495_v22, %v7494_v31 }
 0x1e6   : > { %v5200_v40 = vpop.f32.mrf.mxu0  ;;  %v1794_v17 = vadd.f32 %v5150_v48, %v5086_v47  ;;  %v1896_v30 = vadd.f32 %v5217_v16, %v1799_v2  ;;  %v1786_v29 = vadd.f32 %v5144_v4, %v5080_v3 }
 0x1e7   : > { %v2002_v43 = vmax.f32 %v7001_v36, %v7003_v38  ;;  %v5290_v58 = vpop.f32.mrf.mxu1  ;;  %v1872_v51 = vadd.f32 %v5199_v39, %v6903_v42  ;;  %v7492_v42 = vld [vmem:[#allocation9_spill] sm:$0xff] }
 0x1e8   : > { %v5201_v60 = vpop.f32.mrf.mxu0  ;;  %v5092_v15 = vadd.f32 %v7493_v6, %v7492_v42  ;;  %v1891_v34 = vadd.f32 %v5214_v1, %v1794_v17 }
 0x1e9   : > { %v1971_v45 = vpop.f32.mrf.mxu1  ;;  %v5202_v52 = vadd.f32 %v5201_v60, %v5200_v40  ;;  %v1969_v19 = vadd.f32 %v1968_v7, %v1872_v51  ;;  %v4732_v7 = vld [vmem:[%s7477_s2] ss:$0 sm:$0xff] }
 0x1ea   : > { %v5203_v46 = vpop.f32.mrf.mxu0  ;;  %v1802_v39 = vadd.f32 %v5156_v24, %v5092_v15 }
 0x1eb   : > { %v5293_v12 = vpop.f32.mrf.mxu1  ;;  %v1875_v55 = vadd.f32 %v5202_v52, %v7496_v53 }
 0x1ec   : > { %v5204_v5 = vpop.f32.mrf.mxu0  ;;  %v1993_v40 = vadd.f32 %v5293_v12, %v1896_v30  ;;  %v1899_v47 = vadd.f32 %v5220_v18, %v1802_v39 }
 0x1ed   : > { %v5205_v23 = vadd.f32 %v5204_v5, %v5203_v46  ;;  %v1984_v25 = vpop.f32.mrf.mxu1  ;;  %v1972_v60 = vadd.f32 %v1971_v45, %v1875_v55 }
 0x1ee   : > { %v1985_v14 = vadd.f32 %v1984_v25, %v1888_v63  ;;  %v5206_v54 = vpop.f32.mrf.mxu0 }
 0x1ef   : > { %v1880_v28 = vadd.f32 %v5205_v23, %v1783_v13  ;;  %v5294_v9 = vpop.f32.mrf.mxu1 }
 0x1f0   : > { %v2003_v27 = vmax.f32 %v1969_v19, %v1985_v14  ;;  %v5207_v32 = vpop.f32.mrf.mxu0  ;;  %v1996_v46 = vadd.f32 %v5294_v9, %v1899_v47 }
 0x1f1   : > { %v1977_v35 = vadd.f32 %v5289_v33, %v1880_v28  ;;  %v5208_v41 = vadd.f32 %v5207_v32, %v5206_v54  ;;  %v1987_v59 = vpop.f32.mrf.mxu1 }
 0x1f2   : > { %v2007_v61 = vmax.f32 %v1999_v50, %v2003_v27  ;;  %v1988_v37 = vadd.f32 %v1987_v59, %v1891_v34  ;;  %v2041_v50 = vlaneseq }
 0x1f3   : > { %v2005_v44 = vmax.f32 %v1977_v35, %v1993_v40  ;;  %v1883_v48 = vadd.f32 %v5208_v41, %v1786_v29 }
 0x1f4   : > { %v2018_v51 = vadd.f32 %v4732_v7, %v2007_v61  ;;  %v2004_v52 = vmax.f32 %v1972_v60, %v1988_v37 }
 0x1f5   : > { %v2009_v33 = vmax.f32 %v2001_v57, %v2005_v44  ;;  %v1980_v13 = vadd.f32 %v5290_v58, %v1883_v48  ;;  %v2040_v57 = vunpack.c.0.s8 %v2039_v20  ;;  %v2042_v58 = vshrl.u32 %v2041_v50, 7 }
 0x1f6   : > { %v2022_v16 = vmax.f32 %v2018_v51, 0.0  ;;  %v2008_v45 = vmax.f32 %v2000_v21, %v2004_v52 }
 0x1f7   : > { %v2020_v12 = vadd.f32 %v4732_v7, %v2009_v33  ;;  %v2006_v3 = vmax.f32 %v1980_v13, %v1996_v46  ;;  %v7055_v21 = vsub.s32 %v2040_v57, %v2042_v58 }
 0x1f8   : > { %2027 = vst.msk [vmem:[#allocation3] sm:$0xff] %vm2026_vm1, %v2022_v16  ;;  %v2019_v4 = vadd.f32 %v4732_v7, %v2008_v45 }
 0x1f9   : > { %v2024_v62 = vmax.f32 %v2020_v12, 0.0  ;;  %v2010_v11 = vmax.f32 %v2002_v43, %v2006_v3 }
 0x1fa   : > { %v2023_v49 = vmax.f32 %v2019_v4, 0.0 }
 0x1fb   : > { %2029 = vst.msk [vmem:[#allocation3 + $0x10] sm:$0xff] %vm2026_vm1, %v2024_v62  ;;  %v2021_v26 = vadd.f32 %v4732_v7, %v2010_v11 }
 0x1fc   : > { %2028 = vst.msk [vmem:[#allocation3 + $0x8] sm:$0xff] %vm2026_vm1, %v2023_v49 }
 0x1fd   : > { %v2025_v0 = vmax.f32 %v2021_v26, 0.0 }
 0x1ff   : > { %2030 = vst.msk [vmem:[#allocation3 + $0x18] sm:$0xff] %vm2026_vm1, %v2025_v0  ;;  %v2035_v1 = vld [vmem:[#allocation3 + $0x2] sm:$0x3]  ;;  %v2060_v5 = vld [vmem:[#allocation3 + $0x6] sm:$0x3] }
 0x200   : > { %v2031_v63 = vld [vmem:[#allocation3] sm:$0x3]  ;;  %v2036_v2 = vpack.c.bf16 %v2035_v1, %v2035_v1  ;;  %v2061_v36 = vpack.c.bf16 %v2060_v5, %v2060_v5  ;;  %v2057_v43 = vld [vmem:[#allocation3 + $0x4] sm:$0x3] }
 0x201   : > { %v2032_v38 = vpack.c.bf16 %v2031_v63, %v2031_v63  ;;  %v2058_v42 = vpack.c.bf16 %v2057_v43, %v2057_v43 }
 0x202   : > { %v2044_v6 = vrot.slane %v2036_v2, %v7055_v21  ;;  %v2132_v15 = vld [vmem:[#allocation3 + $0x12] sm:$0x3]  ;;  %v2129_v31 = vld [vmem:[#allocation3 + $0x10] sm:$0x3]  ;;  %v2069_v24 = vrot.slane %v2061_v36, %v7055_v21  ;;  %v2156_v54 = vld [vmem:[#allocation3 + $0x16] sm:$0x3] }
 0x203   : > { %2034 = vst.msk [vmem:[#allocation2] sm:$0x1] %vm2033_vm2, %v2032_v38  ;;  %v2084_v22 = vld [vmem:[#allocation3 + $0xa] sm:$0x3]  ;;  %v2108_v23 = vld [vmem:[#allocation3 + $0xe] sm:$0x3]  ;;  %v2133_v25 = vpack.c.bf16 %v2132_v15, %v2132_v15  ;;  %v2130_v19 = vpack.c.bf16 %v2129_v31, %v2129_v31  ;;  %v2157_v40 = vpack.c.bf16 %v2156_v54, %v2156_v54 }
 0x204   : > { %v2081_v17 = vld [vmem:[#allocation3 + $0x8] sm:$0x3]  ;;  %2059 = vst.msk [vmem:[#allocation2 + $0x1] sm:$0x1] %vm2033_vm2, %v2058_v42  ;;  %v2051_v53 = vrot.slane %v2044_v6, %v7055_v21  ;;  %v2085_v55 = vpack.c.bf16 %v2084_v22, %v2084_v22  ;;  %v2109_v14 = vpack.c.bf16 %v2108_v23, %v2108_v23  ;;  %v2105_v56 = vld [vmem:[#allocation3 + $0xc] sm:$0x3]  ;;  %v2076_v32 = vrot.slane %v2069_v24, %v7055_v21 }
 0x205   : > { %v2153_v10 = vld [vmem:[#allocation3 + $0x14] sm:$0x3]  ;;  %v2082_v18 = vpack.c.bf16 %v2081_v17, %v2081_v17  ;;  %v2106_v30 = vpack.c.bf16 %v2105_v56, %v2105_v56  ;;  %2131 = vst.msk [vmem:[#allocation2 + $0x4] sm:$0x1] %vm2033_vm2, %v2130_v19  ;;  %v2141_v39 = vrot.slane %v2133_v25, %v7055_v21  ;;  %v2165_v37 = vrot.slane %v2157_v40, %v7055_v21 }
 0x206   : > { %2052 = vrot.lane.b32.xlu0 %v2051_v53, %s5945_s13  ;;  %v2093_v28 = vrot.slane %v2085_v55, %v7055_v21  ;;  %v2180_v9 = vld [vmem:[#allocation3 + $0x1a] sm:$0x3]  ;;  %v2154_v29 = vpack.c.bf16 %v2153_v10, %v2153_v10  ;;  %v2177_v27 = vld [vmem:[#allocation3 + $0x18] sm:$0x3]  ;;  %v2117_v34 = vrot.slane %v2109_v14, %v7055_v21  ;;  %v2201_v35 = vld [vmem:[#allocation3 + $0x1c] sm:$0x3] }
 0x207   : > { %2083 = vst.msk [vmem:[#allocation2 + $0x2] sm:$0x1] %vm2033_vm2, %v2082_v18  ;;  %2107 = vst.msk [vmem:[#allocation2 + $0x3] sm:$0x1] %vm2033_vm2, %v2106_v30  ;;  %v2181_v41 = vpack.c.bf16 %v2180_v9, %v2180_v9  ;;  %v2178_v59 = vpack.c.bf16 %v2177_v27, %v2177_v27  ;;  %v2202_v60 = vpack.c.bf16 %v2201_v35, %v2201_v35  ;;  %v2204_v61 = vld [vmem:[#allocation3 + $0x1e] sm:$0x3] }
 0x208   : > { %v2100_v7 = vrot.slane %v2093_v28, %v7055_v21  ;;  %2155 = vst.msk [vmem:[#allocation2 + $0x5] sm:$0x1] %vm2033_vm2, %v2154_v29  ;;  %v2124_v44 = vrot.slane %v2117_v34, %v7055_v21  ;;  %v2148_v47 = vrot.slane %v2141_v39, %v7055_v21  ;;  %v2205_v51 = vpack.c.bf16 %v2204_v61, %v2204_v61 }
 0x209   : > { %2179 = vst.msk [vmem:[#allocation2 + $0x6] sm:$0x1] %vm2033_vm2, %v2178_v59  ;;  %2203 = vst.msk [vmem:[#allocation2 + $0x7] sm:$0x1] %vm2033_vm2, %v2202_v60  ;;  %v2189_v48 = vrot.slane %v2181_v41, %v7055_v21  ;;  %v2172_v52 = vrot.slane %v2165_v37, %v7055_v21 }
 0x20a   : > { %2101 = vrot.lane.b32.xlu1 %v2100_v7, %s5945_s13  ;;  %2077 = vrot.lane.b32.xlu0 %v2076_v32, %s5945_s13  ;;  %v2213_v46 = vrot.slane %v2205_v51, %v7055_v21 }
 0x20b   : > { %v2196_v33 = vrot.slane %v2189_v48, %v7055_v21 }
 0x20c   : > { %v2220_v13 = vrot.slane %v2213_v46, %v7055_v21 }
 0x20e   : > { %2125 = vrot.lane.b32.xlu1 %v2124_v44, %s5945_s13  ;;  %2149 = vrot.lane.b32.xlu0 %v2148_v47, %s5945_s13 }
 0x212   : > { %2173 = vrot.lane.b32.xlu1 %v2172_v52, %s5945_s13  ;;  %2197 = vrot.lane.b32.xlu0 %v2196_v33, %s5945_s13 }
 0x216   : > { %2221 = vrot.lane.b32.xlu1 %v2220_v13, %s5945_s13 }
 0x278   : > { %v2053_v16 = vpop.permute.xlu0 %2052 }
 0x279   : > { %2056 = vst.msk [vmem:[#allocation2] sm:$0x1] %vm2055_vm3, %v2053_v16 }
 0x27c   : > { %v2102_v45 = vpop.permute.xlu1 %2101  ;;  %v2078_v8 = vpop.permute.xlu0 %2077 }
 0x27d   : > { %2104 = vst.msk [vmem:[#allocation2 + $0x2] sm:$0x1] %vm2055_vm3, %v2102_v45  ;;  %2080 = vst.msk [vmem:[#allocation2 + $0x1] sm:$0x1] %vm2055_vm3, %v2078_v8 }
 0x280   : > { %v2126_v20 = vpop.permute.xlu1 %2125  ;;  %v2150_v50 = vpop.permute.xlu0 %2149 }
 0x281   : > { %2128 = vst.msk [vmem:[#allocation2 + $0x3] sm:$0x1] %vm2055_vm3, %v2126_v20  ;;  %2152 = vst.msk [vmem:[#allocation2 + $0x4] sm:$0x1] %vm2055_vm3, %v2150_v50 }
 0x284   : > { %v2174_v12 = vpop.permute.xlu1 %2173  ;;  %v2198_v3 = vpop.permute.xlu0 %2197 }
 0x285   : > { %2176 = vst.msk [vmem:[#allocation2 + $0x5] sm:$0x1] %vm2055_vm3, %v2174_v12  ;;  %2200 = vst.msk [vmem:[#allocation2 + $0x6] sm:$0x1] %vm2055_vm3, %v2198_v3 }
 0x288   : > { %v2222_v4 = vpop.permute.xlu1 %2221 }
 0x289   : > { %2224 = vst.msk [vmem:[#allocation2 + $0x7] sm:$0x1] %vm2055_vm3, %v2222_v4 }
 0x28a PF: > { %v5475_v62 = vld [vmem:[%s6556_s24 + $0xe4] ss:$16 sps:$4 sm:$0xff]   ;;  %v5479_v49 = vld [vmem:[%s6556_s24 + $0xe0] ss:$16 sps:$4 sm:$0xff]   ;;  %v2484_v27 = vlaneseq  ;;  %v5946_v32 = vmov 1966171168  }
 0x28b   : > { %v5477_v11 = vld [vmem:[%s6556_s24 + $0x2e4] ss:$16 sps:$4 sm:$0xff]   ;;  %3842 = vmatprep.subr.bf16.mxu0 %v5475_v62  ;;  %v5480_v57 = vld [vmem:[%s6556_s24 + $0x2e0] ss:$16 sps:$4 sm:$0xff]   ;;  %v2507_v34 = vunpack.c.l.s4 %v5946_v32 }
 0x28c   : > { %3883 = vmatprep.subr.bf16.mxu1 %v5477_v11  ;;  %v5481_v58 = vld [vmem:[%s6556_s24 + $0xc4] ss:$16 sps:$4 sm:$0xff]   ;;  %3843 = vmatpush1.bf16.msra.mxu0 %v5479_v49  ;;  %v5485_v0 = vld [vmem:[%s6556_s24 + $0xc0] ss:$16 sps:$4 sm:$0xff]   ;;  %v7137_v7 = vshrl.u32 %v2484_v27, 7 }
 0x28d   : > { %3884 = vmatpush1.bf16.msra.mxu1 %v5480_v57  ;;  %v5483_v26 = vld [vmem:[%s6556_s24 + $0x2c4] ss:$16 sps:$4 sm:$0xff]   ;;  %3844 = vmatprep.subr.bf16.mxu0 %v5481_v58  ;;  %v5486_v21 = vld [vmem:[%s6556_s24 + $0x2c0] ss:$16 sps:$4 sm:$0xff]   ;;  %v2508_v41 = vunpack.c.0.s8 %v2507_v34 }
 0x28e   : > { %3885 = vmatprep.subr.bf16.mxu1 %v5483_v26  ;;  %v5487_v1 = vld [vmem:[%s6556_s24 + $0xa4] ss:$16 sps:$4 sm:$0xff]   ;;  %v5491_v63 = vld [vmem:[%s6556_s24 + $0xa0] ss:$16 sps:$4 sm:$0xff]  }
 0x28f   : > { %v5489_v5 = vld [vmem:[%s6556_s24 + $0x2a4] ss:$16 sps:$4 sm:$0xff]   ;;  %v5492_v2 = vld [vmem:[%s6556_s24 + $0x2a0] ss:$16 sps:$4 sm:$0xff]   ;;  %v2511_v47 = vsub.s32 %v2508_v41, %v7137_v7 }
 0x290   : > { %3845 = vmatpush1.bf16.msra.mxu0 %v5485_v0  ;;  %v5493_v36 = vld [vmem:[%s6556_s24 + $0x84] ss:$16 sps:$4 sm:$0xff]   ;;  %v5497_v43 = vld [vmem:[%s6556_s24 + $0x80] ss:$16 sps:$4 sm:$0xff]   ;;  %v2225_v52 = vld [vmem:[#allocation2] sm:$0xff] }
 0x291   : > { %3886 = vmatpush1.bf16.msra.mxu1 %v5486_v21  ;;  %3846 = vmatprep.subr.bf16.mxu0 %v5487_v1  ;;  %v5495_v38 = vld [vmem:[%s6556_s24 + $0x284] ss:$16 sps:$4 sm:$0xff]   ;;  %v5498_v42 = vld [vmem:[%s6556_s24 + $0x280] ss:$16 sps:$4 sm:$0xff]   ;;  %v2512_v46 = vrot.slane %v2225_v52, %v2511_v47  ;;  %v2505_v13 = vcombine.high %v2225_v52, %v2225_v52 }
 0x292   : > { %3887 = vmatprep.subr.bf16.mxu1 %v5489_v5  ;;  %v5499_v6 = vld [vmem:[%s6556_s24 + $0x64] ss:$16 sps:$4 sm:$0xff]   ;;  %v5503_v31 = vld [vmem:[%s6556_s24 + $0x60] ss:$16 sps:$4 sm:$0xff]  }
 0x293   : > { %v5501_v15 = vld [vmem:[%s6556_s24 + $0x264] ss:$16 sps:$4 sm:$0xff]   ;;  %v5504_v22 = vld [vmem:[%s6556_s24 + $0x260] ss:$16 sps:$4 sm:$0xff]   ;;  %v2520_v20 = vcombine.high %v2512_v46, %v2512_v46  ;;  %v2519_v50 = vrot.slane %v2505_v13, %v2511_v47 }
 0x294   : > { %3847 = vmatpush1.bf16.msra.mxu0 %v5491_v63  ;;  %v5505_v24 = vld [vmem:[%s6556_s24 + $0x44] ss:$16 sps:$4 sm:$0xff]   ;;  %v5509_v25 = vld [vmem:[%s6556_s24 + $0x40] ss:$16 sps:$4 sm:$0xff]  }
 0x295   : > { %3888 = vmatpush1.bf16.msra.mxu1 %v5492_v2  ;;  %3848 = vmatprep.subr.bf16.mxu0 %v5493_v36  ;;  %v5507_v23 = vld [vmem:[%s6556_s24 + $0x244] ss:$16 sps:$4 sm:$0xff]   ;;  %v5510_v17 = vld [vmem:[%s6556_s24 + $0x240] ss:$16 sps:$4 sm:$0xff]   ;;  %v7152_v3 = vrot.slane %v2520_v20, %v2511_v47  ;;  %v7154_v4 = vrot.slane %v2519_v50, %v2511_v47  ;;  %v2521_v36 = vcombine.high %v2519_v50, %v2519_v50 }
 0x296   : > { %3889 = vmatprep.subr.bf16.mxu1 %v5495_v38  ;;  %v5511_v19 = vld [vmem:[%s6556_s24 + $0x24] ss:$16 sps:$4 sm:$0xff]   ;;  %v5515_v55 = vld [vmem:[%s6556_s24 + $0x20] ss:$16 sps:$4 sm:$0xff]  }
 0x297   : > { %v5513_v53 = vld [vmem:[%s6556_s24 + $0x224] ss:$16 sps:$4 sm:$0xff]   ;;  %v5516_v14 = vld [vmem:[%s6556_s24 + $0x220] ss:$16 sps:$4 sm:$0xff]   ;;  %v7161_v57 = vcombine.high %v7152_v3, %v7152_v3  ;;  %3874 = vmatprep.mubr.bf16.mxu0 %v7152_v3 }
 0x298   : > { %3849 = vmatpush1.bf16.msra.mxu0 %v5497_v43  ;;  %v5517_v54 = vld [vmem:[%s6556_s24 + $0x4] ss:$16 sps:$4 sm:$0xff]   ;;  %v5521_v10 = vld [vmem:[%s6556_s24] ss:$16 sps:$4 sm:$0xff]   ;;  %v7174_v43 = vrot.slane %v2512_v46, %v2511_v47 }
 0x299   : > { %3890 = vmatpush1.bf16.msra.mxu1 %v5498_v42  ;;  %3850 = vmatprep.subr.bf16.mxu0 %v5499_v6  ;;  %v5519_v56 = vld [vmem:[%s6556_s24 + $0x204] ss:$16 sps:$4 sm:$0xff]   ;;  %v5522_v18 = vld [vmem:[%s6556_s24 + $0x200] ss:$16 sps:$4 sm:$0xff]  }
 0x29a   : > { %3891 = vmatprep.subr.bf16.mxu1 %v5501_v15  ;;  %v5523_v30 = vld [vmem:[%s6556_s24 + $0x1e4] ss:$16 sps:$4 sm:$0xff]   ;;  %v5527_v9 = vld [vmem:[%s6556_s24 + $0x1e0] ss:$16 sps:$4 sm:$0xff]   ;;  %3915 = vmatprep.mubr.bf16.mxu1 %v7161_v57 }
 0x29b   : > { %v5525_v28 = vld [vmem:[%s6556_s24 + $0x3e4] ss:$16 sps:$4 sm:$0xff]   ;;  %v5528_v29 = vld [vmem:[%s6556_s24 + $0x3e0] ss:$16 sps:$4 sm:$0xff]  }
 0x29c   : > { %3851 = vmatpush1.bf16.msra.mxu0 %v5503_v31  ;;  %v5529_v39 = vld [vmem:[%s6556_s24 + $0x1c4] ss:$16 sps:$4 sm:$0xff]   ;;  %v5533_v35 = vld [vmem:[%s6556_s24 + $0x1c0] ss:$16 sps:$4 sm:$0xff]   ;;  %v7179_v31 = vrot.slane %v2521_v36, %v2511_v47 }
 0x29d   : > { %3892 = vmatpush1.bf16.msra.mxu1 %v5504_v22  ;;  %3852 = vmatprep.subr.bf16.mxu0 %v5505_v24  ;;  %v5531_v40 = vld [vmem:[%s6556_s24 + $0x3c4] ss:$16 sps:$4 sm:$0xff]   ;;  %v5534_v59 = vld [vmem:[%s6556_s24 + $0x3c0] ss:$16 sps:$4 sm:$0xff]   ;;  %v7183_v22 = vcombine.high %v7174_v43, %v7174_v43 }
 0x29e   : > { %3893 = vmatprep.subr.bf16.mxu1 %v5507_v23  ;;  %v5535_v60 = vld [vmem:[%s6556_s24 + $0x1a4] ss:$16 sps:$4 sm:$0xff]   ;;  %v5539_v37 = vld [vmem:[%s6556_s24 + $0x1a0] ss:$16 sps:$4 sm:$0xff]  }
 0x29f   : > { %v5537_v61 = vld [vmem:[%s6556_s24 + $0x3a4] ss:$16 sps:$4 sm:$0xff]   ;;  %v5540_v44 = vld [vmem:[%s6556_s24 + $0x3a0] ss:$16 sps:$4 sm:$0xff]  }
 0x2a0   : > { %3853 = vmatpush1.bf16.msra.mxu0 %v5509_v25  ;;  %v5541_v48 = vld [vmem:[%s6556_s24 + $0x184] ss:$16 sps:$4 sm:$0xff]   ;;  %v5545_v33 = vld [vmem:[%s6556_s24 + $0x180] ss:$16 sps:$4 sm:$0xff]  }
 0x2a1   : > { %3894 = vmatpush1.bf16.msra.mxu1 %v5510_v17  ;;  %3854 = vmatprep.subr.bf16.mxu0 %v5511_v19  ;;  %v5543_v51 = vld [vmem:[%s6556_s24 + $0x384] ss:$16 sps:$4 sm:$0xff]   ;;  %v5546_v16 = vld [vmem:[%s6556_s24 + $0x380] ss:$16 sps:$4 sm:$0xff]   ;;  %v7191_v19 = vcombine.high %v7179_v31, %v7179_v31 }
 0x2a2   : > { %3895 = vmatprep.subr.bf16.mxu1 %v5513_v53  ;;  %v5547_v45 = vld [vmem:[%s6556_s24 + $0x164] ss:$16 sps:$4 sm:$0xff]   ;;  %v5551_v12 = vld [vmem:[%s6556_s24 + $0x160] ss:$16 sps:$4 sm:$0xff]  }
 0x2a3   : > { %v5549_v8 = vld [vmem:[%s6556_s24 + $0x364] ss:$16 sps:$4 sm:$0xff]   ;;  %v5552_v62 = vld [vmem:[%s6556_s24 + $0x360] ss:$16 sps:$4 sm:$0xff]  }
 0x2a4   : > { %3855 = vmatpush1.bf16.msra.mxu0 %v5515_v55  ;;  %v5553_v11 = vld [vmem:[%s6556_s24 + $0x144] ss:$16 sps:$4 sm:$0xff]   ;;  %v5557_v58 = vld [vmem:[%s6556_s24 + $0x140] ss:$16 sps:$4 sm:$0xff]  }
 0x2a5   : > { %3896 = vmatpush1.bf16.msra.mxu1 %v5516_v14  ;;  %3856 = vmatprep.subr.bf16.mxu0 %v5517_v54  ;;  %v5555_v49 = vld [vmem:[%s6556_s24 + $0x344] ss:$16 sps:$4 sm:$0xff]   ;;  %v5558_v26 = vld [vmem:[%s6556_s24 + $0x340] ss:$16 sps:$4 sm:$0xff]  }
 0x2a6   : > { %3897 = vmatprep.subr.bf16.mxu1 %v5519_v56  ;;  %v5559_v0 = vld [vmem:[%s6556_s24 + $0x124] ss:$16 sps:$4 sm:$0xff]   ;;  %v5563_v1 = vld [vmem:[%s6556_s24 + $0x120] ss:$16 sps:$4 sm:$0xff]  }
 0x2a7   : > { %v5561_v21 = vld [vmem:[%s6556_s24 + $0x324] ss:$16 sps:$4 sm:$0xff]   ;;  %v5564_v5 = vld [vmem:[%s6556_s24 + $0x320] ss:$16 sps:$4 sm:$0xff]  }
 0x2a8   : > { %3857 = vmatpush1.bf16.msra.mxu0 %v5521_v10  ;;  %v5565_v63 = vld [vmem:[%s6556_s24 + $0x104] ss:$16 sps:$4 sm:$0xff]   ;;  %v5569_v38 = vld [vmem:[%s6556_s24 + $0x100] ss:$16 sps:$4 sm:$0xff]  }
 0x2a9   : > { %3898 = vmatpush1.bf16.msra.mxu1 %v5522_v18  ;;  %3858 = vmatprep.subr.bf16.mxu0 %v5523_v30  ;;  %v5567_v2 = vld [vmem:[%s6556_s24 + $0x304] ss:$16 sps:$4 sm:$0xff]   ;;  %v5570_v42 = vld [vmem:[%s6556_s24 + $0x300] ss:$16 sps:$4 sm:$0xff]  }
 0x2aa   : > { %3899 = vmatprep.subr.bf16.mxu1 %v5525_v28  ;;  %v5573_v6 = vld [vmem:[%s6556_s24 + $0x4e4] ss:$16 sps:$4 sm:$0xff]   ;;  %v5571_v24 = vld [vmem:[%s6556_s24 + $0x4e0] ss:$16 sps:$4 sm:$0xff]  }
 0x2ab   : > { %v5576_v15 = vld [vmem:[%s6556_s24 + $0x6e4] ss:$16 sps:$4 sm:$0xff]   ;;  %v5574_v23 = vld [vmem:[%s6556_s24 + $0x6e0] ss:$16 sps:$4 sm:$0xff]  }
 0x2ac   : > { %3859 = vmatpush2.bf16.msra.mxu0 %v5527_v9  ;;  %v5579_v25 = vld [vmem:[%s6556_s24 + $0x4c4] ss:$16 sps:$4 sm:$0xff]   ;;  %v5577_v53 = vld [vmem:[%s6556_s24 + $0x4c0] ss:$16 sps:$4 sm:$0xff]  }
 0x2ad   : > { %3900 = vmatpush2.bf16.msra.mxu1 %v5528_v29  ;;  %3860 = vmatprep.subr.bf16.mxu0 %v5529_v39  ;;  %v5582_v17 = vld [vmem:[%s6556_s24 + $0x6c4] ss:$16 sps:$4 sm:$0xff]   ;;  %v5580_v55 = vld [vmem:[%s6556_s24 + $0x6c0] ss:$16 sps:$4 sm:$0xff]  }
 0x2ae   : > { %3901 = vmatprep.subr.bf16.mxu1 %v5531_v40  ;;  %v5585_v14 = vld [vmem:[%s6556_s24 + $0x4a4] ss:$16 sps:$4 sm:$0xff]   ;;  %v5583_v56 = vld [vmem:[%s6556_s24 + $0x4a0] ss:$16 sps:$4 sm:$0xff]  }
 0x2af   : > { %v5588_v54 = vld [vmem:[%s6556_s24 + $0x6a4] ss:$16 sps:$4 sm:$0xff]   ;;  %v5586_v10 = vld [vmem:[%s6556_s24 + $0x6a0] ss:$16 sps:$4 sm:$0xff]  }
 0x2b0   : > { %3861 = vmatpush2.bf16.msra.mxu0 %v5533_v35  ;;  %v5591_v18 = vld [vmem:[%s6556_s24 + $0x484] ss:$16 sps:$4 sm:$0xff]   ;;  %v5589_v28 = vld [vmem:[%s6556_s24 + $0x480] ss:$16 sps:$4 sm:$0xff]  }
 0x2b1   : > { %3902 = vmatpush2.bf16.msra.mxu1 %v5534_v59  ;;  %3862 = vmatprep.subr.bf16.mxu0 %v5535_v60  ;;  %v5594_v30 = vld [vmem:[%s6556_s24 + $0x684] ss:$16 sps:$4 sm:$0xff]   ;;  %v5592_v9 = vld [vmem:[%s6556_s24 + $0x680] ss:$16 sps:$4 sm:$0xff]  }
 0x2b2   : > { %3903 = vmatprep.subr.bf16.mxu1 %v5537_v61  ;;  %v5597_v29 = vld [vmem:[%s6556_s24 + $0x464] ss:$16 sps:$4 sm:$0xff]   ;;  %v5595_v32 = vld [vmem:[%s6556_s24 + $0x460] ss:$16 sps:$4 sm:$0xff]  }
 0x2b3   : > { %v5600_v27 = vld [vmem:[%s6556_s24 + $0x664] ss:$16 sps:$4 sm:$0xff]   ;;  %v5598_v34 = vld [vmem:[%s6556_s24 + $0x660] ss:$16 sps:$4 sm:$0xff]  }
 0x2b4   : > { %3863 = vmatpush2.bf16.msra.mxu0 %v5539_v37  ;;  %v5603_v39 = vld [vmem:[%s6556_s24 + $0x444] ss:$16 sps:$4 sm:$0xff]   ;;  %v5601_v35 = vld [vmem:[%s6556_s24 + $0x440] ss:$16 sps:$4 sm:$0xff]  }
 0x2b5   : > { %3904 = vmatpush2.bf16.msra.mxu1 %v5540_v44  ;;  %3864 = vmatprep.subr.bf16.mxu0 %v5541_v48  ;;  %v5606_v40 = vld [vmem:[%s6556_s24 + $0x644] ss:$16 sps:$4 sm:$0xff]   ;;  %v5604_v41 = vld [vmem:[%s6556_s24 + $0x640] ss:$16 sps:$4 sm:$0xff]  }
 0x2b6   : > { %3905 = vmatprep.subr.bf16.mxu1 %v5543_v51  ;;  %v5609_v59 = vld [vmem:[%s6556_s24 + $0x424] ss:$16 sps:$4 sm:$0xff]   ;;  %v5607_v61 = vld [vmem:[%s6556_s24 + $0x420] ss:$16 sps:$4 sm:$0xff]  }
 0x2b7   : > { %v5612_v60 = vld [vmem:[%s6556_s24 + $0x624] ss:$16 sps:$4 sm:$0xff]   ;;  %v5610_v37 = vld [vmem:[%s6556_s24 + $0x620] ss:$16 sps:$4 sm:$0xff]  }
 0x2b8   : > { %3865 = vmatpush2.bf16.msra.mxu0 %v5545_v33  ;;  %v5615_v44 = vld [vmem:[%s6556_s24 + $0x404] ss:$16 sps:$4 sm:$0xff]   ;;  %v5613_v48 = vld [vmem:[%s6556_s24 + $0x400] ss:$16 sps:$4 sm:$0xff]  }
 0x2b9   : > { %3906 = vmatpush2.bf16.msra.mxu1 %v5546_v16  ;;  %3866 = vmatprep.subr.bf16.mxu0 %v5547_v45  ;;  %v5618_v47 = vld [vmem:[%s6556_s24 + $0x604] ss:$16 sps:$4 sm:$0xff]   ;;  %v5616_v51 = vld [vmem:[%s6556_s24 + $0x600] ss:$16 sps:$4 sm:$0xff]  }
 0x2ba   : > { %3907 = vmatprep.subr.bf16.mxu1 %v5549_v8  ;;  %v5621_v52 = vld [vmem:[%s6556_s24 + $0x5e4] ss:$16 sps:$4 sm:$0xff]   ;;  %v5619_v46 = vld [vmem:[%s6556_s24 + $0x5e0] ss:$16 sps:$4 sm:$0xff]  }
 0x2bb   : > { %v5624_v33 = vld [vmem:[%s6556_s24 + $0x7e4] ss:$16 sps:$4 sm:$0xff]   ;;  %v5622_v13 = vld [vmem:[%s6556_s24 + $0x7e0] ss:$16 sps:$4 sm:$0xff]  }
 0x2bc   : > { %3867 = vmatpush2.bf16.msra.mxu0 %v5551_v12  ;;  %v5627_v16 = vld [vmem:[%s6556_s24 + $0x5c4] ss:$16 sps:$4 sm:$0xff]   ;;  %v5625_v8 = vld [vmem:[%s6556_s24 + $0x5c0] ss:$16 sps:$4 sm:$0xff]  }
 0x2bd   : > { %3908 = vmatpush2.bf16.msra.mxu1 %v5552_v62  ;;  %3868 = vmatprep.subr.bf16.mxu0 %v5553_v11  ;;  %v5630_v45 = vld [vmem:[%s6556_s24 + $0x7c4] ss:$16 sps:$4 sm:$0xff]   ;;  %v5628_v20 = vld [vmem:[%s6556_s24 + $0x7c0] ss:$16 sps:$4 sm:$0xff]  }
 0x2be   : > { %3909 = vmatprep.subr.bf16.mxu1 %v5555_v49  ;;  %v5633_v50 = vld [vmem:[%s6556_s24 + $0x5a4] ss:$16 sps:$4 sm:$0xff]   ;;  %v5631_v62 = vld [vmem:[%s6556_s24 + $0x5a0] ss:$16 sps:$4 sm:$0xff]  }
 0x2bf   : > { %v5636_v12 = vld [vmem:[%s6556_s24 + $0x7a4] ss:$16 sps:$4 sm:$0xff]   ;;  %v5634_v11 = vld [vmem:[%s6556_s24 + $0x7a0] ss:$16 sps:$4 sm:$0xff]  }
 0x2c0   : > { %3869 = vmatpush2.bf16.msra.mxu0 %v5557_v58  ;;  %v5639_v49 = vld [vmem:[%s6556_s24 + $0x584] ss:$16 sps:$4 sm:$0xff]  }
 0x2c1   : > { %3910 = vmatpush2.bf16.msra.mxu1 %v5558_v26  ;;  %3870 = vmatprep.subr.bf16.mxu0 %v5559_v0  ;;  %v5642_v58 = vld [vmem:[%s6556_s24 + $0x784] ss:$16 sps:$4 sm:$0xff]   ;;  %v5637_v26 = vld [vmem:[%s6556_s24 + $0x580] ss:$16 sps:$4 sm:$0xff]  }
 0x2c2   : > { %3911 = vmatprep.subr.bf16.mxu1 %v5561_v21  ;;  %v5640_v0 = vld [vmem:[%s6556_s24 + $0x780] ss:$16 sps:$4 sm:$0xff]   ;;  %v5645_v21 = vld [vmem:[%s6556_s24 + $0x564] ss:$16 sps:$4 sm:$0xff]  }
 0x2c3   : > { %v5654_v36 = vld [vmem:[%s6556_s24 + $0x744] ss:$16 sps:$4 sm:$0xff]  }
 0x2c4   : > { %3871 = vmatpush2.bf16.msra.mxu0 %v5563_v1  ;;  %v5648_v1 = vld [vmem:[%s6556_s24 + $0x764] ss:$16 sps:$4 sm:$0xff]  }
 0x2c5   : > { %3912 = vmatpush2.bf16.msra.mxu1 %v5564_v5  ;;  %3872 = vmatprep.subr.bf16.mxu0 %v5565_v63  ;;  %v5643_v5 = vld [vmem:[%s6556_s24 + $0x560] ss:$16 sps:$4 sm:$0xff]  }
 0x2c6   : > { %3913 = vmatprep.subr.bf16.mxu1 %v5567_v2  ;;  %v5646_v63 = vld [vmem:[%s6556_s24 + $0x760] ss:$16 sps:$4 sm:$0xff]   ;;  %v5651_v2 = vld [vmem:[%s6556_s24 + $0x544] ss:$16 sps:$4 sm:$0xff]  }
 0x2c8   : > { %3873 = vmatpush2.bf16.msra.mxu0 %v5569_v38  ;;  %v5649_v38 = vld [vmem:[%s6556_s24 + $0x540] ss:$16 sps:$4 sm:$0xff]  }
 0x2c9   : > { %3914 = vmatpush2.bf16.msra.mxu1 %v5570_v42  ;;  %3924 = vmatprep.subr.bf16.mxu0 %v5573_v6  ;;  %v5652_v42 = vld [vmem:[%s6556_s24 + $0x740] ss:$16 sps:$4 sm:$0xff]   ;;  %v5657_v6 = vld [vmem:[%s6556_s24 + $0x524] ss:$16 sps:$4 sm:$0xff]  }
 0x2ca   : > { %3965 = vmatprep.subr.bf16.mxu1 %v5576_v15  ;;  %v5660_v15 = vld [vmem:[%s6556_s24 + $0x724] ss:$16 sps:$4 sm:$0xff]  }
 0x2cb   : > { %3875 = vmatmul.mubr.bf16.vlgmr.msra.gmra.mxu0 %v7174_v43 }
 0x2cc   : > { %3916 = vmatmul.mubr.bf16.vlgmr.msra.gmra.mxu1 %v7183_v22  ;;  %3925 = vmatpush1.bf16.msra.mxu0 %v5571_v24  ;;  %v5655_v24 = vld [vmem:[%s6556_s24 + $0x520] ss:$16 sps:$4 sm:$0xff]  }
 0x2cd   : > { %3966 = vmatpush1.bf16.msra.mxu1 %v5574_v23  ;;  %3926 = vmatprep.subr.bf16.mxu0 %v5579_v25  ;;  %v5658_v23 = vld [vmem:[%s6556_s24 + $0x720] ss:$16 sps:$4 sm:$0xff]   ;;  %v5663_v25 = vld [vmem:[%s6556_s24 + $0x504] ss:$16 sps:$4 sm:$0xff]  }
 0x2ce   : > { %3967 = vmatprep.subr.bf16.mxu1 %v5582_v17  ;;  %3956 = vmatprep.mubr.bf16.mxu0 %v7179_v31  ;;  %v5666_v17 = vld [vmem:[%s6556_s24 + $0x704] ss:$16 sps:$4 sm:$0xff]  }
 0x2cf   : > { %3997 = vmatprep.mubr.bf16.mxu1 %v7191_v19 }
 0x2d0   : > { %3927 = vmatpush1.bf16.msra.mxu0 %v5577_v53  ;;  %v5661_v53 = vld [vmem:[%s6556_s24 + $0x500] ss:$16 sps:$4 sm:$0xff]  }
 0x2d1   : > { %3968 = vmatpush1.bf16.msra.mxu1 %v5580_v55  ;;  %3928 = vmatprep.subr.bf16.mxu0 %v5585_v14  ;;  %v5664_v55 = vld [vmem:[%s6556_s24 + $0x700] ss:$16 sps:$4 sm:$0xff]   ;;  %v5670_v14 = vld [vmem:[%s6556_s24 + $0xec] ss:$16 sps:$4 sm:$0xff]  }
 0x2d2   : > { %3969 = vmatprep.subr.bf16.mxu1 %v5588_v54  ;;  %v5673_v54 = vld [vmem:[%s6556_s24 + $0x2ec] ss:$16 sps:$4 sm:$0xff]  }
 0x2d4   : > { %3929 = vmatpush1.bf16.msra.mxu0 %v5583_v56  ;;  %v7259_v56 = vcombine.high %v7154_v4, %v7154_v4 }
 0x2d5   : > { %3970 = vmatpush1.bf16.msra.mxu1 %v5586_v10  ;;  %3930 = vmatprep.subr.bf16.mxu0 %v5591_v18  ;;  %v5668_v10 = vld [vmem:[%s6556_s24 + $0xe8] ss:$16 sps:$4 sm:$0xff]  }
 0x2d6   : > { %3971 = vmatprep.subr.bf16.mxu1 %v5594_v30  ;;  %v5671_v18 = vld [vmem:[%s6556_s24 + $0x2e8] ss:$16 sps:$4 sm:$0xff]   ;;  %v5676_v30 = vld [vmem:[%s6556_s24 + $0xcc] ss:$16 sps:$4 sm:$0xff]  }
 0x2d8   : > { %3931 = vmatpush1.bf16.msra.mxu0 %v5589_v28  ;;  %v5679_v28 = vld [vmem:[%s6556_s24 + $0x2cc] ss:$16 sps:$4 sm:$0xff]  }
 0x2d9   : > { %3972 = vmatpush1.bf16.msra.mxu1 %v5592_v9  ;;  %3932 = vmatprep.subr.bf16.mxu0 %v5597_v29  ;;  %v5674_v9 = vld [vmem:[%s6556_s24 + $0xc8] ss:$16 sps:$4 sm:$0xff]  }
 0x2da   : > { %3973 = vmatprep.subr.bf16.mxu1 %v5600_v27  ;;  %v5677_v29 = vld [vmem:[%s6556_s24 + $0x2c8] ss:$16 sps:$4 sm:$0xff]   ;;  %v5682_v27 = vld [vmem:[%s6556_s24 + $0xac] ss:$16 sps:$4 sm:$0xff]  }
 0x2dc   : > { %3933 = vmatpush1.bf16.msra.mxu0 %v5595_v32  ;;  %v5685_v32 = vld [vmem:[%s6556_s24 + $0x2ac] ss:$16 sps:$4 sm:$0xff]  }
 0x2dd   : > { %3974 = vmatpush1.bf16.msra.mxu1 %v5598_v34  ;;  %3934 = vmatprep.subr.bf16.mxu0 %v5603_v39  ;;  %v5680_v34 = vld [vmem:[%s6556_s24 + $0xa8] ss:$16 sps:$4 sm:$0xff]  }
 0x2de   : > { %3975 = vmatprep.subr.bf16.mxu1 %v5606_v40  ;;  %v5683_v39 = vld [vmem:[%s6556_s24 + $0x2a8] ss:$16 sps:$4 sm:$0xff]   ;;  %v5688_v40 = vld [vmem:[%s6556_s24 + $0x8c] ss:$16 sps:$4 sm:$0xff]  }
 0x2e0   : > { %3935 = vmatpush1.bf16.msra.mxu0 %v5601_v35  ;;  %v5691_v35 = vld [vmem:[%s6556_s24 + $0x28c] ss:$16 sps:$4 sm:$0xff]  }
 0x2e1   : > { %3976 = vmatpush1.bf16.msra.mxu1 %v5604_v41  ;;  %3936 = vmatprep.subr.bf16.mxu0 %v5609_v59  ;;  %v5686_v41 = vld [vmem:[%s6556_s24 + $0x88] ss:$16 sps:$4 sm:$0xff]   ;;  %v5697_v59 = vld [vmem:[%s6556_s24 + $0x26c] ss:$16 sps:$4 sm:$0xff]  }
 0x2e2   : > { %3977 = vmatprep.subr.bf16.mxu1 %v5612_v60  ;;  %v5692_v60 = vld [vmem:[%s6556_s24 + $0x68] ss:$16 sps:$4 sm:$0xff]  }
 0x2e4   : > { %3937 = vmatpush1.bf16.msra.mxu0 %v5607_v61  ;;  %v5695_v61 = vld [vmem:[%s6556_s24 + $0x268] ss:$16 sps:$4 sm:$0xff]  }
 0x2e5   : > { %3978 = vmatpush1.bf16.msra.mxu1 %v5610_v37  ;;  %3938 = vmatprep.subr.bf16.mxu0 %v5615_v44  ;;  %v5700_v37 = vld [vmem:[%s6556_s24 + $0x4c] ss:$16 sps:$4 sm:$0xff]  }
 0x2e6   : > { %3979 = vmatprep.subr.bf16.mxu1 %v5618_v47  ;;  %v5703_v44 = vld [vmem:[%s6556_s24 + $0x24c] ss:$16 sps:$4 sm:$0xff]   ;;  %v5698_v47 = vld [vmem:[%s6556_s24 + $0x48] ss:$16 sps:$4 sm:$0xff]  }
 0x2e8   : > { %3939 = vmatpush1.bf16.msra.mxu0 %v5613_v48  ;;  %v5701_v48 = vld [vmem:[%s6556_s24 + $0x248] ss:$16 sps:$4 sm:$0xff]  }
 0x2e9   : > { %3980 = vmatpush1.bf16.msra.mxu1 %v5616_v51  ;;  %3940 = vmatprep.subr.bf16.mxu0 %v5621_v52  ;;  %v5706_v51 = vld [vmem:[%s6556_s24 + $0x2c] ss:$16 sps:$4 sm:$0xff]  }
 0x2ea   : > { %3981 = vmatprep.subr.bf16.mxu1 %v5624_v33  ;;  %v5709_v52 = vld [vmem:[%s6556_s24 + $0x22c] ss:$16 sps:$4 sm:$0xff]   ;;  %v5704_v33 = vld [vmem:[%s6556_s24 + $0x28] ss:$16 sps:$4 sm:$0xff]  }
 0x2ec   : > { %3941 = vmatpush2.bf16.msra.mxu0 %v5619_v46  ;;  %v5707_v46 = vld [vmem:[%s6556_s24 + $0x228] ss:$16 sps:$4 sm:$0xff]  }
 0x2ed   : > { %3982 = vmatpush2.bf16.msra.mxu1 %v5622_v13  ;;  %3942 = vmatprep.subr.bf16.mxu0 %v5627_v16  ;;  %v5712_v13 = vld [vmem:[%s6556_s24 + $0xc] ss:$16 sps:$4 sm:$0xff]  }
 0x2ee   : > { %3983 = vmatprep.subr.bf16.mxu1 %v5630_v45  ;;  %v5715_v16 = vld [vmem:[%s6556_s24 + $0x20c] ss:$16 sps:$4 sm:$0xff]   ;;  %v5710_v45 = vld [vmem:[%s6556_s24 + $0x8] ss:$16 sps:$4 sm:$0xff]  }
 0x2f0   : > { %3943 = vmatpush2.bf16.msra.mxu0 %v5625_v8  ;;  %v5713_v8 = vld [vmem:[%s6556_s24 + $0x208] ss:$16 sps:$4 sm:$0xff]  }
 0x2f1   : > { %3984 = vmatpush2.bf16.msra.mxu1 %v5628_v20  ;;  %3944 = vmatprep.subr.bf16.mxu0 %v5633_v50  ;;  %v5718_v20 = vld [vmem:[%s6556_s24 + $0x1ec] ss:$16 sps:$4 sm:$0xff]  }
 0x2f2   : > { %3985 = vmatprep.subr.bf16.mxu1 %v5636_v12  ;;  %v5721_v50 = vld [vmem:[%s6556_s24 + $0x3ec] ss:$16 sps:$4 sm:$0xff]   ;;  %v5716_v12 = vld [vmem:[%s6556_s24 + $0x1e8] ss:$16 sps:$4 sm:$0xff]  }
 0x2f4   : > { %3945 = vmatpush2.bf16.msra.mxu0 %v5631_v62  ;;  %v5719_v62 = vld [vmem:[%s6556_s24 + $0x3e8] ss:$16 sps:$4 sm:$0xff]  }
 0x2f5   : > { %3986 = vmatpush2.bf16.msra.mxu1 %v5634_v11  ;;  %3946 = vmatprep.subr.bf16.mxu0 %v5639_v49  ;;  %v5724_v11 = vld [vmem:[%s6556_s24 + $0x1cc] ss:$16 sps:$4 sm:$0xff]  }
 0x2f6   : > { %3987 = vmatprep.subr.bf16.mxu1 %v5642_v58  ;;  %v5727_v49 = vld [vmem:[%s6556_s24 + $0x3cc] ss:$16 sps:$4 sm:$0xff]   ;;  %v5722_v58 = vld [vmem:[%s6556_s24 + $0x1c8] ss:$16 sps:$4 sm:$0xff]  }
 0x2f8   : > { %3947 = vmatpush2.bf16.msra.mxu0 %v5637_v26  ;;  %v5725_v26 = vld [vmem:[%s6556_s24 + $0x3c8] ss:$16 sps:$4 sm:$0xff]  }
 0x2f9   : > { %3988 = vmatpush2.bf16.msra.mxu1 %v5640_v0  ;;  %3948 = vmatprep.subr.bf16.mxu0 %v5645_v21  ;;  %v5730_v0 = vld [vmem:[%s6556_s24 + $0x1ac] ss:$16 sps:$4 sm:$0xff]  }
 0x2fa   : > { %3989 = vmatprep.subr.bf16.mxu1 %v5648_v1  ;;  %v5733_v21 = vld [vmem:[%s6556_s24 + $0x3ac] ss:$16 sps:$4 sm:$0xff]   ;;  %v5728_v1 = vld [vmem:[%s6556_s24 + $0x1a8] ss:$16 sps:$4 sm:$0xff]  }
 0x2fc   : > { %3949 = vmatpush2.bf16.msra.mxu0 %v5643_v5  ;;  %v5731_v5 = vld [vmem:[%s6556_s24 + $0x3a8] ss:$16 sps:$4 sm:$0xff]  }
 0x2fd   : > { %3990 = vmatpush2.bf16.msra.mxu1 %v5646_v63  ;;  %3950 = vmatprep.subr.bf16.mxu0 %v5651_v2  ;;  %v5736_v63 = vld [vmem:[%s6556_s24 + $0x18c] ss:$16 sps:$4 sm:$0xff]  }
 0x2fe   : > { %3991 = vmatprep.subr.bf16.mxu1 %v5654_v36  ;;  %v5739_v2 = vld [vmem:[%s6556_s24 + $0x38c] ss:$16 sps:$4 sm:$0xff]   ;;  %v5734_v36 = vld [vmem:[%s6556_s24 + $0x188] ss:$16 sps:$4 sm:$0xff]  }
 0x300   : > { %3951 = vmatpush2.bf16.msra.mxu0 %v5649_v38  ;;  %v5737_v38 = vld [vmem:[%s6556_s24 + $0x388] ss:$16 sps:$4 sm:$0xff]  }
 0x301   : > { %3992 = vmatpush2.bf16.msra.mxu1 %v5652_v42  ;;  %3952 = vmatprep.subr.bf16.mxu0 %v5657_v6  ;;  %v5742_v42 = vld [vmem:[%s6556_s24 + $0x16c] ss:$16 sps:$4 sm:$0xff]  }
 0x302   : > { %3993 = vmatprep.subr.bf16.mxu1 %v5660_v15  ;;  %v5745_v6 = vld [vmem:[%s6556_s24 + $0x36c] ss:$16 sps:$4 sm:$0xff]   ;;  %v5740_v15 = vld [vmem:[%s6556_s24 + $0x168] ss:$16 sps:$4 sm:$0xff]  }
 0x304   : > { %3953 = vmatpush2.bf16.msra.mxu0 %v5655_v24  ;;  %v5743_v24 = vld [vmem:[%s6556_s24 + $0x368] ss:$16 sps:$4 sm:$0xff]  }
 0x305   : > { %3994 = vmatpush2.bf16.msra.mxu1 %v5658_v23  ;;  %3954 = vmatprep.subr.bf16.mxu0 %v5663_v25  ;;  %v5748_v23 = vld [vmem:[%s6556_s24 + $0x14c] ss:$16 sps:$4 sm:$0xff]  }
 0x306   : > { %3995 = vmatprep.subr.bf16.mxu1 %v5666_v17  ;;  %v5751_v25 = vld [vmem:[%s6556_s24 + $0x34c] ss:$16 sps:$4 sm:$0xff]   ;;  %v5746_v17 = vld [vmem:[%s6556_s24 + $0x148] ss:$16 sps:$4 sm:$0xff]  }
 0x308   : > { %3955 = vmatpush2.bf16.msra.mxu0 %v5661_v53  ;;  %v5749_v53 = vld [vmem:[%s6556_s24 + $0x348] ss:$16 sps:$4 sm:$0xff]  }
 0x309   : > { %3996 = vmatpush2.bf16.msra.mxu1 %v5664_v55  ;;  %4006 = vmatprep.subr.bf16.mxu0 %v5670_v14  ;;  %v5754_v55 = vld [vmem:[%s6556_s24 + $0x12c] ss:$16 sps:$4 sm:$0xff]  }
 0x30a   : > { %4047 = vmatprep.subr.bf16.mxu1 %v5673_v54  ;;  %v5757_v14 = vld [vmem:[%s6556_s24 + $0x32c] ss:$16 sps:$4 sm:$0xff]   ;;  %v5752_v54 = vld [vmem:[%s6556_s24 + $0x128] ss:$16 sps:$4 sm:$0xff]  }
 0x30b   : > { %3957 = vmatmul.mubr.bf16.vlgmr.msra.gmra.mxu0 %v7154_v4 }
 0x30c   : > { %3998 = vmatmul.mubr.bf16.vlgmr.msra.gmra.mxu1 %v7259_v56  ;;  %4007 = vmatpush1.bf16.msra.mxu0 %v5668_v10  ;;  %v5755_v10 = vld [vmem:[%s6556_s24 + $0x328] ss:$16 sps:$4 sm:$0xff]  }
 0x30d   : > { %4048 = vmatpush1.bf16.msra.mxu1 %v5671_v18  ;;  %4008 = vmatprep.subr.bf16.mxu0 %v5676_v30  ;;  %v5760_v18 = vld [vmem:[%s6556_s24 + $0x10c] ss:$16 sps:$4 sm:$0xff]  }
 0x30e   : > { %4049 = vmatprep.subr.bf16.mxu1 %v5679_v28  ;;  %4038 = vmatprep.mubr.bf16.mxu0 %v7152_v3  ;;  %v5689_v3 = vld [vmem:[%s6556_s24 + $0x288] ss:$16 sps:$4 sm:$0xff]   ;;  %v5763_v30 = vld [vmem:[%s6556_s24 + $0x30c] ss:$16 sps:$4 sm:$0xff]  }
 0x30f   : > { %4079 = vmatprep.mubr.bf16.mxu1 %v7161_v57  ;;  %v5694_v57 = vld [vmem:[%s6556_s24 + $0x6c] ss:$16 sps:$4 sm:$0xff]   ;;  %v5758_v28 = vld [vmem:[%s6556_s24 + $0x108] ss:$16 sps:$4 sm:$0xff]  }
 0x310   : > { %4009 = vmatpush1.bf16.msra.mxu0 %v5674_v9  ;;  %v5761_v9 = vld [vmem:[%s6556_s24 + $0x308] ss:$16 sps:$4 sm:$0xff]  }
 0x311   : > { %4050 = vmatpush1.bf16.msra.mxu1 %v5677_v29  ;;  %4010 = vmatprep.subr.bf16.mxu0 %v5682_v27  ;;  %v5766_v29 = vld [vmem:[%s6556_s24 + $0x4ec] ss:$16 sps:$4 sm:$0xff]  }
 0x312   : > { %4051 = vmatprep.subr.bf16.mxu1 %v5685_v32  ;;  %v5769_v27 = vld [vmem:[%s6556_s24 + $0x6ec] ss:$16 sps:$4 sm:$0xff]   ;;  %v5764_v32 = vld [vmem:[%s6556_s24 + $0x4e8] ss:$16 sps:$4 sm:$0xff]  }
 0x314   : > { %4011 = vmatpush1.bf16.msra.mxu0 %v5680_v34  ;;  %v5767_v34 = vld [vmem:[%s6556_s24 + $0x6e8] ss:$16 sps:$4 sm:$0xff]  }
 0x315   : > { %4052 = vmatpush1.bf16.msra.mxu1 %v5683_v39  ;;  %4012 = vmatprep.subr.bf16.mxu0 %v5688_v40  ;;  %v5772_v39 = vld [vmem:[%s6556_s24 + $0x4cc] ss:$16 sps:$4 sm:$0xff]  }
 0x316   : > { %4053 = vmatprep.subr.bf16.mxu1 %v5691_v35  ;;  %v5775_v40 = vld [vmem:[%s6556_s24 + $0x6cc] ss:$16 sps:$4 sm:$0xff]   ;;  %v5770_v35 = vld [vmem:[%s6556_s24 + $0x4c8] ss:$16 sps:$4 sm:$0xff]  }
 0x318   : > { %4013 = vmatpush1.bf16.msra.mxu0 %v5686_v41  ;;  %v5773_v41 = vld [vmem:[%s6556_s24 + $0x6c8] ss:$16 sps:$4 sm:$0xff]  }
 0x319   : > { %4054 = vmatpush1.bf16.msra.mxu1 %v5689_v3  ;;  %4014 = vmatprep.subr.bf16.mxu0 %v5694_v57  ;;  %v5778_v3 = vld [vmem:[%s6556_s24 + $0x4ac] ss:$16 sps:$4 sm:$0xff]  }
 0x31a   : > { %4055 = vmatprep.subr.bf16.mxu1 %v5697_v59  ;;  %v5781_v57 = vld [vmem:[%s6556_s24 + $0x6ac] ss:$16 sps:$4 sm:$0xff]  }
 0x31b   : > { %v5784_v59 = vld [vmem:[%s6556_s24 + $0x48c] ss:$16 sps:$4 sm:$0xff]  }
 0x31c   : > { %4015 = vmatpush1.bf16.msra.mxu0 %v5692_v60  ;;  %v5787_v60 = vld [vmem:[%s6556_s24 + $0x68c] ss:$16 sps:$4 sm:$0xff]  }
 0x31d   : > { %4056 = vmatpush1.bf16.msra.mxu1 %v5695_v61  ;;  %4016 = vmatprep.subr.bf16.mxu0 %v5700_v37  ;;  %v5782_v61 = vld [vmem:[%s6556_s24 + $0x488] ss:$16 sps:$4 sm:$0xff]   ;;  %v5793_v37 = vld [vmem:[%s6556_s24 + $0x66c] ss:$16 sps:$4 sm:$0xff]  }
 0x31e   : > { %4057 = vmatprep.subr.bf16.mxu1 %v5703_v44  ;;  %v5788_v44 = vld [vmem:[%s6556_s24 + $0x468] ss:$16 sps:$4 sm:$0xff]  }
 0x320   : > { %4017 = vmatpush1.bf16.msra.mxu0 %v5698_v47  ;;  %v5791_v47 = vld [vmem:[%s6556_s24 + $0x668] ss:$16 sps:$4 sm:$0xff]  }
 0x321   : > { %4058 = vmatpush1.bf16.msra.mxu1 %v5701_v48  ;;  %4018 = vmatprep.subr.bf16.mxu0 %v5706_v51  ;;  %v5796_v48 = vld [vmem:[%s6556_s24 + $0x44c] ss:$16 sps:$4 sm:$0xff]  }
 0x322   : > { %4059 = vmatprep.subr.bf16.mxu1 %v5709_v52  ;;  %v5799_v51 = vld [vmem:[%s6556_s24 + $0x64c] ss:$16 sps:$4 sm:$0xff]   ;;  %v5794_v52 = vld [vmem:[%s6556_s24 + $0x448] ss:$16 sps:$4 sm:$0xff]  }
 0x324   : > { %4019 = vmatpush1.bf16.msra.mxu0 %v5704_v33  ;;  %v5797_v33 = vld [vmem:[%s6556_s24 + $0x648] ss:$16 sps:$4 sm:$0xff]  }
 0x325   : > { %4060 = vmatpush1.bf16.msra.mxu1 %v5707_v46  ;;  %4020 = vmatprep.subr.bf16.mxu0 %v5712_v13  ;;  %v5802_v46 = vld [vmem:[%s6556_s24 + $0x42c] ss:$16 sps:$4 sm:$0xff]  }
 0x326   : > { %4061 = vmatprep.subr.bf16.mxu1 %v5715_v16  ;;  %v5805_v13 = vld [vmem:[%s6556_s24 + $0x62c] ss:$16 sps:$4 sm:$0xff]   ;;  %v5800_v16 = vld [vmem:[%s6556_s24 + $0x428] ss:$16 sps:$4 sm:$0xff]  }
 0x328   : > { %4021 = vmatpush1.bf16.msra.mxu0 %v5710_v45  ;;  %v5803_v45 = vld [vmem:[%s6556_s24 + $0x628] ss:$16 sps:$4 sm:$0xff]  }
 0x329   : > { %4062 = vmatpush1.bf16.msra.mxu1 %v5713_v8  ;;  %4022 = vmatprep.subr.bf16.mxu0 %v5718_v20  ;;  %v5808_v8 = vld [vmem:[%s6556_s24 + $0x40c] ss:$16 sps:$4 sm:$0xff]  }
 0x32a   : > { %4063 = vmatprep.subr.bf16.mxu1 %v5721_v50  ;;  %v5811_v20 = vld [vmem:[%s6556_s24 + $0x60c] ss:$16 sps:$4 sm:$0xff]   ;;  %v5806_v50 = vld [vmem:[%s6556_s24 + $0x408] ss:$16 sps:$4 sm:$0xff]  }
 0x32c   : > { %4023 = vmatpush2.bf16.msra.mxu0 %v5716_v12  ;;  %v5809_v12 = vld [vmem:[%s6556_s24 + $0x608] ss:$16 sps:$4 sm:$0xff]  }
 0x32d   : > { %4064 = vmatpush2.bf16.msra.mxu1 %v5719_v62  ;;  %4024 = vmatprep.subr.bf16.mxu0 %v5724_v11  ;;  %v5814_v62 = vld [vmem:[%s6556_s24 + $0x5ec] ss:$16 sps:$4 sm:$0xff]  }
 0x32e   : > { %4065 = vmatprep.subr.bf16.mxu1 %v5727_v49  ;;  %v5817_v11 = vld [vmem:[%s6556_s24 + $0x7ec] ss:$16 sps:$4 sm:$0xff]   ;;  %v5812_v49 = vld [vmem:[%s6556_s24 + $0x5e8] ss:$16 sps:$4 sm:$0xff]  }
 0x330   : > { %4025 = vmatpush2.bf16.msra.mxu0 %v5722_v58  ;;  %v5815_v58 = vld [vmem:[%s6556_s24 + $0x7e8] ss:$16 sps:$4 sm:$0xff]  }
 0x331   : > { %4066 = vmatpush2.bf16.msra.mxu1 %v5725_v26  ;;  %4026 = vmatprep.subr.bf16.mxu0 %v5730_v0  ;;  %v5820_v26 = vld [vmem:[%s6556_s24 + $0x5cc] ss:$16 sps:$4 sm:$0xff]  }
 0x332   : > { %4067 = vmatprep.subr.bf16.mxu1 %v5733_v21  ;;  %v5823_v0 = vld [vmem:[%s6556_s24 + $0x7cc] ss:$16 sps:$4 sm:$0xff]   ;;  %v5818_v21 = vld [vmem:[%s6556_s24 + $0x5c8] ss:$16 sps:$4 sm:$0xff]  }
 0x334   : > { %4027 = vmatpush2.bf16.msra.mxu0 %v5728_v1  ;;  %v5821_v1 = vld [vmem:[%s6556_s24 + $0x7c8] ss:$16 sps:$4 sm:$0xff]  }
 0x335   : > { %4068 = vmatpush2.bf16.msra.mxu1 %v5731_v5  ;;  %4028 = vmatprep.subr.bf16.mxu0 %v5736_v63  ;;  %v5826_v5 = vld [vmem:[%s6556_s24 + $0x5ac] ss:$16 sps:$4 sm:$0xff]  }
 0x336   : > { %4069 = vmatprep.subr.bf16.mxu1 %v5739_v2  ;;  %v5829_v63 = vld [vmem:[%s6556_s24 + $0x7ac] ss:$16 sps:$4 sm:$0xff]   ;;  %v5824_v2 = vld [vmem:[%s6556_s24 + $0x5a8] ss:$16 sps:$4 sm:$0xff]  }
 0x338   : > { %4029 = vmatpush2.bf16.msra.mxu0 %v5734_v36  ;;  %v5827_v36 = vld [vmem:[%s6556_s24 + $0x7a8] ss:$16 sps:$4 sm:$0xff]  }
 0x339   : > { %4070 = vmatpush2.bf16.msra.mxu1 %v5737_v38  ;;  %4030 = vmatprep.subr.bf16.mxu0 %v5742_v42  ;;  %v5832_v38 = vld [vmem:[%s6556_s24 + $0x58c] ss:$16 sps:$4 sm:$0xff]  }
 0x33a   : > { %4071 = vmatprep.subr.bf16.mxu1 %v5745_v6  ;;  %v5835_v42 = vld [vmem:[%s6556_s24 + $0x78c] ss:$16 sps:$4 sm:$0xff]   ;;  %v5830_v6 = vld [vmem:[%s6556_s24 + $0x588] ss:$16 sps:$4 sm:$0xff]  }
 0x33c   : > { %4031 = vmatpush2.bf16.msra.mxu0 %v5740_v15  ;;  %v5833_v15 = vld [vmem:[%s6556_s24 + $0x788] ss:$16 sps:$4 sm:$0xff]  }
 0x33d   : > { %4072 = vmatpush2.bf16.msra.mxu1 %v5743_v24  ;;  %4032 = vmatprep.subr.bf16.mxu0 %v5748_v23  ;;  %v5838_v24 = vld [vmem:[%s6556_s24 + $0x56c] ss:$16 sps:$4 sm:$0xff]  }
 0x33e   : > { %4073 = vmatprep.subr.bf16.mxu1 %v5751_v25  ;;  %v5841_v23 = vld [vmem:[%s6556_s24 + $0x76c] ss:$16 sps:$4 sm:$0xff]   ;;  %v5836_v25 = vld [vmem:[%s6556_s24 + $0x568] ss:$16 sps:$4 sm:$0xff]  }
 0x340   : > { %4033 = vmatpush2.bf16.msra.mxu0 %v5746_v17  ;;  %v5839_v17 = vld [vmem:[%s6556_s24 + $0x768] ss:$16 sps:$4 sm:$0xff]  }
 0x341   : > { %4074 = vmatpush2.bf16.msra.mxu1 %v5749_v53  ;;  %4034 = vmatprep.subr.bf16.mxu0 %v5754_v55  ;;  %v5844_v53 = vld [vmem:[%s6556_s24 + $0x54c] ss:$16 sps:$4 sm:$0xff]  }
 0x342   : > { %4075 = vmatprep.subr.bf16.mxu1 %v5757_v14  ;;  %v5847_v55 = vld [vmem:[%s6556_s24 + $0x74c] ss:$16 sps:$4 sm:$0xff]   ;;  %v5842_v14 = vld [vmem:[%s6556_s24 + $0x548] ss:$16 sps:$4 sm:$0xff]  }
 0x344   : > { %4035 = vmatpush2.bf16.msra.mxu0 %v5752_v54  ;;  %v5845_v54 = vld [vmem:[%s6556_s24 + $0x748] ss:$16 sps:$4 sm:$0xff]  }
 0x345   : > { %4076 = vmatpush2.bf16.msra.mxu1 %v5755_v10  ;;  %4036 = vmatprep.subr.bf16.mxu0 %v5760_v18  ;;  %v5850_v10 = vld [vmem:[%s6556_s24 + $0x52c] ss:$16 sps:$4 sm:$0xff]  }
 0x346   : > { %4077 = vmatprep.subr.bf16.mxu1 %v5763_v30  ;;  %v5853_v18 = vld [vmem:[%s6556_s24 + $0x72c] ss:$16 sps:$4 sm:$0xff]   ;;  %v5848_v30 = vld [vmem:[%s6556_s24 + $0x528] ss:$16 sps:$4 sm:$0xff]  }
 0x348   : > { %4037 = vmatpush2.bf16.msra.mxu0 %v5758_v28  ;;  %v5851_v28 = vld [vmem:[%s6556_s24 + $0x728] ss:$16 sps:$4 sm:$0xff]  }
 0x349   : > { %4078 = vmatpush2.bf16.msra.mxu1 %v5761_v9  ;;  %4088 = vmatprep.subr.bf16.mxu0 %v5766_v29  ;;  %v5856_v9 = vld [vmem:[%s6556_s24 + $0x50c] ss:$16 sps:$4 sm:$0xff]  }
 0x34a   : > { %4129 = vmatprep.subr.bf16.mxu1 %v5769_v27  ;;  %v5859_v29 = vld [vmem:[%s6556_s24 + $0x70c] ss:$16 sps:$4 sm:$0xff]   ;;  %v5854_v27 = vld [vmem:[%s6556_s24 + $0x508] ss:$16 sps:$4 sm:$0xff]  }
 0x34b   : > { %4039 = vmatmul.mubr.bf16.vlgmr.msra.gmra.mxu0 %v7174_v43  ;;  %v5776_v43 = vld [vmem:[%s6556_s24 + $0x4a8] ss:$16 sps:$4 sm:$0xff]  }
 0x34c   : > { %4080 = vmatmul.mubr.bf16.vlgmr.msra.gmra.mxu1 %v7183_v22  ;;  %4089 = vmatpush1.bf16.msra.mxu0 %v5764_v32  ;;  %v5779_v22 = vld [vmem:[%s6556_s24 + $0x6a8] ss:$16 sps:$4 sm:$0xff]  }
 0x34d   : > { %4130 = vmatpush1.bf16.msra.mxu1 %v5767_v34  ;;  %4090 = vmatprep.subr.bf16.mxu0 %v5772_v39  ;;  %v5857_v32 = vld [vmem:[%s6556_s24 + $0x708] ss:$16 sps:$4 sm:$0xff]   ;;  %v5860_v34 = vld [vmem:[%s6554_s30 + $0x78] sm:$0xff]  }
 0x34e   : > { %4131 = vmatprep.subr.bf16.mxu1 %v5775_v40  ;;  %4120 = vmatprep.mubr.bf16.mxu0 %v7179_v31  ;;  %v5785_v31 = vld [vmem:[%s6556_s24 + $0x688] ss:$16 sps:$4 sm:$0xff]   ;;  %v5861_v39 = vld [vmem:[%s6554_s30 + $0x38] sm:$0xff]  }
 0x34f   : > { %4161 = vmatprep.mubr.bf16.mxu1 %v7191_v19  ;;  %v5790_v19 = vld [vmem:[%s6556_s24 + $0x46c] ss:$16 sps:$4 sm:$0xff]  }
 0x350   : > { %4091 = vmatpush1.bf16.msra.mxu0 %v5770_v35  ;;  %v5862_v40 = vld [vmem:[%s6554_s30 + $0x70] sm:$0xff]  }
 0x351   : > { %4132 = vmatpush1.bf16.msra.mxu1 %v5773_v41  ;;  %4092 = vmatprep.subr.bf16.mxu0 %v5778_v3  ;;  %v5863_v3 = vld [vmem:[%s6554_s30 + $0x30] sm:$0xff]  }
 0x352   : > { %4133 = vmatprep.subr.bf16.mxu1 %v5781_v57 }
 0x354   : > { %4093 = vmatpush1.bf16.msra.mxu0 %v5776_v43 }
 0x355   : > { %4134 = vmatpush1.bf16.msra.mxu1 %v5779_v22  ;;  %4094 = vmatprep.subr.bf16.mxu0 %v5784_v59  ;;  %v5864_v22 = vld [vmem:[%s6554_s30 + $0x68] sm:$0xff]  }
 0x356   : > { %4135 = vmatprep.subr.bf16.mxu1 %v5787_v60 }
 0x358   : > { %4095 = vmatpush1.bf16.msra.mxu0 %v5782_v61  ;;  %v5865_v61 = vld [vmem:[%s6554_s30 + $0x28] sm:$0xff]  }
 0x359   : > { %4136 = vmatpush1.bf16.msra.mxu1 %v5785_v31  ;;  %4096 = vmatprep.subr.bf16.mxu0 %v5790_v19  ;;  %v5876_v19 = vld [vmem:[%s6554_s30 + $0xf8] sm:$0xff]  }
 0x35a   : > { %4137 = vmatprep.subr.bf16.mxu1 %v5793_v37  ;;  %v5877_v37 = vld [vmem:[%s6554_s30 + $0xb8] sm:$0xff]  }
 0x35c   : > { %4097 = vmatpush1.bf16.msra.mxu0 %v5788_v44  ;;  %v5878_v44 = vld [vmem:[%s6554_s30 + $0xf0] sm:$0xff]  }
 0x35d   : > { %4138 = vmatpush1.bf16.msra.mxu1 %v5791_v47  ;;  %4098 = vmatprep.subr.bf16.mxu0 %v5796_v48  ;;  %v5867_v47 = vld [vmem:[%s6554_s30 + $0x20] sm:$0xff]   ;;  %v5879_v48 = vld [vmem:[%s6554_s30 + $0xb0] sm:$0xff]  }
 0x35e   : > { %4139 = vmatprep.subr.bf16.mxu1 %v5799_v51  ;;  %v5868_v51 = vld [vmem:[%s6554_s30 + $0x58] sm:$0xff]  }
 0x360   : > { %4099 = vmatpush1.bf16.msra.mxu0 %v5794_v52  ;;  %v5880_v52 = vld [vmem:[%s6554_s30 + $0xe8] sm:$0xff]  }
 0x361   : > { %4140 = vmatpush1.bf16.msra.mxu1 %v5797_v33  ;;  %4100 = vmatprep.subr.bf16.mxu0 %v5802_v46  ;;  %v5869_v33 = vld [vmem:[%s6554_s30 + $0x18] sm:$0xff]   ;;  %v5881_v46 = vld [vmem:[%s6554_s30 + $0xa8] sm:$0xff]  }
 0x362   : > { %4141 = vmatprep.subr.bf16.mxu1 %v5805_v13  ;;  %v5870_v13 = vld [vmem:[%s6554_s30 + $0x50] sm:$0xff]  }
 0x364   : > { %4101 = vmatpush1.bf16.msra.mxu0 %v5800_v16  ;;  %v5882_v16 = vld [vmem:[%s6554_s30 + $0xe0] sm:$0xff]  }
 0x365   : > { %4142 = vmatpush1.bf16.msra.mxu1 %v5803_v45  ;;  %4102 = vmatprep.subr.bf16.mxu0 %v5808_v8  ;;  %v5871_v45 = vld [vmem:[%s6554_s30 + $0x10] sm:$0xff]   ;;  %v5883_v8 = vld [vmem:[%s6554_s30 + $0xa0] sm:$0xff]  }
 0x366   : > { %4143 = vmatprep.subr.bf16.mxu1 %v5811_v20  ;;  %v5872_v20 = vld [vmem:[%s6554_s30 + $0x48] sm:$0xff]  }
 0x368   : > { %4103 = vmatpush1.bf16.msra.mxu0 %v5806_v50  ;;  %v5884_v50 = vld [vmem:[%s6554_s30 + $0xd8] sm:$0xff]  }
 0x369   : > { %4144 = vmatpush1.bf16.msra.mxu1 %v5809_v12  ;;  %4104 = vmatprep.subr.bf16.mxu0 %v5814_v62  ;;  %v5873_v12 = vld [vmem:[%s6554_s30 + $0x8] sm:$0xff]   ;;  %v5885_v62 = vld [vmem:[%s6554_s30 + $0x98] sm:$0xff]  }
 0x36a   : > { %4145 = vmatprep.subr.bf16.mxu1 %v5817_v11  ;;  %v5874_v11 = vld [vmem:[%s6554_s30 + $0x40] sm:$0xff]  }
 0x36c   : > { %4105 = vmatpush2.bf16.msra.mxu0 %v5812_v49  ;;  %v5875_v49 = vld [vmem:[%s6554_s30] sm:$0xff]  }
 0x36d   : > { %4146 = vmatpush2.bf16.msra.mxu1 %v5815_v58  ;;  %4106 = vmatprep.subr.bf16.mxu0 %v5820_v26  ;;  %v2486_v58 = vsub.s32 0, %v7137_v7  ;;  %v2482_v26 = vld [vmem:[%s829_s22] sm:$0xf] }
 0x36e   : > { %4147 = vmatprep.subr.bf16.mxu1 %v5823_v0  ;;  %v2490_v0 = vsub.s32 1, %v7137_v7 }
 0x370   : > { %4107 = vmatpush2.bf16.msra.mxu0 %v5818_v21  ;;  %v2487_v21 = vrot.slane %v2482_v26, %v2486_v58 }
 0x371   : > { %4148 = vmatpush2.bf16.msra.mxu1 %v5821_v1  ;;  %4108 = vmatprep.subr.bf16.mxu0 %v5826_v5  ;;  %v2491_v1 = vrot.slane %v2482_v26, %v2490_v0 }
 0x372   : > { %4149 = vmatprep.subr.bf16.mxu1 %v5829_v63 }
 0x374   : > { %4109 = vmatpush2.bf16.msra.mxu0 %v5824_v2  ;;  %v5886_v2 = vld [vmem:[%s6554_s30 + $0xd0] sm:$0xff]  }
 0x375   : > { %4150 = vmatpush2.bf16.msra.mxu1 %v5827_v36  ;;  %4110 = vmatprep.subr.bf16.mxu0 %v5832_v38  ;;  %v5887_v38 = vld [vmem:[%s6554_s30 + $0x90] sm:$0xff]  }
 0x376   : > { %4151 = vmatprep.subr.bf16.mxu1 %v5835_v42 }
 0x378   : > { %4111 = vmatpush2.bf16.msra.mxu0 %v5830_v6 }
 0x379   : > { %4152 = vmatpush2.bf16.msra.mxu1 %v5833_v15  ;;  %4112 = vmatprep.subr.bf16.mxu0 %v5838_v24 }
 0x37a   : > { %4153 = vmatprep.subr.bf16.mxu1 %v5841_v23 }
 0x37c   : > { %4113 = vmatpush2.bf16.msra.mxu0 %v5836_v25 }
 0x37d   : > { %4154 = vmatpush2.bf16.msra.mxu1 %v5839_v17  ;;  %4114 = vmatprep.subr.bf16.mxu0 %v5844_v53  ;;  %v5888_v17 = vld [vmem:[%s6554_s30 + $0xc8] sm:$0xff]  }
 0x37e   : > { %4155 = vmatprep.subr.bf16.mxu1 %v5847_v55 }
 0x380   : > { %4115 = vmatpush2.bf16.msra.mxu0 %v5842_v14  ;;  %v5889_v14 = vld [vmem:[%s6554_s30 + $0x88] sm:$0xff]  }
 0x381   : > { %4156 = vmatpush2.bf16.msra.mxu1 %v5845_v54  ;;  %4116 = vmatprep.subr.bf16.mxu0 %v5850_v10 }
 0x382   : > { %4157 = vmatprep.subr.bf16.mxu1 %v5853_v18 }
 0x384   : > { %4117 = vmatpush2.bf16.msra.mxu0 %v5848_v30 }
 0x385   : > { %4158 = vmatpush2.bf16.msra.mxu1 %v5851_v28  ;;  %4118 = vmatprep.subr.bf16.mxu0 %v5856_v9 }
 0x386   : > { %4159 = vmatprep.subr.bf16.mxu1 %v5859_v29  ;;  %v5890_v29 = vld [vmem:[%s6554_s30 + $0xc0] sm:$0xff]  }
 0x388   : > { %4119 = vmatpush2.bf16.msra.mxu0 %v5854_v27 }
 0x389   : > { %4160 = vmatpush2.bf16.msra.mxu1 %v5857_v32  ;;  %5231 = vmatprep.subr.bf16.mxu0 %v5860_v34  ;;  %v5891_v32 = vld [vmem:[%s6554_s30 + $0x80] sm:$0xff]  }
 0x38a   : > { %5253 = vmatprep.subr.bf16.mxu1 %v5876_v19 }
 0x38b   : > { %v7398_v35 = vpop.f32.mrf.mxu0  ;;  %4121 = vmatmul.mubr.bf16.vlgmr.msra.gmra.mxu0 %v7154_v4  ;;  %v5866_v4 = vld [vmem:[%s6554_s30 + $0x60] sm:$0xff]  }
 0x38c   : > { %v7400_v41 = vpop.f32.mrf.mxu1  ;;  %4162 = vmatmul.mubr.bf16.vlgmr.msra.gmra.mxu1 %v7259_v56  ;;  %5232 = vmatpush3.bf16.msra.mxu0 %v5861_v39  ;;  %v3877_v5 = vadd.f32 %v7398_v35, %v2487_v21 }
 0x38d   : > { %v3878_v57 = vpop.f32.mrf.mxu0  ;;  %5233 = vmatprep.subr.bf16.mxu0 %v5862_v40  ;;  %5254 = vmatpush3.bf16.msra.mxu1 %v5877_v37 }
 0x38e   : > { %v7405_v43 = vpop.f32.mrf.mxu1  ;;  %5255 = vmatprep.subr.bf16.mxu1 %v5878_v44  ;;  %v3879_v63 = vadd.f32 %v3878_v57, %v2491_v1  ;;  %v3918_v36 = vadd.f32 %v7400_v41, %v3877_v5 }
 0x38f   : > { %v3880_v59 = vpop.f32.mrf.mxu0 }
 0x390   : > { %v3921_v60 = vpop.f32.mrf.mxu1  ;;  %5234 = vmatpush3.bf16.msra.mxu0 %v5863_v3  ;;  %v3920_v15 = vadd.f32 %v7405_v43, %v3879_v63 }
 0x391   : > { %v3881_v31 = vpop.f32.mrf.mxu0  ;;  %5235 = vmatprep.subr.bf16.mxu0 %v5864_v22  ;;  %5256 = vmatpush3.bf16.msra.mxu1 %v5879_v48  ;;  %v2494_v60 = vsub.s32 2, %v7137_v7 }
 0x392   : > { %v3922_v56 = vpop.f32.mrf.mxu1  ;;  %5257 = vmatprep.subr.bf16.mxu1 %v5880_v52 }
 0x394   : > { %5236 = vmatpush3.bf16.msra.mxu0 %v5865_v61  ;;  %v2498_v61 = vsub.s32 3, %v7137_v7 }
 0x395   : > { %5237 = vmatprep.subr.bf16.mxu0 %v5866_v4  ;;  %5258 = vmatpush3.bf16.msra.mxu1 %v5881_v46  ;;  %v2495_v4 = vrot.slane %v2482_v26, %v2494_v60 }
 0x396   : > { %5259 = vmatprep.subr.bf16.mxu1 %v5882_v16  ;;  %v2499_v31 = vrot.slane %v2482_v26, %v2498_v61 }
 0x398   : > { %5238 = vmatpush3.bf16.msra.mxu0 %v5867_v47 }
 0x399   : > { %5239 = vmatprep.subr.bf16.mxu0 %v5868_v51  ;;  %5260 = vmatpush3.bf16.msra.mxu1 %v5883_v8 }
 0x39a   : > { %5261 = vmatprep.subr.bf16.mxu1 %v5884_v50 }
 0x39c   : > { %5240 = vmatpush3.bf16.msra.mxu0 %v5869_v33 }
 0x39d   : > { %5241 = vmatprep.subr.bf16.mxu0 %v5870_v13  ;;  %5262 = vmatpush3.bf16.msra.mxu1 %v5885_v62 }
 0x39e   : > { %5263 = vmatprep.subr.bf16.mxu1 %v5886_v2 }
 0x3a0   : > { %5242 = vmatpush3.bf16.msra.mxu0 %v5871_v45 }
 0x3a1   : > { %5243 = vmatprep.subr.bf16.mxu0 %v5872_v20  ;;  %5264 = vmatpush3.bf16.msra.mxu1 %v5887_v38 }
 0x3a2   : > { %5265 = vmatprep.subr.bf16.mxu1 %v5888_v17 }
 0x3a4   : > { %5244 = vmatpush3.bf16.msra.mxu0 %v5873_v12 }
 0x3a5   : > { %5245 = vmatprep.subr.bf16.mxu0 %v5874_v11  ;;  %5266 = vmatpush3.bf16.msra.mxu1 %v5889_v14 }
 0x3a6   : > { %5267 = vmatprep.subr.bf16.mxu1 %v5890_v29 }
 0x3a8   : > { %5246 = vmatpush3.bf16.msra.mxu0 %v5875_v49 }
 0x3a9   : > { %5268 = vmatpush3.bf16.msra.mxu1 %v5891_v32 }
 0x3cb   : > { %v3958_v42 = vpop.f32.mrf.mxu0 }
 0x3cc   : > { %v3999_v6 = vpop.f32.mrf.mxu1  ;;  %v3959_v24 = vadd.f32 %v3958_v42, %v3918_v36 }
 0x3cd   : > { %v3960_v23 = vpop.f32.mrf.mxu0 }
 0x3ce   : > { %v4001_v25 = vpop.f32.mrf.mxu1  ;;  %v4000_v53 = vadd.f32 %v3999_v6, %v3959_v24  ;;  %v3961_v55 = vadd.f32 %v3960_v23, %v3920_v15 }
 0x3cf   : > { %v3962_v54 = vpop.f32.mrf.mxu0 }
 0x3d0   : > { %v4003_v10 = vpop.f32.mrf.mxu1  ;;  %v4002_v18 = vadd.f32 %v4001_v25, %v3961_v55  ;;  %v4170_v30 = vmax.f32 %v4000_v53, 0.0 }
 0x3d1   : > { %v3963_v28 = vpop.f32.mrf.mxu0 }
 0x3d2   : > { %v4004_v9 = vpop.f32.mrf.mxu1  ;;  %v4171_v27 = vmax.f32 %v4002_v18, 0.0  ;;  %v4174_v39 = vpack.c.bf16 %v4170_v30, %v4170_v30 }
 0x3d4   : > { %v4175_v34 = vpack.c.bf16 %v4171_v27, %v4171_v27 }
 0x3d6   : > { %4466 = vmatprep.mubr.bf16.mxu0 %v4175_v34 }
 0x3d7   : > { %4467 = vmatmul.mubr.bf16.vlgmr.msra.gmra.mxu0 %v4174_v39 }
 0x40b   : > { %v4040_v40 = vpop.f32.mrf.mxu0 }
 0x40c   : > { %v4081_v35 = vpop.f32.mrf.mxu1  ;;  %v4041_v56 = vadd.f32 %v4040_v40, %v2495_v4 }
 0x40d   : > { %v4042_v41 = vpop.f32.mrf.mxu0 }
 0x40e   : > { %v4083_v3 = vpop.f32.mrf.mxu1  ;;  %v4043_v19 = vadd.f32 %v4042_v41, %v2499_v31  ;;  %v4082_v37 = vadd.f32 %v4081_v35, %v4041_v56 }
 0x40f   : > { %v4044_v57 = vpop.f32.mrf.mxu0 }
 0x410   : > { %v4085_v43 = vpop.f32.mrf.mxu1  ;;  %v4084_v48 = vadd.f32 %v4083_v3, %v4043_v19 }
 0x411   : > { %v4045_v22 = vpop.f32.mrf.mxu0 }
 0x412   : > { %v4086_v59 = vpop.f32.mrf.mxu1 }
 0x44b   : > { %v4122_v44 = vpop.f32.mrf.mxu0 }
 0x44c   : > { %v4163_v47 = vpop.f32.mrf.mxu1  ;;  %v4123_v51 = vadd.f32 %v4122_v44, %v4082_v37 }
 0x44d   : > { %v4124_v52 = vpop.f32.mrf.mxu0 }
 0x44e   : > { %v4165_v33 = vpop.f32.mrf.mxu1  ;;  %v4164_v46 = vadd.f32 %v4163_v47, %v4123_v51  ;;  %v4125_v13 = vadd.f32 %v4124_v52, %v4084_v48 }
 0x44f   : > { %v4126_v16 = vpop.f32.mrf.mxu0 }
 0x450   : > { %v4167_v45 = vpop.f32.mrf.mxu1  ;;  %v4166_v8 = vadd.f32 %v4165_v33, %v4125_v13  ;;  %v4172_v20 = vmax.f32 %v4164_v46, 0.0 }
 0x451   : > { %v4127_v50 = vpop.f32.mrf.mxu0 }
 0x452   : > { %v4168_v12 = vpop.f32.mrf.mxu1  ;;  %v4173_v7 = vmax.f32 %v4166_v8, 0.0  ;;  %v4176_v11 = vpack.c.bf16 %v4172_v20, %v4172_v20 }
 0x454   : > { %v4177_v62 = vpack.c.bf16 %v4173_v7, %v4173_v7 }
 0x456   : > { %4506 = vmatprep.mubr.bf16.mxu1 %v4177_v62 }
 0x457   : > { %4507 = vmatmul.mubr.bf16.vlgmr.msra.gmra.mxu1 %v4176_v11 }
 0x497   : > { %v5247_v49 = vpop.f32.mrf.mxu0 }
 0x499   : > { %v5248_v58 = vpop.f32.mrf.mxu0 }
 0x49a   : > { %v5249_v26 = vadd.f32 %v5248_v58, %v5247_v49 }
 0x49b   : > { %v5250_v0 = vpop.f32.mrf.mxu0 }
 0x49d   : > { %v5251_v21 = vpop.f32.mrf.mxu0 }
 0x517   : > { %v5269_v1 = vpop.f32.mrf.mxu1 }
 0x519   : > { %v5270_v5 = vpop.f32.mrf.mxu1  ;;  %4516 = sbr.rel (%p4617_p10) target bundleno = 1314 (0x522), region = 79 }
 0x51a   : > { %v5271_v63 = vadd.f32 %v5270_v5, %v5269_v1 }
 0x51b   : > { %v5272_v2 = vpop.f32.mrf.mxu1 }
 0x51c   : > { %v4509_v36 = vadd.f32 %v5271_v63, %v5249_v26 }
 0x51d   : > { %v5273_v38 = vpop.f32.mrf.mxu1 }
 0x51e   : > { %v5022_v42 = vld [vmem:[%s7481_s6] ss:$0 sm:$0xff] }
 0x51f   : > { %v4524_v6 = vadd.f32 %v5022_v42, %v4509_v36 }
 0x521   : > { %4525 = vst [vmem:[#allocation5] sm:$0x3] %v4524_v6 }
 0x522 PF: > { %p5023_p11 = scmp.le.s32.totalorder %s6004_s27, 0 }
 0x524   : > { %4529 = sbr.rel (%p5023_p11) target bundleno = 1325 (0x52d), region = 83 }
 0x529   : > { %v4530_v15 = vld [vmem:[#allocation5] sm:$0x3] }
 0x52a   : > { %v4531_v24 = vadd.f32 %v4530_v15, %v4509_v36 }
 0x52c   : > { %4532 = vst [vmem:[#allocation5] sm:$0x3] %v4531_v24 }
 0x52d PF: > { %p5315_p12 = scmp.eq.s32.totalorder %s6004_s27, 3  ;;  %s5947_s30 = smov [#allocation5]  }
 0x52e   : > { %s4540_s15 = sshll.u32 %s5947_s30, 4  ;;  %s4541_s15 = int_to_ptr.vmem [resolvable:$true] %s4540_s15 }
 0x52f   : > { %s5892_s16 = scalar_lea.vmem %s4541_s15, 32  ;;  %p5899_p2 = scmp.lt.s32.totalorder %s4541_s15, %s4541_s15 }
 0x530   : > { %p5893_p13 = scmp.ne.s32.totalorder %s4541_s15, %s5892_s16  ;;  %p5900_p3 = scmp.lt.s32.totalorder %s5892_s16, %s5892_s16 }
 0x532   : > { %p5894_p0 = pnand %p5893_p13, %p5315_p12  ;;  %p5901_p4 = por %p5900_p3, %p5899_p2 }
 0x534   : > { %p5895_p1 = pneg %p5894_p0 }
 0x536   : > { %p5902_p5 = pnand %p5901_p4, %p5895_p1 }
 0x538   : > { %5905 = shalt.err (!%p5902_p5)
}
 0x539   : > { %5312 = dma.vmem_to_hbm [thread:$0]  (%p5315_p12), %s4541_s15, 32, %s7482_s7, [#allocation6]  }
 0x53a   : > { %5929 = dma.done.wait (%p5315_p12), [#allocation6], 32  }
 0x53b   : > { %5931 = vsyncadd (%p5315_p12), [#allocation6], 4294967264 }
 0x53c PF: > { %p15_p6 = scmp.ge.s32.totalorder %s6007_s28, 6   ;;  %s7499_s24 = smov %s5938_s25 }
 0x53d   : > { %s7500_s25 = smov %s6016_s8  ;;  %s7501_s26 = smov %s6007_s28 }
 0x53e   :  { %17 = sbr.rel (!%p15_p6) target bundleno = 2 (0x2), region = 121 }
 0x543   :  { %4553 = vsyncpa [#allocation6], 1 }
 0x544   :  { %4555 = vsyncpa [#allocation6 + $0x1], 1 }

</bundles_post_ra>
